<compile_context>
chip_gen: v5e
topology: v5e:2x2
jax: 0.10.0
libtpu: 0.0.40
codegen_flags: <defaults>
</compile_context>

<pallas_src>
import functools

import jax
import jax.numpy as jnp
from jax.experimental import pallas as pl
from jax.experimental.pallas import tpu as pltpu

CONV_FEATS = 3136  # 64 * 7 * 7, matches conv_output_size in the PyTorch module


def _round_up(x, m):
    return (x + m - 1) // m * m


def _pick_row_tile(m, tm_max):
    """Row tile: multiple of 16 sublanes (bf16 packing), capped at tm_max."""
    if m < 16:
        return m  # full-dims block is always legal
    return min(tm_max, _round_up(m, 16))


# --------------------- tiled matmul + bias + activation ----------------------
def _mm_bias_act_kernel(x_ref, w_ref, b_ref, o_ref, *, act):
    # bf16 x bf16 -> f32 accumulate on the MXU; bias/activation in f32 on the VPU.
    y = jnp.dot(x_ref[...], w_ref[...], preferred_element_type=jnp.float32)
    y = y + b_ref[...]
    if act == "relu":
        y = jnp.maximum(y, 0.0)
    elif act == "tanh":
        y = jnp.tanh(y)
    o_ref[...] = y.astype(o_ref.dtype)


def matmul_bias_act(x, w, b2d, act="none", out_dtype=jnp.float32, tm_max=1024):
    """y = act(x @ w + b), tiled over rows with pipelined double-buffered DMA."""
    M, K = x.shape
    K2, N = w.shape
    assert K == K2, (K, K2)
    tm = _pick_row_tile(M, tm_max)
    grid = (pl.cdiv(M, tm),)
    kernel = functools.partial(_mm_bias_act_kernel, act=act)
    return pl.pallas_call(
        kernel,
        out_shape=jax.ShapeDtypeStruct((M, N), out_dtype),
        grid_spec=pltpu.PrefetchScalarGridSpec(
            num_scalar_prefetch=0,
            grid=grid,
            in_specs=[
                pl.BlockSpec((tm, K), lambda i: (i, 0)),
                pl.BlockSpec((K, N), lambda i: (0, 0)),
                pl.BlockSpec((1, N), lambda i: (0, 0)),
            ],
            out_specs=pl.BlockSpec((tm, N), lambda i: (i, 0)),
        ),
        compiler_params=pltpu.CompilerParams(
            dimension_semantics=("parallel",)),
    )(x, w, b2d)


# ------------------------------ conv via im2col ------------------------------
def conv2d_relu_nhwc(x, w_mat, b2d, k, stride):
    """Valid-padding Conv2d (PyTorch semantics) + ReLU on NHWC activations.

    w_mat is the pre-reshaped (k*k*Cin, Cout) bf16 weight matrix whose row
    order matches the (kh, kw, C) patch layout built below.
    """
    # TODO(synk): patch extraction is still materialized in XLA (NHWC so slices
    # are channel-contiguous); fully fusing it into the kernel would need a
    # manual strided-DMA gather per (kh, kw) offset.
    N, H, W, C = x.shape
    Ho = (H - k) // stride + 1
    Wo = (W - k) // stride + 1
    cols = []
    for i in range(k):
        for j in range(k):
            cols.append(x[:, i:i + stride * Ho:stride, j:j + stride * Wo:stride, :])
    patches = jnp.stack(cols, axis=3)                 # (N, Ho, Wo, k*k, C)
    patches = patches.reshape(N * Ho * Wo, k * k * C)
    out = matmul_bias_act(patches, w_mat, b2d, act="relu", out_dtype=jnp.bfloat16)
    return out.reshape(N, Ho, Wo, w_mat.shape[1])     # stays NHWC (no transpose)


# --------------------------- fused MLP head kernel ----------------------------
def _mlp_head_kernel(*refs, n_layers, ac_dim):
    # refs: feat, acs, w0_feat, w0_ac, b0, [w_i, b_i]*(n_layers-1), w_out, b_out, out
    feat_ref, acs_ref, w0f_ref, w0a_ref, b0_ref = refs[:5]
    o_ref = refs[-1]

    # Feature part of the first layer: big lane-aligned bf16 MXU matmul.
    h = jnp.dot(feat_ref[...], w0f_ref[...], preferred_element_type=jnp.float32)
    h = h + b0_ref[...]

    # Action part: tiny K (=ac_dim) contraction as unrolled VPU multiply-adds
    # (replaces the XLA concat + misaligned K=3136+ac_dim matmul).
    acs = acs_ref[...]
    w0a = w0a_ref[...]
    for kk in range(ac_dim):
        h = h + acs[:, kk:kk + 1] * w0a[kk:kk + 1, :]

    idx = 5
    if n_layers >= 1:
        h = jnp.tanh(h)
        for _ in range(n_layers - 1):
            w_ref, b_ref = refs[idx], refs[idx + 1]
            idx += 2
            h = jnp.tanh(
                jnp.dot(h.astype(jnp.bfloat16), w_ref[...],
                        preferred_element_type=jnp.float32) + b_ref[...])
        w_out_ref, b_out_ref = refs[idx], refs[idx + 1]
        h = jnp.dot(h.astype(jnp.bfloat16), w_out_ref[...],
                    preferred_element_type=jnp.float32) + b_out_ref[...]
    o_ref[...] = h.astype(o_ref.dtype)


def mlp_head(feats, acs, mlp_ops, n_layers, tm_max=512):
    """All FC layers fused into one Pallas kernel; h never leaves VMEM."""
    M, D = feats.shape
    A = acs.shape[1]
    tm = _pick_row_tile(M, tm_max)
    grid = (pl.cdiv(M, tm),)
    in_specs = [
        pl.BlockSpec((tm, D), lambda i: (i, 0)),
        pl.BlockSpec((tm, A), lambda i: (i, 0)),
    ]
    for op in mlp_ops:  # weights/biases: one full-array block, revisited per tile
        in_specs.append(pl.BlockSpec(op.shape, lambda i: (0, 0)))
    kernel = functools.partial(_mlp_head_kernel, n_layers=n_layers, ac_dim=A)
    return pl.pallas_call(
        kernel,
        out_shape=jax.ShapeDtypeStruct((M, 1), jnp.float32),
        grid_spec=pltpu.PrefetchScalarGridSpec(
            num_scalar_prefetch=0,
            grid=grid,
            in_specs=in_specs,
            out_specs=pl.BlockSpec((tm, 1), lambda i: (i, 0)),
        ),
        compiler_params=pltpu.CompilerParams(
            dimension_semantics=("parallel",)),
    )(feats, acs, *mlp_ops)


# ------------------------------ parameters -----------------------------------
def init_params(key, ac_dim, n_layers, size):
    """PyTorch-style (uniform +-1/sqrt(fan_in)) init with PyTorch layouts."""
    def lin(k, fan_in, shape):
        bound = 1.0 / float(fan_in) ** 0.5
        return jax.random.uniform(k, shape, jnp.float32, -bound, bound)

    ks = iter(jax.random.split(key, 6 + 2 * n_layers + 2))
    p = {}
    p["conv1_w"] = lin(next(ks), 4 * 8 * 8, (32, 4, 8, 8))
    p["conv1_b"] = lin(next(ks), 4 * 8 * 8, (32,))
    p["conv2_w"] = lin(next(ks), 32 * 4 * 4, (64, 32, 4, 4))
    p["conv2_b"] = lin(next(ks), 32 * 4 * 4, (64,))
    p["conv3_w"] = lin(next(ks), 64 * 3 * 3, (64, 64, 3, 3))
    p["conv3_b"] = lin(next(ks), 64 * 3 * 3, (64,))
    in_dim = CONV_FEATS + ac_dim
    for i in range(n_layers):
        p[f"fc{i}_w"] = lin(next(ks), in_dim, (in_dim, size))
        p[f"fc{i}_b"] = lin(next(ks), in_dim, (size,))
        in_dim = size
    p["out_w"] = lin(next(ks), in_dim, (in_dim, 1))
    p["out_b"] = lin(next(ks), in_dim, (1,))
    return p


def prepare_params(params, n_layers):
    """One-time conversion into kernel-friendly layout: bf16 matmul weights in
    im2col (kh,kw,C) row order, (1,N) f32 biases, /255 folded into conv1, and
    the first FC weight split into feature / action parts."""
    bf16, f32 = jnp.bfloat16, jnp.float32

    def conv_mat(w, scale=1.0):
        cout, cin, kh, kw = w.shape
        m = jnp.transpose(w, (2, 3, 1, 0)).reshape(kh * kw * cin, cout)
        return (m * scale).astype(bf16)

    prep = {
        "c1w": conv_mat(params["conv1_w"], 1.0 / 255.0),  # fold pixel normalization
        "c1b": params["conv1_b"].reshape(1, -1).astype(f32),
        "c2w": conv_mat(params["conv2_w"]),
        "c2b": params["conv2_b"].reshape(1, -1).astype(f32),
        "c3w": conv_mat(params["conv3_w"]),
        "c3b": params["conv3_b"].reshape(1, -1).astype(f32),
    }
    ops = []
    if n_layers == 0:
        w, b = params["out_w"], params["out_b"]
        ops += [w[:CONV_FEATS].astype(bf16), w[CONV_FEATS:].astype(f32),
                b.reshape(1, -1).astype(f32)]
    else:
        w, b = params["fc0_w"], params["fc0_b"]
        ops += [w[:CONV_FEATS].astype(bf16), w[CONV_FEATS:].astype(f32),
                b.reshape(1, -1).astype(f32)]
        for i in range(1, n_layers):
            ops += [params[f"fc{i}_w"].astype(bf16),
                    params[f"fc{i}_b"].reshape(1, -1).astype(f32)]
        ops += [params["out_w"].astype(bf16),
                params["out_b"].reshape(1, -1).astype(f32)]
    prep["mlp_ops"] = tuple(ops)
    return prep


# ------------------------------ forward pass ----------------------------------
def state_action_critic_forward(prep, obs, acs, n_layers):
    # Mirror the 5D-obs / 3D-acs branch by flattening leading dims (same math as
    # the per-slice Python loop in the PyTorch forward).
    if obs.ndim == 5 and acs.ndim == 3:
        lead = obs.shape[:2]
        q = state_action_critic_forward(
            prep, obs.reshape((-1,) + obs.shape[2:]),
            acs.reshape((-1, acs.shape[-1])), n_layers)
        return q.reshape(lead)

    assert obs.shape[1:] == (4, 96, 96), obs.shape
    n = obs.shape[0]
    # TODO(synk): exact crop offsets / normalization of PreprocessCarRacing are
    # assumed (top 84 rows, width center-crop 6:90, divide by 255 — the /255 is
    # folded into conv1's weights in prepare_params).
    x = obs[:, :, :84, 6:90]
    x = jnp.transpose(x, (0, 2, 3, 1)).astype(jnp.bfloat16)   # NHWC for the conv stack

    x = conv2d_relu_nhwc(x, prep["c1w"], prep["c1b"], k=8, stride=4)   # (n, 20, 20, 32)
    x = conv2d_relu_nhwc(x, prep["c2w"], prep["c2b"], k=4, stride=2)   # (n, 9, 9, 64)
    x = conv2d_relu_nhwc(x, prep["c3w"], prep["c3b"], k=3, stride=1)   # (n, 7, 7, 64)

    # Restore PyTorch nn.Flatten (NCHW -> C,H,W) order with one small transpose.
    feats = jnp.transpose(x, (0, 3, 1, 2)).reshape(n, CONV_FEATS)

    q = mlp_head(feats, acs.astype(jnp.float32), prep["mlp_ops"], n_layers)
    return q[:, 0]                                            # .squeeze(-1)


# --------------------------- pure-JAX f32 reference ---------------------------
def reference_forward(params, obs, acs, n_layers):
    x = obs[:, :, :84, 6:90].astype(jnp.float32) / 255.0

    def conv(x, w, b, stride):
        y = jax.lax.conv_general_dilated(
            x, w, window_strides=(stride, stride), padding="VALID",
            dimension_numbers=("NCHW", "OIHW", "NCHW"))
        return jax.nn.relu(y + b[None, :, None, None])

    x = conv(x, params["conv1_w"], params["conv1_b"], 4)
    x = conv(x, params["conv2_w"], params["conv2_b"], 2)
    x = conv(x, params["conv3_w"], params["conv3_b"], 1)
    h = jnp.concatenate([x.reshape(x.shape[0], -1), acs.astype(jnp.float32)], axis=-1)
    for i in range(n_layers):
        h = jnp.tanh(h @ params[f"fc{i}_w"] + params[f"fc{i}_b"])
    return (h @ params["out_w"] + params["out_b"])[:, 0]


# ---------------------------------- main --------------------------------------
if __name__ == "__main__":
    batch = 2
    ac_dim = 3
    n_layers = 2
    size = 64

    key = jax.random.PRNGKey(0)
    k_obs, k_acs, k_params = jax.random.split(key, 3)

    # obs simulates uint8-style pixels in [0, 255); acs are continuous actions.
    obs = jax.random.uniform(k_obs, (batch, 4, 96, 96), jnp.float32, 0.0, 255.0)
    acs = jax.random.normal(k_acs, (batch, ac_dim), jnp.float32)

    params = init_params(k_params, ac_dim, n_layers, size)
    prep = prepare_params(params, n_layers)

    fwd = jax.jit(functools.partial(state_action_critic_forward, n_layers=n_layers))
    q_values = jax.block_until_ready(fwd(prep, obs, acs))

    assert q_values.shape == (batch,), q_values.shape
    assert bool(jnp.all(jnp.isfinite(q_values)))

    # Loose tolerance: kernel path feeds the MXU bf16 inputs (f32 accumulate).
    q_ref = jax.block_until_ready(
        jax.jit(functools.partial(reference_forward, n_layers=n_layers))(params, obs, acs))
    assert jnp.allclose(q_values, q_ref, atol=1e-1, rtol=1e-1), (q_values, q_ref)

    print("KERNEL_OK")
</pallas_src>

<mosaic_0001>
module attributes {stable_mosaic.version = 11 : i64} {
  func.func @_mm_bias_act_kernel(%arg0: i32, %arg1: memref<800x256xbf16, #tpu.memory_space<vmem>>, %arg2: memref<256x32xbf16, #tpu.memory_space<vmem>>, %arg3: memref<1x32xf32, #tpu.memory_space<vmem>>, %arg4: memref<800x32xbf16, #tpu.memory_space<vmem>>) attributes {dimension_semantics = [#tpu.dimension_semantics<parallel>], iteration_bounds = array<i64: 1>, scalar_prefetch = 0 : i64, scratch_operands = 0 : i64, tpu.core_type = #tpu.core_type<tc>, window_params = [{transform_indices = @transform_0, window_bounds = array<i64: 800, 256>}, {pipeline_mode = #tpu.pipeline_mode<synchronous>, transform_indices = @transform_1, window_bounds = array<i64: 256, 32>}, {pipeline_mode = #tpu.pipeline_mode<synchronous>, transform_indices = @transform_2, window_bounds = array<i64: 1, 32>}, {transform_indices = @transform_3, window_bounds = array<i64: 800, 32>}]} {
    %c0 = arith.constant 0 : index
    %c0_0 = arith.constant 0 : index
    %0 = vector.load %arg1[%c0, %c0_0] : memref<800x256xbf16, #tpu.memory_space<vmem>>, vector<800x256xbf16>
    %c0_1 = arith.constant 0 : index
    %c0_2 = arith.constant 0 : index
    %1 = vector.load %arg2[%c0_1, %c0_2] : memref<256x32xbf16, #tpu.memory_space<vmem>>, vector<256x32xbf16>
    %cst = arith.constant dense<0.000000e+00> : vector<800x32xf32>
    %2 = tpu.matmul %0, %1, %cst {dimension_numbers = #tpu.dot_dimension_numbers<[1], [0], [0], [1], [0, 0, 1, 1], [], []>} : vector<800x256xbf16>, vector<256x32xbf16>, vector<800x32xf32> -> vector<800x32xf32>
    %c0_3 = arith.constant 0 : index
    %c0_4 = arith.constant 0 : index
    %3 = vector.load %arg3[%c0_3, %c0_4] : memref<1x32xf32, #tpu.memory_space<vmem>>, vector<1x32xf32>
    %4 = vector.broadcast %3 : vector<1x32xf32> to vector<800x32xf32>
    %5 = arith.addf %2, %4 : vector<800x32xf32>
    %cst_5 = arith.constant 0.000000e+00 : f32
    %6 = vector.broadcast %cst_5 : f32 to vector<800x32xf32>
    %7 = arith.maximumf %5, %6 : vector<800x32xf32>
    %8 = arith.truncf %7 : vector<800x32xf32> to vector<800x32xbf16>
    %c0_6 = arith.constant 0 : index
    %c0_7 = arith.constant 0 : index
    %9 = vector.load %arg4[%c0_6, %c0_7] : memref<800x32xbf16, #tpu.memory_space<vmem>>, vector<800x32xbf16>
    tpu.vector_store %arg4[%c0_6, %c0_7], %8 {strides = array<i32>} : memref<800x32xbf16, #tpu.memory_space<vmem>>, vector<800x32xbf16>,
    return
  }
  func.func @transform_0(%arg0: i32) -> (i32, i32) {
    %c0_i32 = arith.constant 0 : i32
    %c0_i32_0 = arith.constant 0 : i32
    return %arg0, %c0_i32 : i32, i32
  }
  func.func @transform_1(%arg0: i32) -> (i32, i32) {
    %c0_i32 = arith.constant 0 : i32
    %c0_i32_0 = arith.constant 0 : i32
    %c0_i32_1 = arith.constant 0 : i32
    return %c0_i32, %c0_i32_0 : i32, i32
  }
  func.func @transform_2(%arg0: i32) -> (i32, i32) {
    %c0_i32 = arith.constant 0 : i32
    %c0_i32_0 = arith.constant 0 : i32
    %c0_i32_1 = arith.constant 0 : i32
    return %c0_i32, %c0_i32_0 : i32, i32
  }
  func.func @transform_3(%arg0: i32) -> (i32, i32) {
    %c0_i32 = arith.constant 0 : i32
    %c0_i32_0 = arith.constant 0 : i32
    return %arg0, %c0_i32 : i32, i32
  }
}

module attributes {stable_mosaic.version = 11 : i64} {
  func.func @_mm_bias_act_kernel(%arg0: i32, %arg1: memref<176x512xbf16, #tpu.memory_space<vmem>>, %arg2: memref<512x64xbf16, #tpu.memory_space<vmem>>, %arg3: memref<1x64xf32, #tpu.memory_space<vmem>>, %arg4: memref<176x64xbf16, #tpu.memory_space<vmem>>) attributes {dimension_semantics = [#tpu.dimension_semantics<parallel>], iteration_bounds = array<i64: 1>, scalar_prefetch = 0 : i64, scratch_operands = 0 : i64, tpu.core_type = #tpu.core_type<tc>, window_params = [{transform_indices = @transform_0, window_bounds = array<i64: 176, 512>}, {pipeline_mode = #tpu.pipeline_mode<synchronous>, transform_indices = @transform_1, window_bounds = array<i64: 512, 64>}, {pipeline_mode = #tpu.pipeline_mode<synchronous>, transform_indices = @transform_2, window_bounds = array<i64: 1, 64>}, {transform_indices = @transform_3, window_bounds = array<i64: 176, 64>}]} {
    %c0 = arith.constant 0 : index
    %c0_0 = arith.constant 0 : index
    %0 = vector.load %arg1[%c0, %c0_0] : memref<176x512xbf16, #tpu.memory_space<vmem>>, vector<176x512xbf16>
    %c0_1 = arith.constant 0 : index
    %c0_2 = arith.constant 0 : index
    %1 = vector.load %arg2[%c0_1, %c0_2] : memref<512x64xbf16, #tpu.memory_space<vmem>>, vector<512x64xbf16>
    %cst = arith.constant dense<0.000000e+00> : vector<176x64xf32>
    %2 = tpu.matmul %0, %1, %cst {dimension_numbers = #tpu.dot_dimension_numbers<[1], [0], [0], [1], [0, 0, 1, 1], [], []>} : vector<176x512xbf16>, vector<512x64xbf16>, vector<176x64xf32> -> vector<176x64xf32>
    %c0_3 = arith.constant 0 : index
    %c0_4 = arith.constant 0 : index
    %3 = vector.load %arg3[%c0_3, %c0_4] : memref<1x64xf32, #tpu.memory_space<vmem>>, vector<1x64xf32>
    %4 = vector.broadcast %3 : vector<1x64xf32> to vector<176x64xf32>
    %5 = arith.addf %2, %4 : vector<176x64xf32>
    %cst_5 = arith.constant 0.000000e+00 : f32
    %6 = vector.broadcast %cst_5 : f32 to vector<176x64xf32>
    %7 = arith.maximumf %5, %6 : vector<176x64xf32>
    %8 = arith.truncf %7 : vector<176x64xf32> to vector<176x64xbf16>
    %c0_6 = arith.constant 0 : index
    %c0_7 = arith.constant 0 : index
    %9 = vector.load %arg4[%c0_6, %c0_7] : memref<176x64xbf16, #tpu.memory_space<vmem>>, vector<176x64xbf16>
    tpu.vector_store %arg4[%c0_6, %c0_7], %8 {strides = array<i32>} : memref<176x64xbf16, #tpu.memory_space<vmem>>, vector<176x64xbf16>,
    return
  }
  func.func @transform_0(%arg0: i32) -> (i32, i32) {
    %c0_i32 = arith.constant 0 : i32
    %c0_i32_0 = arith.constant 0 : i32
    return %arg0, %c0_i32 : i32, i32
  }
  func.func @transform_1(%arg0: i32) -> (i32, i32) {
    %c0_i32 = arith.constant 0 : i32
    %c0_i32_0 = arith.constant 0 : i32
    %c0_i32_1 = arith.constant 0 : i32
    return %c0_i32, %c0_i32_0 : i32, i32
  }
  func.func @transform_2(%arg0: i32) -> (i32, i32) {
    %c0_i32 = arith.constant 0 : i32
    %c0_i32_0 = arith.constant 0 : i32
    %c0_i32_1 = arith.constant 0 : i32
    return %c0_i32, %c0_i32_0 : i32, i32
  }
  func.func @transform_3(%arg0: i32) -> (i32, i32) {
    %c0_i32 = arith.constant 0 : i32
    %c0_i32_0 = arith.constant 0 : i32
    return %arg0, %c0_i32 : i32, i32
  }
}

module attributes {stable_mosaic.version = 11 : i64} {
  func.func @_mm_bias_act_kernel(%arg0: i32, %arg1: memref<112x576xbf16, #tpu.memory_space<vmem>>, %arg2: memref<576x64xbf16, #tpu.memory_space<vmem>>, %arg3: memref<1x64xf32, #tpu.memory_space<vmem>>, %arg4: memref<112x64xbf16, #tpu.memory_space<vmem>>) attributes {dimension_semantics = [#tpu.dimension_semantics<parallel>], iteration_bounds = array<i64: 1>, scalar_prefetch = 0 : i64, scratch_operands = 0 : i64, tpu.core_type = #tpu.core_type<tc>, window_params = [{transform_indices = @transform_0, window_bounds = array<i64: 112, 576>}, {pipeline_mode = #tpu.pipeline_mode<synchronous>, transform_indices = @transform_1, window_bounds = array<i64: 576, 64>}, {pipeline_mode = #tpu.pipeline_mode<synchronous>, transform_indices = @transform_2, window_bounds = array<i64: 1, 64>}, {transform_indices = @transform_3, window_bounds = array<i64: 112, 64>}]} {
    %c0 = arith.constant 0 : index
    %c0_0 = arith.constant 0 : index
    %0 = vector.load %arg1[%c0, %c0_0] : memref<112x576xbf16, #tpu.memory_space<vmem>>, vector<112x576xbf16>
    %c0_1 = arith.constant 0 : index
    %c0_2 = arith.constant 0 : index
    %1 = vector.load %arg2[%c0_1, %c0_2] : memref<576x64xbf16, #tpu.memory_space<vmem>>, vector<576x64xbf16>
    %cst = arith.constant dense<0.000000e+00> : vector<112x64xf32>
    %2 = tpu.matmul %0, %1, %cst {dimension_numbers = #tpu.dot_dimension_numbers<[1], [0], [0], [1], [0, 0, 1, 1], [], []>} : vector<112x576xbf16>, vector<576x64xbf16>, vector<112x64xf32> -> vector<112x64xf32>
    %c0_3 = arith.constant 0 : index
    %c0_4 = arith.constant 0 : index
    %3 = vector.load %arg3[%c0_3, %c0_4] : memref<1x64xf32, #tpu.memory_space<vmem>>, vector<1x64xf32>
    %4 = vector.broadcast %3 : vector<1x64xf32> to vector<112x64xf32>
    %5 = arith.addf %2, %4 : vector<112x64xf32>
    %cst_5 = arith.constant 0.000000e+00 : f32
    %6 = vector.broadcast %cst_5 : f32 to vector<112x64xf32>
    %7 = arith.maximumf %5, %6 : vector<112x64xf32>
    %8 = arith.truncf %7 : vector<112x64xf32> to vector<112x64xbf16>
    %c0_6 = arith.constant 0 : index
    %c0_7 = arith.constant 0 : index
    %9 = vector.load %arg4[%c0_6, %c0_7] : memref<112x64xbf16, #tpu.memory_space<vmem>>, vector<112x64xbf16>
    tpu.vector_store %arg4[%c0_6, %c0_7], %8 {strides = array<i32>} : memref<112x64xbf16, #tpu.memory_space<vmem>>, vector<112x64xbf16>,
    return
  }
  func.func @transform_0(%arg0: i32) -> (i32, i32) {
    %c0_i32 = arith.constant 0 : i32
    %c0_i32_0 = arith.constant 0 : i32
    return %arg0, %c0_i32 : i32, i32
  }
  func.func @transform_1(%arg0: i32) -> (i32, i32) {
    %c0_i32 = arith.constant 0 : i32
    %c0_i32_0 = arith.constant 0 : i32
    %c0_i32_1 = arith.constant 0 : i32
    return %c0_i32, %c0_i32_0 : i32, i32
  }
  func.func @transform_2(%arg0: i32) -> (i32, i32) {
    %c0_i32 = arith.constant 0 : i32
    %c0_i32_0 = arith.constant 0 : i32
    %c0_i32_1 = arith.constant 0 : i32
    return %c0_i32, %c0_i32_0 : i32, i32
  }
  func.func @transform_3(%arg0: i32) -> (i32, i32) {
    %c0_i32 = arith.constant 0 : i32
    %c0_i32_0 = arith.constant 0 : i32
    return %arg0, %c0_i32 : i32, i32
  }
}

module attributes {stable_mosaic.version = 11 : i64} {
  func.func @_mlp_head_kernel(%arg0: i32, %arg1: memref<2x3136xbf16, #tpu.memory_space<vmem>>, %arg2: memref<2x3xf32, #tpu.memory_space<vmem>>, %arg3: memref<3136x64xbf16, #tpu.memory_space<vmem>>, %arg4: memref<3x64xf32, #tpu.memory_space<vmem>>, %arg5: memref<1x64xf32, #tpu.memory_space<vmem>>, %arg6: memref<64x64xbf16, #tpu.memory_space<vmem>>, %arg7: memref<1x64xf32, #tpu.memory_space<vmem>>, %arg8: memref<64x1xbf16, #tpu.memory_space<vmem>>, %arg9: memref<1x1xf32, #tpu.memory_space<vmem>>, %arg10: memref<2x1xf32, #tpu.memory_space<vmem>>) attributes {dimension_semantics = [#tpu.dimension_semantics<parallel>], iteration_bounds = array<i64: 1>, scalar_prefetch = 0 : i64, scratch_operands = 0 : i64, tpu.core_type = #tpu.core_type<tc>, window_params = [{transform_indices = @transform_0, window_bounds = array<i64: 2, 3136>}, {transform_indices = @transform_1, window_bounds = array<i64: 2, 3>}, {pipeline_mode = #tpu.pipeline_mode<synchronous>, transform_indices = @transform_2, window_bounds = array<i64: 3136, 64>}, {pipeline_mode = #tpu.pipeline_mode<synchronous>, transform_indices = @transform_3, window_bounds = array<i64: 3, 64>}, {pipeline_mode = #tpu.pipeline_mode<synchronous>, transform_indices = @transform_4, window_bounds = array<i64: 1, 64>}, {pipeline_mode = #tpu.pipeline_mode<synchronous>, transform_indices = @transform_5, window_bounds = array<i64: 64, 64>}, {pipeline_mode = #tpu.pipeline_mode<synchronous>, transform_indices = @transform_6, window_bounds = array<i64: 1, 64>}, {pipeline_mode = #tpu.pipeline_mode<synchronous>, transform_indices = @transform_7, window_bounds = array<i64: 64, 1>}, {pipeline_mode = #tpu.pipeline_mode<synchronous>, transform_indices = @transform_8, window_bounds = array<i64: 1, 1>}, {transform_indices = @transform_9, window_bounds = array<i64: 2, 1>}]} {
    %c0 = arith.constant 0 : index
    %c0_0 = arith.constant 0 : index
    %0 = vector.load %arg1[%c0, %c0_0] : memref<2x3136xbf16, #tpu.memory_space<vmem>>, vector<2x3136xbf16>
    %c0_1 = arith.constant 0 : index
    %c0_2 = arith.constant 0 : index
    %1 = vector.load %arg3[%c0_1, %c0_2] : memref<3136x64xbf16, #tpu.memory_space<vmem>>, vector<3136x64xbf16>
    %cst = arith.constant dense<0.000000e+00> : vector<2x64xf32>
    %2 = tpu.matmul %0, %1, %cst {dimension_numbers = #tpu.dot_dimension_numbers<[1], [0], [0], [1], [0, 0, 1, 1], [], []>} : vector<2x3136xbf16>, vector<3136x64xbf16>, vector<2x64xf32> -> vector<2x64xf32>
    %c0_3 = arith.constant 0 : index
    %c0_4 = arith.constant 0 : index
    %3 = vector.load %arg5[%c0_3, %c0_4] : memref<1x64xf32, #tpu.memory_space<vmem>>, vector<1x64xf32>
    %4 = vector.broadcast %3 : vector<1x64xf32> to vector<2x64xf32>
    %5 = arith.addf %2, %4 : vector<2x64xf32>
    %c0_5 = arith.constant 0 : index
    %c0_6 = arith.constant 0 : index
    %6 = vector.load %arg2[%c0_5, %c0_6] : memref<2x3xf32, #tpu.memory_space<vmem>>, vector<2x3xf32>
    %c0_7 = arith.constant 0 : index
    %c0_8 = arith.constant 0 : index
    %7 = vector.load %arg4[%c0_7, %c0_8] : memref<3x64xf32, #tpu.memory_space<vmem>>, vector<3x64xf32>
    %8 = vector.extract_strided_slice %6 {offsets = [0, 0], sizes = [2, 1], strides = [1, 1]} : vector<2x3xf32> to vector<2x1xf32>
    %9 = vector.extract_strided_slice %7 {offsets = [0, 0], sizes = [1, 64], strides = [1, 1]} : vector<3x64xf32> to vector<1x64xf32>
    %10 = vector.broadcast %8 : vector<2x1xf32> to vector<2x64xf32>
    %11 = vector.broadcast %9 : vector<1x64xf32> to vector<2x64xf32>
    %12 = arith.mulf %10, %11 : vector<2x64xf32>
    %13 = arith.addf %5, %12 : vector<2x64xf32>
    %14 = vector.extract_strided_slice %6 {offsets = [0, 1], sizes = [2, 1], strides = [1, 1]} : vector<2x3xf32> to vector<2x1xf32>
    %15 = vector.extract_strided_slice %7 {offsets = [1, 0], sizes = [1, 64], strides = [1, 1]} : vector<3x64xf32> to vector<1x64xf32>
    %16 = vector.broadcast %14 : vector<2x1xf32> to vector<2x64xf32>
    %17 = vector.broadcast %15 : vector<1x64xf32> to vector<2x64xf32>
    %18 = arith.mulf %16, %17 : vector<2x64xf32>
    %19 = arith.addf %13, %18 : vector<2x64xf32>
    %20 = vector.extract_strided_slice %6 {offsets = [0, 2], sizes = [2, 1], strides = [1, 1]} : vector<2x3xf32> to vector<2x1xf32>
    %21 = vector.extract_strided_slice %7 {offsets = [2, 0], sizes = [1, 64], strides = [1, 1]} : vector<3x64xf32> to vector<1x64xf32>
    %22 = vector.broadcast %20 : vector<2x1xf32> to vector<2x64xf32>
    %23 = vector.broadcast %21 : vector<1x64xf32> to vector<2x64xf32>
    %24 = arith.mulf %22, %23 : vector<2x64xf32>
    %25 = arith.addf %19, %24 : vector<2x64xf32>
    %26 = math.tanh %25 : vector<2x64xf32>
    %27 = arith.truncf %26 : vector<2x64xf32> to vector<2x64xbf16>
    %c0_9 = arith.constant 0 : index
    %c0_10 = arith.constant 0 : index
    %28 = vector.load %arg6[%c0_9, %c0_10] : memref<64x64xbf16, #tpu.memory_space<vmem>>, vector<64x64xbf16>
    %cst_11 = arith.constant dense<0.000000e+00> : vector<2x64xf32>
    %29 = tpu.matmul %27, %28, %cst_11 {dimension_numbers = #tpu.dot_dimension_numbers<[1], [0], [0], [1], [0, 0, 1, 1], [], []>} : vector<2x64xbf16>, vector<64x64xbf16>, vector<2x64xf32> -> vector<2x64xf32>
    %c0_12 = arith.constant 0 : index
    %c0_13 = arith.constant 0 : index
    %30 = vector.load %arg7[%c0_12, %c0_13] : memref<1x64xf32, #tpu.memory_space<vmem>>, vector<1x64xf32>
    %31 = vector.broadcast %30 : vector<1x64xf32> to vector<2x64xf32>
    %32 = arith.addf %29, %31 : vector<2x64xf32>
    %33 = math.tanh %32 : vector<2x64xf32>
    %34 = arith.truncf %33 : vector<2x64xf32> to vector<2x64xbf16>
    %c0_14 = arith.constant 0 : index
    %c0_15 = arith.constant 0 : index
    %35 = vector.load %arg8[%c0_14, %c0_15] : memref<64x1xbf16, #tpu.memory_space<vmem>>, vector<64x1xbf16>
    %cst_16 = arith.constant dense<0.000000e+00> : vector<2x1xf32>
    %36 = tpu.matmul %34, %35, %cst_16 {dimension_numbers = #tpu.dot_dimension_numbers<[1], [0], [0], [1], [0, 0, 1, 1], [], []>} : vector<2x64xbf16>, vector<64x1xbf16>, vector<2x1xf32> -> vector<2x1xf32>
    %c0_17 = arith.constant 0 : index
    %c0_18 = arith.constant 0 : index
    %37 = vector.load %arg9[%c0_17, %c0_18] : memref<1x1xf32, #tpu.memory_space<vmem>>, vector<1x1xf32>
    %38 = vector.broadcast %37 : vector<1x1xf32> to vector<2x1xf32>
    %39 = arith.addf %36, %38 : vector<2x1xf32>
    %c0_19 = arith.constant 0 : index
    %c0_20 = arith.constant 0 : index
    %40 = vector.load %arg10[%c0_19, %c0_20] : memref<2x1xf32, #tpu.memory_space<vmem>>, vector<2x1xf32>
    tpu.vector_store %arg10[%c0_19, %c0_20], %39 {strides = array<i32>} : memref<2x1xf32, #tpu.memory_space<vmem>>, vector<2x1xf32>,
    return
  }
  func.func @transform_0(%arg0: i32) -> (i32, i32) {
    %c0_i32 = arith.constant 0 : i32
    %c0_i32_0 = arith.constant 0 : i32
    return %arg0, %c0_i32 : i32, i32
  }
  func.func @transform_1(%arg0: i32) -> (i32, i32) {
    %c0_i32 = arith.constant 0 : i32
    %c0_i32_0 = arith.constant 0 : i32
    return %arg0, %c0_i32 : i32, i32
  }
  func.func @transform_2(%arg0: i32) -> (i32, i32) {
    %c0_i32 = arith.constant 0 : i32
    %c0_i32_0 = arith.constant 0 : i32
    %c0_i32_1 = arith.constant 0 : i32
    return %c0_i32, %c0_i32_0 : i32, i32
  }
  func.func @transform_3(%arg0: i32) -> (i32, i32) {
    %c0_i32 = arith.constant 0 : i32
    %c0_i32_0 = arith.constant 0 : i32
    %c0_i32_1 = arith.constant 0 : i32
    return %c0_i32, %c0_i32_0 : i32, i32
  }
  func.func @transform_4(%arg0: i32) -> (i32, i32) {
    %c0_i32 = arith.constant 0 : i32
    %c0_i32_0 = arith.constant 0 : i32
    %c0_i32_1 = arith.constant 0 : i32
    return %c0_i32, %c0_i32_0 : i32, i32
  }
  func.func @transform_5(%arg0: i32) -> (i32, i32) {
    %c0_i32 = arith.constant 0 : i32
    %c0_i32_0 = arith.constant 0 : i32
    %c0_i32_1 = arith.constant 0 : i32
    return %c0_i32, %c0_i32_0 : i32, i32
  }
  func.func @transform_6(%arg0: i32) -> (i32, i32) {
    %c0_i32 = arith.constant 0 : i32
    %c0_i32_0 = arith.constant 0 : i32
    %c0_i32_1 = arith.constant 0 : i32
    return %c0_i32, %c0_i32_0 : i32, i32
  }
  func.func @transform_7(%arg0: i32) -> (i32, i32) {
    %c0_i32 = arith.constant 0 : i32
    %c0_i32_0 = arith.constant 0 : i32
    %c0_i32_1 = arith.constant 0 : i32
    return %c0_i32, %c0_i32_0 : i32, i32
  }
  func.func @transform_8(%arg0: i32) -> (i32, i32) {
    %c0_i32 = arith.constant 0 : i32
    %c0_i32_0 = arith.constant 0 : i32
    %c0_i32_1 = arith.constant 0 : i32
    return %c0_i32, %c0_i32_0 : i32, i32
  }
  func.func @transform_9(%arg0: i32) -> (i32, i32) {
    %c0_i32 = arith.constant 0 : i32
    %c0_i32_0 = arith.constant 0 : i32
    return %arg0, %c0_i32 : i32, i32
  }
}

</mosaic_0001>

<bundles_post_ra>
// kernel: state_action_critic_forward.4
= control target key start
LH: loop header
LB: loop body
LE: loop exit
PB: predicated region body
PF: predicated region fallthrough
CT: control target
= control target key end

     0   :  { %vm1464_vm0 = vcmask 257024   ;;  %s3345_s1 = inlined_call_operand.vmem [shape: bf16[256,32], index: 1, kind: input, shape index: {}]   ;;  %s3346_s2 = inlined_call_operand.vmem [shape: f32[1,32], index: 2, kind: input, shape index: {}]   ;;  %s3347_s0 = inlined_call_operand.vmem [shape: bf16[800,256], index: 0, kind: input, shape index: {}]   ;;  %s3348_s3 = inlined_call_operand.vmem [shape: bf16[800,32], index: 3, kind: output, shape index: {}]  }
   0x1   :  { %v2140_v0 = vld [vmem:[%s3345_s1 + $0x38] sm:$0xff]  ;;  %v2139_v2 = vld [vmem:[%s3345_s1 + $0x30] sm:$0xff]  ;;  %v2138_v4 = vld [vmem:[%s3345_s1 + $0x28] sm:$0xff] }
   0x2   :  { %v2148_v1 = vld [vmem:[%s3345_s1 + $0x78] sm:$0xff]  ;;  %746 = vmatpush.bf16.msra.mxu0 %v2140_v0  ;;  %2149 = vmatpush.bf16.msra.mxu2 %v2140_v0  ;;  %v2147_v3 = vld [vmem:[%s3345_s1 + $0x70] sm:$0xff]  ;;  %v2146_v5 = vld [vmem:[%s3345_s1 + $0x68] sm:$0xff] }
   0x3   :  { %1005 = vmatpush.bf16.msra.mxu1 %v2148_v1  ;;  %2157 = vmatpush.bf16.msra.mxu3 %v2148_v1  ;;  %v2137_v6 = vld [vmem:[%s3345_s1 + $0x20] sm:$0xff]  ;;  %v2136_v8 = vld [vmem:[%s3345_s1 + $0x18] sm:$0xff]  ;;  %v2135_v10 = vld [vmem:[%s3345_s1 + $0x10] sm:$0xff] }
   0x4   :  { %v2145_v7 = vld [vmem:[%s3345_s1 + $0x60] sm:$0xff]  ;;  %v2144_v9 = vld [vmem:[%s3345_s1 + $0x58] sm:$0xff]  ;;  %v2143_v11 = vld [vmem:[%s3345_s1 + $0x50] sm:$0xff] }
   0x5   :  { %v2134_v12 = vld [vmem:[%s3345_s1 + $0x8] sm:$0xff]  ;;  %v2133_v14 = vld [vmem:[%s3345_s1] sm:$0xff]  ;;  %v1771_v18 = vld [vmem:[%s3347_s0 + $0x190] sm:$0xf] }
   0x6   :  { %747 = vmatpush.bf16.msra.mxu0 %v2139_v2  ;;  %2150 = vmatpush.bf16.msra.mxu2 %v2139_v2  ;;  %v2142_v13 = vld [vmem:[%s3345_s1 + $0x48] sm:$0xff]  ;;  %v2141_v15 = vld [vmem:[%s3345_s1 + $0x40] sm:$0xff]  ;;  %v2084_v19 = vld [vmem:[%s3347_s0 + $0x194] sm:$0xf0] }
   0x7   :  { %1006 = vmatpush.bf16.msra.mxu1 %v2147_v3  ;;  %2158 = vmatpush.bf16.msra.mxu3 %v2147_v3  ;;  %v1571_v16 = vld [vmem:[%s3347_s0] sm:$0xf]  ;;  %v2034_v17 = vld [vmem:[%s3347_s0 + $0x4] sm:$0xf0]  ;;  %v2033_v20 = vld [vmem:[%s3347_s0 + $0x4] sm:$0xf]  ;;  %v1772_v25 = vor.u32 %v2084_v19, %v1771_v18 }
   0x8   :  { %v1573_v21 = vld [vmem:[%s3347_s0 + $0x8] sm:$0xf0]  ;;  %v2083_v22 = vld [vmem:[%s3347_s0 + $0x194] sm:$0xf]  ;;  %v1773_v23 = vld [vmem:[%s3347_s0 + $0x198] sm:$0xf0]  ;;  %v1572_v24 = vor.u32 %v2034_v17, %v1571_v16 }
   0x9   :  { %v1576_v26 = vor.u32 %v2033_v20, %v1573_v21  ;;  %v1776_v27 = vor.u32 %v2083_v22, %v1773_v23  ;;  %v1579_v28 = vld [vmem:[%s3347_s0 + $0x10] sm:$0xf]  ;;  %v2036_v29 = vld [vmem:[%s3347_s0 + $0x14] sm:$0xf0]  ;;  %v1779_v30 = vld [vmem:[%s3347_s0 + $0x1a0] sm:$0xf] }
   0xa   :  { %748 = vmatpush.bf16.msra.mxu0 %v2138_v4  ;;  %2151 = vmatpush.bf16.msra.mxu2 %v2138_v4  ;;  %v2086_v31 = vld [vmem:[%s3347_s0 + $0x1a4] sm:$0xf0]  ;;  %v2035_v32 = vld [vmem:[%s3347_s0 + $0x14] sm:$0xf]  ;;  %v1581_v33 = vld [vmem:[%s3347_s0 + $0x18] sm:$0xf0]  ;;  %v1580_v36 = vor.u32 %v2036_v29, %v1579_v28 }
   0xb   :  { %1007 = vmatpush.bf16.msra.mxu1 %v2146_v5  ;;  %2159 = vmatpush.bf16.msra.mxu3 %v2146_v5  ;;  %v2085_v34 = vld [vmem:[%s3347_s0 + $0x1a4] sm:$0xf]  ;;  %v1781_v35 = vld [vmem:[%s3347_s0 + $0x1a8] sm:$0xf0]  ;;  %v1780_v37 = vor.u32 %v2086_v31, %v1779_v30  ;;  %v1584_v38 = vor.u32 %v2035_v32, %v1581_v33  ;;  %v1587_v40 = vld [vmem:[%s3347_s0 + $0x20] sm:$0xf] }
   0xc   :  { %v1784_v39 = vor.u32 %v2085_v34, %v1781_v35  ;;  %v2038_v41 = vld [vmem:[%s3347_s0 + $0x24] sm:$0xf0]  ;;  %v1787_v42 = vld [vmem:[%s3347_s0 + $0x1b0] sm:$0xf]  ;;  %v2088_v43 = vld [vmem:[%s3347_s0 + $0x1b4] sm:$0xf0] }
   0xd   :  { %v2037_v44 = vld [vmem:[%s3347_s0 + $0x24] sm:$0xf]  ;;  %v1589_v45 = vld [vmem:[%s3347_s0 + $0x28] sm:$0xf0]  ;;  %v2087_v46 = vld [vmem:[%s3347_s0 + $0x1b4] sm:$0xf]  ;;  %v1588_v48 = vor.u32 %v2038_v41, %v1587_v40  ;;  %v1788_v49 = vor.u32 %v2088_v43, %v1787_v42 }
   0xe   :  { %749 = vmatpush.bf16.msra.mxu0 %v2137_v6  ;;  %2152 = vmatpush.bf16.msra.mxu2 %v2137_v6  ;;  %v1789_v47 = vld [vmem:[%s3347_s0 + $0x1b8] sm:$0xf0]  ;;  %v1592_v50 = vor.u32 %v2037_v44, %v1589_v45  ;;  %v1595_v52 = vld [vmem:[%s3347_s0 + $0x30] sm:$0xf]  ;;  %v2040_v53 = vld [vmem:[%s3347_s0 + $0x34] sm:$0xf0] }
   0xf   :  { %1008 = vmatpush.bf16.msra.mxu1 %v2145_v7  ;;  %2160 = vmatpush.bf16.msra.mxu3 %v2145_v7  ;;  %v1792_v51 = vor.u32 %v2087_v46, %v1789_v47  ;;  %v1795_v54 = vld [vmem:[%s3347_s0 + $0x1c0] sm:$0xf]  ;;  %v2090_v55 = vld [vmem:[%s3347_s0 + $0x1c4] sm:$0xf0]  ;;  %v2039_v56 = vld [vmem:[%s3347_s0 + $0x34] sm:$0xf]  ;;  %v1596_v60 = vor.u32 %v2040_v53, %v1595_v52 }
  0x10   :  { %v1597_v57 = vld [vmem:[%s3347_s0 + $0x38] sm:$0xf0]  ;;  %v2089_v58 = vld [vmem:[%s3347_s0 + $0x1c4] sm:$0xf]  ;;  %v1797_v59 = vld [vmem:[%s3347_s0 + $0x1c8] sm:$0xf0]  ;;  %v1796_v61 = vor.u32 %v2090_v55, %v1795_v54 }
  0x11   :  { %v1600_v62 = vor.u32 %v2039_v56, %v1597_v57  ;;  %v1800_v63 = vor.u32 %v2089_v58, %v1797_v59  ;;  %v1603_v0 = vld [vmem:[%s3347_s0 + $0x40] sm:$0xf]  ;;  %v2042_v1 = vld [vmem:[%s3347_s0 + $0x44] sm:$0xf0]  ;;  %v1803_v2 = vld [vmem:[%s3347_s0 + $0x1d0] sm:$0xf] }
  0x12   :  { %750 = vmatpush.bf16.msra.mxu0 %v2136_v8  ;;  %2153 = vmatpush.bf16.msra.mxu2 %v2136_v8  ;;  %v2092_v3 = vld [vmem:[%s3347_s0 + $0x1d4] sm:$0xf0]  ;;  %v2041_v4 = vld [vmem:[%s3347_s0 + $0x44] sm:$0xf]  ;;  %v1605_v5 = vld [vmem:[%s3347_s0 + $0x48] sm:$0xf0]  ;;  %v1604_v8 = vor.u32 %v2042_v1, %v1603_v0 }
  0x13   :  { %1009 = vmatpush.bf16.msra.mxu1 %v2144_v9  ;;  %2161 = vmatpush.bf16.msra.mxu3 %v2144_v9  ;;  %v2091_v6 = vld [vmem:[%s3347_s0 + $0x1d4] sm:$0xf]  ;;  %v1805_v7 = vld [vmem:[%s3347_s0 + $0x1d8] sm:$0xf0]  ;;  %v1804_v9 = vor.u32 %v2092_v3, %v1803_v2  ;;  %v2093_v18 = vld [vmem:[%s3347_s0 + $0x1e4] sm:$0xf] }
  0x14   :  { %v2043_v16 = vld [vmem:[%s3347_s0 + $0x54] sm:$0xf]  ;;  %v1613_v17 = vld [vmem:[%s3347_s0 + $0x58] sm:$0xf0]  ;;  %v1813_v19 = vld [vmem:[%s3347_s0 + $0x1e8] sm:$0xf0] }
  0x15   :  { %v1616_v22 = vor.u32 %v2043_v16, %v1613_v17  ;;  %v1816_v23 = vor.u32 %v2093_v18, %v1813_v19  ;;  %v2045_v28 = vld [vmem:[%s3347_s0 + $0x64] sm:$0xf]  ;;  %v1621_v29 = vld [vmem:[%s3347_s0 + $0x68] sm:$0xf0]  ;;  %v2095_v30 = vld [vmem:[%s3347_s0 + $0x1f4] sm:$0xf] }
  0x16   :  { %751 = vmatpush.bf16.msra.mxu0 %v2135_v10  ;;  %2154 = vmatpush.bf16.msra.mxu2 %v2135_v10  ;;  %v1608_v10 = vor.u32 %v2041_v4, %v1605_v5  ;;  %v1821_v31 = vld [vmem:[%s3347_s0 + $0x1f8] sm:$0xf0]  ;;  %v1624_v34 = vor.u32 %v2045_v28, %v1621_v29  ;;  %v2047_v40 = vld [vmem:[%s3347_s0 + $0x74] sm:$0xf]  ;;  %v2097_v42 = vld [vmem:[%s3347_s0 + $0x204] sm:$0xf] }
  0x17   :  { %1010 = vmatpush.bf16.msra.mxu1 %v2143_v11  ;;  %2162 = vmatpush.bf16.msra.mxu3 %v2143_v11  ;;  %v1808_v11 = vor.u32 %v2091_v6, %v1805_v7  ;;  %v1824_v35 = vor.u32 %v2095_v30, %v1821_v31  ;;  %v1629_v41 = vld [vmem:[%s3347_s0 + $0x78] sm:$0xf0]  ;;  %v1829_v43 = vld [vmem:[%s3347_s0 + $0x208] sm:$0xf0]  ;;  %v2100_v52 = vld [vmem:[%s3347_s0 + $0x214] sm:$0xf0] }
  0x18   :  { %v1632_v46 = vor.u32 %v2047_v40, %v1629_v41  ;;  %v1832_v47 = vor.u32 %v2097_v42, %v1829_v43  ;;  %v2049_v53 = vld [vmem:[%s3347_s0 + $0x84] sm:$0xf]  ;;  %v1637_v54 = vld [vmem:[%s3347_s0 + $0x88] sm:$0xf0]  ;;  %v2099_v55 = vld [vmem:[%s3347_s0 + $0x214] sm:$0xf] }
  0x19   :  { %v1837_v56 = vld [vmem:[%s3347_s0 + $0x218] sm:$0xf0]  ;;  %v2051_v16 = vld [vmem:[%s3347_s0 + $0x94] sm:$0xf] }
  0x1a   :  { %752 = vmatpush.bf16.msra.mxu0 %v2134_v12  ;;  %2155 = vmatpush.bf16.msra.mxu2 %v2134_v12  ;;  %v1611_v12 = vld [vmem:[%s3347_s0 + $0x50] sm:$0xf]  ;;  %v1645_v17 = vld [vmem:[%s3347_s0 + $0x98] sm:$0xf0] }
  0x1b   :  { %1011 = vmatpush.bf16.msra.mxu1 %v2142_v13  ;;  %2163 = vmatpush.bf16.msra.mxu3 %v2142_v13  ;;  %v2044_v13 = vld [vmem:[%s3347_s0 + $0x54] sm:$0xf0]  ;;  %v1648_v29 = vor.u32 %v2051_v16, %v1645_v17 }
  0x1c   :  { %v1612_v20 = vor.u32 %v2044_v13, %v1611_v12  ;;  %v2052_v13 = vld [vmem:[%s3347_s0 + $0x94] sm:$0xf0] }
  0x1e   :  { %753 = vmatpush.bf16.msra.mxu0 %v2133_v14  ;;  %2156 = vmatpush.bf16.msra.mxu2 %v2133_v14  ;;  %v1811_v14 = vld [vmem:[%s3347_s0 + $0x1e0] sm:$0xf] }
  0x1f   :  { %1012 = vmatpush.bf16.msra.mxu1 %v2141_v15  ;;  %2164 = vmatpush.bf16.msra.mxu3 %v2141_v15  ;;  %v2094_v15 = vld [vmem:[%s3347_s0 + $0x1e4] sm:$0xf0] }
  0x20   :  { %v1812_v21 = vor.u32 %v2094_v15, %v1811_v14  ;;  %v1843_v14 = vld [vmem:[%s3347_s0 + $0x220] sm:$0xf]  ;;  %v2102_v15 = vld [vmem:[%s3347_s0 + $0x224] sm:$0xf0] }
  0x21   :  { %754 = vmatmul.bf16.vlgmr.msra.gmra.mxu0 %v1572_v24  ;;  %879 = vmatmul.bf16.vlgmr.msra.gmra.mxu2 %v1772_v25  ;;  %v1619_v24 = vld [vmem:[%s3347_s0 + $0x60] sm:$0xf]  ;;  %v2046_v25 = vld [vmem:[%s3347_s0 + $0x64] sm:$0xf0] }
  0x22   :  { %1013 = vmatmul.bf16.vlgmr.msra.gmra.mxu1 %v1576_v26  ;;  %1138 = vmatmul.bf16.vlgmr.msra.gmra.mxu3 %v1776_v27  ;;  %v1819_v26 = vld [vmem:[%s3347_s0 + $0x1f0] sm:$0xf]  ;;  %v2096_v27 = vld [vmem:[%s3347_s0 + $0x1f4] sm:$0xf0]  ;;  %v1620_v32 = vor.u32 %v2046_v25, %v1619_v24 }
  0x23   :  { %v1820_v33 = vor.u32 %v2096_v27, %v1819_v26  ;;  %v1844_v27 = vor.u32 %v2102_v15, %v1843_v14 }
  0x31   :  { %759 = vmatmul.bf16.gmra.mxu0 %v1580_v36  ;;  %884 = vmatmul.bf16.gmra.mxu2 %v1780_v37  ;;  %v1627_v36 = vld [vmem:[%s3347_s0 + $0x70] sm:$0xf]  ;;  %v2048_v37 = vld [vmem:[%s3347_s0 + $0x74] sm:$0xf0] }
  0x32   :  { %1018 = vmatmul.bf16.gmra.mxu1 %v1584_v38  ;;  %1143 = vmatmul.bf16.gmra.mxu3 %v1784_v39  ;;  %v1827_v38 = vld [vmem:[%s3347_s0 + $0x200] sm:$0xf]  ;;  %v2098_v39 = vld [vmem:[%s3347_s0 + $0x204] sm:$0xf0]  ;;  %v1628_v44 = vor.u32 %v2048_v37, %v1627_v36 }
  0x33   :  { %v1828_v45 = vor.u32 %v2098_v39, %v1827_v38 }
  0x41   :  { %764 = vmatmul.bf16.gmra.mxu0 %v1588_v48  ;;  %889 = vmatmul.bf16.gmra.mxu2 %v1788_v49  ;;  %v2430_v48 = vld [vmem:[%s3346_s2] ss:$0 sm:$0xff] }
  0x42   :  { %1023 = vmatmul.bf16.gmra.mxu1 %v1592_v50  ;;  %1148 = vmatmul.bf16.gmra.mxu3 %v1792_v51  ;;  %v1635_v49 = vld [vmem:[%s3347_s0 + $0x80] sm:$0xf]  ;;  %v2050_v50 = vld [vmem:[%s3347_s0 + $0x84] sm:$0xf0]  ;;  %v1835_v51 = vld [vmem:[%s3347_s0 + $0x210] sm:$0xf] }
  0x43   :  { %v1636_v57 = vor.u32 %v2050_v50, %v1635_v49  ;;  %v1836_v58 = vor.u32 %v2100_v52, %v1835_v51  ;;  %v2054_v50 = vld [vmem:[%s3347_s0 + $0xa4] sm:$0xf0]  ;;  %v1851_v51 = vld [vmem:[%s3347_s0 + $0x230] sm:$0xf]  ;;  %v2104_v52 = vld [vmem:[%s3347_s0 + $0x234] sm:$0xf0] }
  0x51   :  { %769 = vmatmul.bf16.gmra.mxu0 %v1596_v60  ;;  %894 = vmatmul.bf16.gmra.mxu2 %v1796_v61  ;;  %v1640_v60 = vor.u32 %v2049_v53, %v1637_v54  ;;  %v1840_v61 = vor.u32 %v2099_v55, %v1837_v56  ;;  %v2053_v53 = vld [vmem:[%s3347_s0 + $0xa4] sm:$0xf]  ;;  %v1653_v54 = vld [vmem:[%s3347_s0 + $0xa8] sm:$0xf0] }
  0x52   :  { %1028 = vmatmul.bf16.gmra.mxu1 %v1600_v62  ;;  %1153 = vmatmul.bf16.gmra.mxu3 %v1800_v63 }
  0x61   :  { %774 = vmatmul.bf16.gmra.mxu0 %v1604_v8  ;;  %899 = vmatmul.bf16.gmra.mxu2 %v1804_v9 }
  0x62   :  { %1033 = vmatmul.bf16.gmra.mxu1 %v1608_v10  ;;  %1158 = vmatmul.bf16.gmra.mxu3 %v1808_v11  ;;  %v1643_v10 = vld [vmem:[%s3347_s0 + $0x90] sm:$0xf] }
  0x63   :  { %v1644_v26 = vor.u32 %v2052_v13, %v1643_v10 }
  0x71   :  { %779 = vmatmul.bf16.gmra.mxu0 %v1612_v20  ;;  %904 = vmatmul.bf16.gmra.mxu2 %v1812_v21  ;;  %v2101_v20 = vld [vmem:[%s3347_s0 + $0x224] sm:$0xf]  ;;  %v1845_v21 = vld [vmem:[%s3347_s0 + $0x228] sm:$0xf0] }
  0x72   :  { %1038 = vmatmul.bf16.gmra.mxu1 %v1616_v22  ;;  %1163 = vmatmul.bf16.gmra.mxu3 %v1816_v23  ;;  %v1848_v30 = vor.u32 %v2101_v20, %v1845_v21 }
  0x81   :  { %784 = vmatmul.bf16.gmra.mxu0 %v1620_v32  ;;  %909 = vmatmul.bf16.gmra.mxu2 %v1820_v33 }
  0x82   :  { %1043 = vmatmul.bf16.gmra.mxu1 %v1624_v34  ;;  %1168 = vmatmul.bf16.gmra.mxu3 %v1824_v35 }
  0x91   :  { %789 = vmatmul.bf16.gmra.mxu0 %v1628_v44  ;;  %914 = vmatmul.bf16.gmra.mxu2 %v1828_v45 }
  0x92   :  { %1048 = vmatmul.bf16.gmra.mxu1 %v1632_v46  ;;  %1173 = vmatmul.bf16.gmra.mxu3 %v1832_v47  ;;  %v1651_v46 = vld [vmem:[%s3347_s0 + $0xa0] sm:$0xf] }
  0x9e   :  { %v755_v59 = vpop.f32.mrf.mxu0 }
  0x9f   :  { %v756_v62 = vadd.f32 %v2430_v48, %v755_v59  ;;  %v1014_v63 = vpop.f32.mrf.mxu1 }
  0xa1   :  { %v1015_v0 = vadd.f32 %v1014_v63, %v756_v62  ;;  %794 = vmatmul.bf16.gmra.mxu0 %v1636_v57  ;;  %919 = vmatmul.bf16.gmra.mxu2 %v1836_v58  ;;  %v2103_v57 = vld [vmem:[%s3347_s0 + $0x234] sm:$0xf]  ;;  %v1853_v58 = vld [vmem:[%s3347_s0 + $0x238] sm:$0xf0]  ;;  %v1652_v63 = vor.u32 %v2054_v50, %v1651_v46 }
  0xa2   :  { %1053 = vmatmul.bf16.gmra.mxu1 %v1640_v60  ;;  %1178 = vmatmul.bf16.gmra.mxu3 %v1840_v61 }
  0xa3   :  { %v1264_v1 = vmax.f32 %v1015_v0, 0.0  ;;  %v1852_v0 = vor.u32 %v2104_v52, %v1851_v51 }
  0xa4   :  { %v880_v2 = vpop.f32.mrf.mxu2 }
  0xa5   :  { %v1364_v3 = vpack.c.bf16 %v1264_v1, %v1264_v1  ;;  %v881_v4 = vadd.f32 %v2430_v48, %v880_v2  ;;  %v1139_v5 = vpop.f32.mrf.mxu3  ;;  %v1656_v2 = vor.u32 %v2053_v53, %v1653_v54 }
  0xa6   :  { %v757_v6 = vpop.f32.mrf.mxu0 }
  0xa7   :  { %1465 = vst.msk [vmem:[%s3348_s3] sm:$0xf] %vm1464_vm0, %v1364_v3  ;;  %v1140_v7 = vadd.f32 %v1139_v5, %v881_v4  ;;  %v758_v8 = vadd.f32 %v2430_v48, %v757_v6  ;;  %v1016_v9 = vpop.f32.mrf.mxu1  ;;  %v1856_v3 = vor.u32 %v2103_v57, %v1853_v58 }
  0xa9   :  { %v1314_v11 = vmax.f32 %v1140_v7, 0.0  ;;  %v1017_v12 = vadd.f32 %v1016_v9, %v758_v8 }
  0xab   :  { %v1414_v18 = vpack.c.bf16 %v1314_v11, %v1314_v11  ;;  %v1265_v19 = vmax.f32 %v1017_v12, 0.0 }
  0xac   :  { %v882_v22 = vpop.f32.mrf.mxu2 }
  0xad   :  { %1515 = vst.msk [vmem:[%s3348_s3 + $0xc8] sm:$0xf] %vm1464_vm0, %v1414_v18  ;;  %v1365_v23 = vpack.c.bf16 %v1265_v19, %v1265_v19  ;;  %v883_v24 = vadd.f32 %v2430_v48, %v882_v22  ;;  %v1141_v25 = vpop.f32.mrf.mxu3  ;;  %v1659_v19 = vld [vmem:[%s3347_s0 + $0xb0] sm:$0xf]  ;;  %v2056_v22 = vld [vmem:[%s3347_s0 + $0xb4] sm:$0xf0] }
  0xae   :  { %v760_v28 = vpop.f32.mrf.mxu0 }
  0xaf   :  { %1466 = vst.msk [vmem:[%s3348_s3 + $0x4] sm:$0xf] %vm1464_vm0, %v1365_v23  ;;  %v1142_v31 = vadd.f32 %v1141_v25, %v883_v24  ;;  %v761_v32 = vadd.f32 %v2430_v48, %v760_v28  ;;  %v1019_v33 = vpop.f32.mrf.mxu1  ;;  %v1859_v23 = vld [vmem:[%s3347_s0 + $0x240] sm:$0xf]  ;;  %v2106_v24 = vld [vmem:[%s3347_s0 + $0x244] sm:$0xf0] }
  0xb0   :  { %v2055_v25 = vld [vmem:[%s3347_s0 + $0xb4] sm:$0xf] }
  0xb1   :  { %v1315_v34 = vmax.f32 %v1142_v31, 0.0  ;;  %v1020_v35 = vadd.f32 %v1019_v33, %v761_v32  ;;  %799 = vmatmul.bf16.gmra.mxu0 %v1644_v26  ;;  %924 = vmatmul.bf16.gmra.mxu2 %v1844_v27  ;;  %v1661_v26 = vld [vmem:[%s3347_s0 + $0xb8] sm:$0xf0] }
  0xb2   :  { %1058 = vmatmul.bf16.gmra.mxu1 %v1648_v29  ;;  %1183 = vmatmul.bf16.gmra.mxu3 %v1848_v30  ;;  %v2105_v29 = vld [vmem:[%s3347_s0 + $0x244] sm:$0xf]  ;;  %v1861_v30 = vld [vmem:[%s3347_s0 + $0x248] sm:$0xf0] }
  0xb3   :  { %v1415_v36 = vpack.c.bf16 %v1315_v34, %v1315_v34  ;;  %v1266_v37 = vmax.f32 %v1020_v35, 0.0  ;;  %v1660_v35 = vor.u32 %v2056_v22, %v1659_v19 }
  0xb4   :  { %v885_v38 = vpop.f32.mrf.mxu2 }
  0xb5   :  { %1516 = vst.msk [vmem:[%s3348_s3 + $0xcc] sm:$0xf] %vm1464_vm0, %v1415_v36  ;;  %v1366_v39 = vpack.c.bf16 %v1266_v37, %v1266_v37  ;;  %v886_v40 = vadd.f32 %v2430_v48, %v885_v38  ;;  %v1144_v41 = vpop.f32.mrf.mxu3  ;;  %v1860_v36 = vor.u32 %v2106_v24, %v1859_v23  ;;  %v1664_v38 = vor.u32 %v2055_v25, %v1661_v26 }
  0xb6   :  { %v762_v42 = vpop.f32.mrf.mxu0 }
  0xb7   :  { %1467 = vst.msk [vmem:[%s3348_s3 + $0x8] sm:$0xf] %vm1464_vm0, %v1366_v39  ;;  %v1145_v43 = vadd.f32 %v1144_v41, %v886_v40  ;;  %v763_v44 = vadd.f32 %v2430_v48, %v762_v42  ;;  %v1021_v45 = vpop.f32.mrf.mxu1  ;;  %v1864_v39 = vor.u32 %v2105_v29, %v1861_v30 }
  0xb9   :  { %v1316_v47 = vmax.f32 %v1145_v43, 0.0  ;;  %v1022_v49 = vadd.f32 %v1021_v45, %v763_v44 }
  0xbb   :  { %v1416_v55 = vpack.c.bf16 %v1316_v47, %v1316_v47  ;;  %v1267_v56 = vmax.f32 %v1022_v49, 0.0 }
  0xbc   :  { %v887_v59 = vpop.f32.mrf.mxu2 }
  0xbd   :  { %1517 = vst.msk [vmem:[%s3348_s3 + $0xd0] sm:$0xf] %vm1464_vm0, %v1416_v55  ;;  %v1367_v60 = vpack.c.bf16 %v1267_v56, %v1267_v56  ;;  %v888_v61 = vadd.f32 %v2430_v48, %v887_v59  ;;  %v1146_v62 = vpop.f32.mrf.mxu3  ;;  %v1667_v56 = vld [vmem:[%s3347_s0 + $0xc0] sm:$0xf]  ;;  %v2058_v59 = vld [vmem:[%s3347_s0 + $0xc4] sm:$0xf0] }
  0xbe   :  { %v765_v1 = vpop.f32.mrf.mxu0 }
  0xbf   :  { %1468 = vst.msk [vmem:[%s3348_s3 + $0xc] sm:$0xf] %vm1464_vm0, %v1367_v60  ;;  %v1147_v4 = vadd.f32 %v1146_v62, %v888_v61  ;;  %v766_v5 = vadd.f32 %v2430_v48, %v765_v1  ;;  %v1024_v6 = vpop.f32.mrf.mxu1  ;;  %v1867_v60 = vld [vmem:[%s3347_s0 + $0x250] sm:$0xf]  ;;  %v2108_v61 = vld [vmem:[%s3347_s0 + $0x254] sm:$0xf0] }
  0xc0   :  { %v2057_v62 = vld [vmem:[%s3347_s0 + $0xc4] sm:$0xf] }
  0xc1   :  { %v1317_v7 = vmax.f32 %v1147_v4, 0.0  ;;  %v1025_v8 = vadd.f32 %v1024_v6, %v766_v5  ;;  %804 = vmatmul.bf16.gmra.mxu0 %v1652_v63  ;;  %929 = vmatmul.bf16.gmra.mxu2 %v1852_v0  ;;  %v1669_v63 = vld [vmem:[%s3347_s0 + $0xc8] sm:$0xf0] }
  0xc2   :  { %1063 = vmatmul.bf16.gmra.mxu1 %v1656_v2  ;;  %1188 = vmatmul.bf16.gmra.mxu3 %v1856_v3  ;;  %v2107_v2 = vld [vmem:[%s3347_s0 + $0x254] sm:$0xf]  ;;  %v1869_v3 = vld [vmem:[%s3347_s0 + $0x258] sm:$0xf0] }
  0xc3   :  { %v1417_v9 = vpack.c.bf16 %v1317_v7, %v1317_v7  ;;  %v1268_v10 = vmax.f32 %v1025_v8, 0.0  ;;  %v1668_v8 = vor.u32 %v2058_v59, %v1667_v56 }
  0xc4   :  { %v890_v11 = vpop.f32.mrf.mxu2 }
  0xc5   :  { %1518 = vst.msk [vmem:[%s3348_s3 + $0xd4] sm:$0xf] %vm1464_vm0, %v1417_v9  ;;  %v1368_v12 = vpack.c.bf16 %v1268_v10, %v1268_v10  ;;  %v891_v13 = vadd.f32 %v2430_v48, %v890_v11  ;;  %v1149_v14 = vpop.f32.mrf.mxu3  ;;  %v1868_v9 = vor.u32 %v2108_v61, %v1867_v60  ;;  %v1672_v11 = vor.u32 %v2057_v62, %v1669_v63 }
  0xc6   :  { %v767_v15 = vpop.f32.mrf.mxu0 }
  0xc7   :  { %1469 = vst.msk [vmem:[%s3348_s3 + $0x10] sm:$0xf] %vm1464_vm0, %v1368_v12  ;;  %v1150_v16 = vadd.f32 %v1149_v14, %v891_v13  ;;  %v768_v17 = vadd.f32 %v2430_v48, %v767_v15  ;;  %v1026_v18 = vpop.f32.mrf.mxu1  ;;  %v1872_v12 = vor.u32 %v2107_v2, %v1869_v3 }
  0xc9   :  { %v1318_v20 = vmax.f32 %v1150_v16, 0.0  ;;  %v1027_v21 = vadd.f32 %v1026_v18, %v768_v17 }
  0xcb   :  { %v1418_v27 = vpack.c.bf16 %v1318_v20, %v1318_v20  ;;  %v1269_v28 = vmax.f32 %v1027_v21, 0.0 }
  0xcc   :  { %v892_v31 = vpop.f32.mrf.mxu2 }
  0xcd   :  { %1519 = vst.msk [vmem:[%s3348_s3 + $0xd8] sm:$0xf] %vm1464_vm0, %v1418_v27  ;;  %v1369_v32 = vpack.c.bf16 %v1269_v28, %v1269_v28  ;;  %v893_v33 = vadd.f32 %v2430_v48, %v892_v31  ;;  %v1151_v34 = vpop.f32.mrf.mxu3  ;;  %v1675_v28 = vld [vmem:[%s3347_s0 + $0xd0] sm:$0xf]  ;;  %v2060_v31 = vld [vmem:[%s3347_s0 + $0xd4] sm:$0xf0] }
  0xce   :  { %v770_v37 = vpop.f32.mrf.mxu0 }
  0xcf   :  { %1470 = vst.msk [vmem:[%s3348_s3 + $0x14] sm:$0xf] %vm1464_vm0, %v1369_v32  ;;  %v1152_v40 = vadd.f32 %v1151_v34, %v893_v33  ;;  %v771_v41 = vadd.f32 %v2430_v48, %v770_v37  ;;  %v1029_v42 = vpop.f32.mrf.mxu1  ;;  %v1875_v32 = vld [vmem:[%s3347_s0 + $0x260] sm:$0xf]  ;;  %v2110_v33 = vld [vmem:[%s3347_s0 + $0x264] sm:$0xf0] }
  0xd0   :  { %v2059_v34 = vld [vmem:[%s3347_s0 + $0xd4] sm:$0xf] }
  0xd1   :  { %v1319_v43 = vmax.f32 %v1152_v40, 0.0  ;;  %v1030_v44 = vadd.f32 %v1029_v42, %v771_v41  ;;  %809 = vmatmul.bf16.gmra.mxu0 %v1660_v35  ;;  %934 = vmatmul.bf16.gmra.mxu2 %v1860_v36  ;;  %v1677_v35 = vld [vmem:[%s3347_s0 + $0xd8] sm:$0xf0] }
  0xd2   :  { %1068 = vmatmul.bf16.gmra.mxu1 %v1664_v38  ;;  %1193 = vmatmul.bf16.gmra.mxu3 %v1864_v39  ;;  %v2109_v38 = vld [vmem:[%s3347_s0 + $0x264] sm:$0xf]  ;;  %v1877_v39 = vld [vmem:[%s3347_s0 + $0x268] sm:$0xf0] }
  0xd3   :  { %v1419_v45 = vpack.c.bf16 %v1319_v43, %v1319_v43  ;;  %v1270_v46 = vmax.f32 %v1030_v44, 0.0  ;;  %v1676_v44 = vor.u32 %v2060_v31, %v1675_v28 }
  0xd4   :  { %v895_v47 = vpop.f32.mrf.mxu2 }
  0xd5   :  { %1520 = vst.msk [vmem:[%s3348_s3 + $0xdc] sm:$0xf] %vm1464_vm0, %v1419_v45  ;;  %v1370_v49 = vpack.c.bf16 %v1270_v46, %v1270_v46  ;;  %v896_v50 = vadd.f32 %v2430_v48, %v895_v47  ;;  %v1154_v51 = vpop.f32.mrf.mxu3  ;;  %v1876_v45 = vor.u32 %v2110_v33, %v1875_v32  ;;  %v1680_v47 = vor.u32 %v2059_v34, %v1677_v35 }
  0xd6   :  { %v772_v52 = vpop.f32.mrf.mxu0 }
  0xd7   :  { %1471 = vst.msk [vmem:[%s3348_s3 + $0x18] sm:$0xf] %vm1464_vm0, %v1370_v49  ;;  %v1155_v53 = vadd.f32 %v1154_v51, %v896_v50  ;;  %v773_v54 = vadd.f32 %v2430_v48, %v772_v52  ;;  %v1031_v55 = vpop.f32.mrf.mxu1  ;;  %v1880_v49 = vor.u32 %v2109_v38, %v1877_v39 }
  0xd9   :  { %v1320_v57 = vmax.f32 %v1155_v53, 0.0  ;;  %v1032_v58 = vadd.f32 %v1031_v55, %v773_v54 }
  0xdb   :  { %v1420_v0 = vpack.c.bf16 %v1320_v57, %v1320_v57  ;;  %v1271_v1 = vmax.f32 %v1032_v58, 0.0 }
  0xdc   :  { %v897_v4 = vpop.f32.mrf.mxu2 }
  0xdd   :  { %1521 = vst.msk [vmem:[%s3348_s3 + $0xe0] sm:$0xf] %vm1464_vm0, %v1420_v0  ;;  %v1371_v5 = vpack.c.bf16 %v1271_v1, %v1271_v1  ;;  %v898_v6 = vadd.f32 %v2430_v48, %v897_v4  ;;  %v1156_v7 = vpop.f32.mrf.mxu3  ;;  %v1683_v1 = vld [vmem:[%s3347_s0 + $0xe0] sm:$0xf]  ;;  %v2062_v4 = vld [vmem:[%s3347_s0 + $0xe4] sm:$0xf0] }
  0xde   :  { %v775_v10 = vpop.f32.mrf.mxu0 }
  0xdf   :  { %1472 = vst.msk [vmem:[%s3348_s3 + $0x1c] sm:$0xf] %vm1464_vm0, %v1371_v5  ;;  %v1157_v13 = vadd.f32 %v1156_v7, %v898_v6  ;;  %v776_v14 = vadd.f32 %v2430_v48, %v775_v10  ;;  %v1034_v15 = vpop.f32.mrf.mxu1  ;;  %v1883_v5 = vld [vmem:[%s3347_s0 + $0x270] sm:$0xf]  ;;  %v2112_v6 = vld [vmem:[%s3347_s0 + $0x274] sm:$0xf0] }
  0xe0   :  { %v2061_v7 = vld [vmem:[%s3347_s0 + $0xe4] sm:$0xf] }
  0xe1   :  { %v1321_v16 = vmax.f32 %v1157_v13, 0.0  ;;  %v1035_v17 = vadd.f32 %v1034_v15, %v776_v14  ;;  %814 = vmatmul.bf16.gmra.mxu0 %v1668_v8  ;;  %939 = vmatmul.bf16.gmra.mxu2 %v1868_v9  ;;  %v1685_v8 = vld [vmem:[%s3347_s0 + $0xe8] sm:$0xf0] }
  0xe2   :  { %1073 = vmatmul.bf16.gmra.mxu1 %v1672_v11  ;;  %1198 = vmatmul.bf16.gmra.mxu3 %v1872_v12  ;;  %v2111_v11 = vld [vmem:[%s3347_s0 + $0x274] sm:$0xf]  ;;  %v1885_v12 = vld [vmem:[%s3347_s0 + $0x278] sm:$0xf0] }
  0xe3   :  { %v1421_v18 = vpack.c.bf16 %v1321_v16, %v1321_v16  ;;  %v1272_v19 = vmax.f32 %v1035_v17, 0.0  ;;  %v1684_v17 = vor.u32 %v2062_v4, %v1683_v1 }
  0xe4   :  { %v900_v20 = vpop.f32.mrf.mxu2 }
  0xe5   :  { %1522 = vst.msk [vmem:[%s3348_s3 + $0xe4] sm:$0xf] %vm1464_vm0, %v1421_v18  ;;  %v1372_v21 = vpack.c.bf16 %v1272_v19, %v1272_v19  ;;  %v901_v22 = vadd.f32 %v2430_v48, %v900_v20  ;;  %v1159_v23 = vpop.f32.mrf.mxu3  ;;  %v1884_v18 = vor.u32 %v2112_v6, %v1883_v5  ;;  %v1688_v20 = vor.u32 %v2061_v7, %v1685_v8 }
  0xe6   :  { %v777_v24 = vpop.f32.mrf.mxu0 }
  0xe7   :  { %1473 = vst.msk [vmem:[%s3348_s3 + $0x20] sm:$0xf] %vm1464_vm0, %v1372_v21  ;;  %v1160_v25 = vadd.f32 %v1159_v23, %v901_v22  ;;  %v778_v26 = vadd.f32 %v2430_v48, %v777_v24  ;;  %v1036_v27 = vpop.f32.mrf.mxu1  ;;  %v1888_v21 = vor.u32 %v2111_v11, %v1885_v12 }
  0xe9   :  { %v1322_v29 = vmax.f32 %v1160_v25, 0.0  ;;  %v1037_v30 = vadd.f32 %v1036_v27, %v778_v26 }
  0xeb   :  { %v1422_v36 = vpack.c.bf16 %v1322_v29, %v1322_v29  ;;  %v1273_v37 = vmax.f32 %v1037_v30, 0.0 }
  0xec   :  { %v902_v40 = vpop.f32.mrf.mxu2 }
  0xed   :  { %1523 = vst.msk [vmem:[%s3348_s3 + $0xe8] sm:$0xf] %vm1464_vm0, %v1422_v36  ;;  %v1373_v41 = vpack.c.bf16 %v1273_v37, %v1273_v37  ;;  %v903_v42 = vadd.f32 %v2430_v48, %v902_v40  ;;  %v1161_v43 = vpop.f32.mrf.mxu3  ;;  %v1691_v37 = vld [vmem:[%s3347_s0 + $0xf0] sm:$0xf]  ;;  %v2064_v40 = vld [vmem:[%s3347_s0 + $0xf4] sm:$0xf0] }
  0xee   :  { %v780_v46 = vpop.f32.mrf.mxu0 }
  0xef   :  { %1474 = vst.msk [vmem:[%s3348_s3 + $0x24] sm:$0xf] %vm1464_vm0, %v1373_v41  ;;  %v1162_v50 = vadd.f32 %v1161_v43, %v903_v42  ;;  %v781_v51 = vadd.f32 %v2430_v48, %v780_v46  ;;  %v1039_v52 = vpop.f32.mrf.mxu1  ;;  %v1891_v41 = vld [vmem:[%s3347_s0 + $0x280] sm:$0xf]  ;;  %v2114_v42 = vld [vmem:[%s3347_s0 + $0x284] sm:$0xf0] }
  0xf0   :  { %v2063_v43 = vld [vmem:[%s3347_s0 + $0xf4] sm:$0xf] }
  0xf1   :  { %v1323_v53 = vmax.f32 %v1162_v50, 0.0  ;;  %v1040_v54 = vadd.f32 %v1039_v52, %v781_v51  ;;  %819 = vmatmul.bf16.gmra.mxu0 %v1676_v44  ;;  %944 = vmatmul.bf16.gmra.mxu2 %v1876_v45  ;;  %v1693_v44 = vld [vmem:[%s3347_s0 + $0xf8] sm:$0xf0] }
  0xf2   :  { %1078 = vmatmul.bf16.gmra.mxu1 %v1680_v47  ;;  %1203 = vmatmul.bf16.gmra.mxu3 %v1880_v49  ;;  %v2113_v47 = vld [vmem:[%s3347_s0 + $0x284] sm:$0xf]  ;;  %v1893_v49 = vld [vmem:[%s3347_s0 + $0x288] sm:$0xf0] }
  0xf3   :  { %v1423_v55 = vpack.c.bf16 %v1323_v53, %v1323_v53  ;;  %v1274_v56 = vmax.f32 %v1040_v54, 0.0  ;;  %v1692_v54 = vor.u32 %v2064_v40, %v1691_v37 }
  0xf4   :  { %v905_v57 = vpop.f32.mrf.mxu2 }
  0xf5   :  { %1524 = vst.msk [vmem:[%s3348_s3 + $0xec] sm:$0xf] %vm1464_vm0, %v1423_v55  ;;  %v1374_v58 = vpack.c.bf16 %v1274_v56, %v1274_v56  ;;  %v906_v59 = vadd.f32 %v2430_v48, %v905_v57  ;;  %v1164_v60 = vpop.f32.mrf.mxu3  ;;  %v1892_v55 = vor.u32 %v2114_v42, %v1891_v41  ;;  %v1696_v57 = vor.u32 %v2063_v43, %v1693_v44 }
  0xf6   :  { %v782_v61 = vpop.f32.mrf.mxu0 }
  0xf7   :  { %1475 = vst.msk [vmem:[%s3348_s3 + $0x28] sm:$0xf] %vm1464_vm0, %v1374_v58  ;;  %v1165_v62 = vadd.f32 %v1164_v60, %v906_v59  ;;  %v783_v63 = vadd.f32 %v2430_v48, %v782_v61  ;;  %v1041_v0 = vpop.f32.mrf.mxu1  ;;  %v1896_v58 = vor.u32 %v2113_v47, %v1893_v49 }
  0xf9   :  { %v1324_v2 = vmax.f32 %v1165_v62, 0.0  ;;  %v1042_v3 = vadd.f32 %v1041_v0, %v783_v63 }
  0xfb   :  { %v1424_v9 = vpack.c.bf16 %v1324_v2, %v1324_v2  ;;  %v1275_v10 = vmax.f32 %v1042_v3, 0.0 }
  0xfc   :  { %v907_v13 = vpop.f32.mrf.mxu2 }
  0xfd   :  { %1525 = vst.msk [vmem:[%s3348_s3 + $0xf0] sm:$0xf] %vm1464_vm0, %v1424_v9  ;;  %v1375_v14 = vpack.c.bf16 %v1275_v10, %v1275_v10  ;;  %v908_v15 = vadd.f32 %v2430_v48, %v907_v13  ;;  %v1166_v16 = vpop.f32.mrf.mxu3  ;;  %v1699_v10 = vld [vmem:[%s3347_s0 + $0x100] sm:$0xf]  ;;  %v2066_v13 = vld [vmem:[%s3347_s0 + $0x104] sm:$0xf0] }
  0xfe   :  { %v785_v19 = vpop.f32.mrf.mxu0 }
  0xff   :  { %1476 = vst.msk [vmem:[%s3348_s3 + $0x2c] sm:$0xf] %vm1464_vm0, %v1375_v14  ;;  %v1167_v22 = vadd.f32 %v1166_v16, %v908_v15  ;;  %v786_v23 = vadd.f32 %v2430_v48, %v785_v19  ;;  %v1044_v24 = vpop.f32.mrf.mxu1  ;;  %v1899_v14 = vld [vmem:[%s3347_s0 + $0x290] sm:$0xf]  ;;  %v2116_v15 = vld [vmem:[%s3347_s0 + $0x294] sm:$0xf0] }
 0x100   :  { %v2065_v16 = vld [vmem:[%s3347_s0 + $0x104] sm:$0xf] }
 0x101   :  { %v1325_v25 = vmax.f32 %v1167_v22, 0.0  ;;  %v1045_v26 = vadd.f32 %v1044_v24, %v786_v23  ;;  %824 = vmatmul.bf16.gmra.mxu0 %v1684_v17  ;;  %949 = vmatmul.bf16.gmra.mxu2 %v1884_v18  ;;  %v1701_v17 = vld [vmem:[%s3347_s0 + $0x108] sm:$0xf0] }
 0x102   :  { %1083 = vmatmul.bf16.gmra.mxu1 %v1688_v20  ;;  %1208 = vmatmul.bf16.gmra.mxu3 %v1888_v21  ;;  %v2115_v20 = vld [vmem:[%s3347_s0 + $0x294] sm:$0xf]  ;;  %v1901_v21 = vld [vmem:[%s3347_s0 + $0x298] sm:$0xf0] }
 0x103   :  { %v1425_v27 = vpack.c.bf16 %v1325_v25, %v1325_v25  ;;  %v1276_v28 = vmax.f32 %v1045_v26, 0.0  ;;  %v1700_v26 = vor.u32 %v2066_v13, %v1699_v10 }
 0x104   :  { %v910_v29 = vpop.f32.mrf.mxu2 }
 0x105   :  { %1526 = vst.msk [vmem:[%s3348_s3 + $0xf4] sm:$0xf] %vm1464_vm0, %v1425_v27  ;;  %v1376_v30 = vpack.c.bf16 %v1276_v28, %v1276_v28  ;;  %v911_v31 = vadd.f32 %v2430_v48, %v910_v29  ;;  %v1169_v32 = vpop.f32.mrf.mxu3  ;;  %v1900_v27 = vor.u32 %v2116_v15, %v1899_v14  ;;  %v1704_v29 = vor.u32 %v2065_v16, %v1701_v17 }
 0x106   :  { %v787_v33 = vpop.f32.mrf.mxu0 }
 0x107   :  { %1477 = vst.msk [vmem:[%s3348_s3 + $0x30] sm:$0xf] %vm1464_vm0, %v1376_v30  ;;  %v1170_v34 = vadd.f32 %v1169_v32, %v911_v31  ;;  %v788_v35 = vadd.f32 %v2430_v48, %v787_v33  ;;  %v1046_v36 = vpop.f32.mrf.mxu1  ;;  %v1904_v30 = vor.u32 %v2115_v20, %v1901_v21 }
 0x109   :  { %v1326_v38 = vmax.f32 %v1170_v34, 0.0  ;;  %v1047_v39 = vadd.f32 %v1046_v36, %v788_v35 }
 0x10b   :  { %v1426_v45 = vpack.c.bf16 %v1326_v38, %v1326_v38  ;;  %v1277_v46 = vmax.f32 %v1047_v39, 0.0 }
 0x10c   :  { %v912_v50 = vpop.f32.mrf.mxu2 }
 0x10d   :  { %1527 = vst.msk [vmem:[%s3348_s3 + $0xf8] sm:$0xf] %vm1464_vm0, %v1426_v45  ;;  %v1377_v51 = vpack.c.bf16 %v1277_v46, %v1277_v46  ;;  %v913_v52 = vadd.f32 %v2430_v48, %v912_v50  ;;  %v1171_v53 = vpop.f32.mrf.mxu3  ;;  %v1707_v46 = vld [vmem:[%s3347_s0 + $0x110] sm:$0xf]  ;;  %v2068_v50 = vld [vmem:[%s3347_s0 + $0x114] sm:$0xf0] }
 0x10e   :  { %v790_v56 = vpop.f32.mrf.mxu0 }
 0x10f   :  { %1478 = vst.msk [vmem:[%s3348_s3 + $0x34] sm:$0xf] %vm1464_vm0, %v1377_v51  ;;  %v1172_v59 = vadd.f32 %v1171_v53, %v913_v52  ;;  %v791_v60 = vadd.f32 %v2430_v48, %v790_v56  ;;  %v1049_v61 = vpop.f32.mrf.mxu1  ;;  %v1907_v51 = vld [vmem:[%s3347_s0 + $0x2a0] sm:$0xf]  ;;  %v2118_v52 = vld [vmem:[%s3347_s0 + $0x2a4] sm:$0xf0] }
 0x110   :  { %v2067_v53 = vld [vmem:[%s3347_s0 + $0x114] sm:$0xf] }
 0x111   :  { %v1327_v62 = vmax.f32 %v1172_v59, 0.0  ;;  %v1050_v63 = vadd.f32 %v1049_v61, %v791_v60  ;;  %829 = vmatmul.bf16.gmra.mxu0 %v1692_v54  ;;  %954 = vmatmul.bf16.gmra.mxu2 %v1892_v55  ;;  %v1709_v54 = vld [vmem:[%s3347_s0 + $0x118] sm:$0xf0] }
 0x112   :  { %1088 = vmatmul.bf16.gmra.mxu1 %v1696_v57  ;;  %1213 = vmatmul.bf16.gmra.mxu3 %v1896_v58  ;;  %v2117_v57 = vld [vmem:[%s3347_s0 + $0x2a4] sm:$0xf]  ;;  %v1909_v58 = vld [vmem:[%s3347_s0 + $0x2a8] sm:$0xf0] }
 0x113   :  { %v1427_v0 = vpack.c.bf16 %v1327_v62, %v1327_v62  ;;  %v1278_v1 = vmax.f32 %v1050_v63, 0.0  ;;  %v1708_v63 = vor.u32 %v2068_v50, %v1707_v46 }
 0x114   :  { %v915_v2 = vpop.f32.mrf.mxu2 }
 0x115   :  { %1528 = vst.msk [vmem:[%s3348_s3 + $0xfc] sm:$0xf] %vm1464_vm0, %v1427_v0  ;;  %v1378_v3 = vpack.c.bf16 %v1278_v1, %v1278_v1  ;;  %v916_v4 = vadd.f32 %v2430_v48, %v915_v2  ;;  %v1174_v5 = vpop.f32.mrf.mxu3  ;;  %v1908_v0 = vor.u32 %v2118_v52, %v1907_v51  ;;  %v1712_v2 = vor.u32 %v2067_v53, %v1709_v54 }
 0x116   :  { %v792_v6 = vpop.f32.mrf.mxu0 }
 0x117   :  { %1479 = vst.msk [vmem:[%s3348_s3 + $0x38] sm:$0xf] %vm1464_vm0, %v1378_v3  ;;  %v1175_v7 = vadd.f32 %v1174_v5, %v916_v4  ;;  %v793_v8 = vadd.f32 %v2430_v48, %v792_v6  ;;  %v1051_v9 = vpop.f32.mrf.mxu1  ;;  %v1912_v3 = vor.u32 %v2117_v57, %v1909_v58 }
 0x119   :  { %v1328_v11 = vmax.f32 %v1175_v7, 0.0  ;;  %v1052_v12 = vadd.f32 %v1051_v9, %v793_v8 }
 0x11b   :  { %v1428_v18 = vpack.c.bf16 %v1328_v11, %v1328_v11  ;;  %v1279_v19 = vmax.f32 %v1052_v12, 0.0 }
 0x11c   :  { %v917_v22 = vpop.f32.mrf.mxu2 }
 0x11d   :  { %1529 = vst.msk [vmem:[%s3348_s3 + $0x100] sm:$0xf] %vm1464_vm0, %v1428_v18  ;;  %v1379_v23 = vpack.c.bf16 %v1279_v19, %v1279_v19  ;;  %v918_v24 = vadd.f32 %v2430_v48, %v917_v22  ;;  %v1176_v25 = vpop.f32.mrf.mxu3  ;;  %v1715_v19 = vld [vmem:[%s3347_s0 + $0x120] sm:$0xf]  ;;  %v2070_v22 = vld [vmem:[%s3347_s0 + $0x124] sm:$0xf0] }
 0x11e   :  { %v795_v28 = vpop.f32.mrf.mxu0 }
 0x11f   :  { %1480 = vst.msk [vmem:[%s3348_s3 + $0x3c] sm:$0xf] %vm1464_vm0, %v1379_v23  ;;  %v1177_v31 = vadd.f32 %v1176_v25, %v918_v24  ;;  %v796_v32 = vadd.f32 %v2430_v48, %v795_v28  ;;  %v1054_v33 = vpop.f32.mrf.mxu1  ;;  %v1915_v23 = vld [vmem:[%s3347_s0 + $0x2b0] sm:$0xf]  ;;  %v2120_v24 = vld [vmem:[%s3347_s0 + $0x2b4] sm:$0xf0] }
 0x120   :  { %v2069_v25 = vld [vmem:[%s3347_s0 + $0x124] sm:$0xf] }
 0x121   :  { %v1329_v34 = vmax.f32 %v1177_v31, 0.0  ;;  %v1055_v35 = vadd.f32 %v1054_v33, %v796_v32  ;;  %834 = vmatmul.bf16.gmra.mxu0 %v1700_v26  ;;  %959 = vmatmul.bf16.gmra.mxu2 %v1900_v27  ;;  %v1717_v26 = vld [vmem:[%s3347_s0 + $0x128] sm:$0xf0] }
 0x122   :  { %1093 = vmatmul.bf16.gmra.mxu1 %v1704_v29  ;;  %1218 = vmatmul.bf16.gmra.mxu3 %v1904_v30  ;;  %v2119_v29 = vld [vmem:[%s3347_s0 + $0x2b4] sm:$0xf]  ;;  %v1917_v30 = vld [vmem:[%s3347_s0 + $0x2b8] sm:$0xf0] }
 0x123   :  { %v1429_v36 = vpack.c.bf16 %v1329_v34, %v1329_v34  ;;  %v1280_v37 = vmax.f32 %v1055_v35, 0.0  ;;  %v1716_v35 = vor.u32 %v2070_v22, %v1715_v19 }
 0x124   :  { %v920_v38 = vpop.f32.mrf.mxu2 }
 0x125   :  { %1530 = vst.msk [vmem:[%s3348_s3 + $0x104] sm:$0xf] %vm1464_vm0, %v1429_v36  ;;  %v1380_v39 = vpack.c.bf16 %v1280_v37, %v1280_v37  ;;  %v921_v40 = vadd.f32 %v2430_v48, %v920_v38  ;;  %v1179_v41 = vpop.f32.mrf.mxu3  ;;  %v1916_v36 = vor.u32 %v2120_v24, %v1915_v23  ;;  %v1720_v38 = vor.u32 %v2069_v25, %v1717_v26  ;;  %v2949_v26 = vld [vmem:[%s3346_s2] ss:$0 sm:$0xff] }
 0x126   :  { %v797_v42 = vpop.f32.mrf.mxu0 }
 0x127   :  { %1481 = vst.msk [vmem:[%s3348_s3 + $0x40] sm:$0xf] %vm1464_vm0, %v1380_v39  ;;  %v1180_v43 = vadd.f32 %v1179_v41, %v921_v40  ;;  %v798_v44 = vadd.f32 %v2430_v48, %v797_v42  ;;  %v1056_v45 = vpop.f32.mrf.mxu1  ;;  %v1920_v39 = vor.u32 %v2119_v29, %v1917_v30 }
 0x129   :  { %v1330_v47 = vmax.f32 %v1180_v43, 0.0  ;;  %v1057_v49 = vadd.f32 %v1056_v45, %v798_v44 }
 0x12b   :  { %v1430_v55 = vpack.c.bf16 %v1330_v47, %v1330_v47  ;;  %v1281_v56 = vmax.f32 %v1057_v49, 0.0 }
 0x12c   :  { %v922_v59 = vpop.f32.mrf.mxu2 }
 0x12d   :  { %1531 = vst.msk [vmem:[%s3348_s3 + $0x108] sm:$0xf] %vm1464_vm0, %v1430_v55  ;;  %v1381_v60 = vpack.c.bf16 %v1281_v56, %v1281_v56  ;;  %v923_v61 = vadd.f32 %v2430_v48, %v922_v59  ;;  %v1181_v62 = vpop.f32.mrf.mxu3  ;;  %v1723_v56 = vld [vmem:[%s3347_s0 + $0x130] sm:$0xf]  ;;  %v2072_v59 = vld [vmem:[%s3347_s0 + $0x134] sm:$0xf0] }
 0x12e   :  { %v800_v1 = vpop.f32.mrf.mxu0 }
 0x12f   :  { %1482 = vst.msk [vmem:[%s3348_s3 + $0x44] sm:$0xf] %vm1464_vm0, %v1381_v60  ;;  %v1182_v4 = vadd.f32 %v1181_v62, %v923_v61  ;;  %v801_v5 = vadd.f32 %v2430_v48, %v800_v1  ;;  %v1059_v6 = vpop.f32.mrf.mxu1  ;;  %v1923_v60 = vld [vmem:[%s3347_s0 + $0x2c0] sm:$0xf]  ;;  %v2122_v61 = vld [vmem:[%s3347_s0 + $0x2c4] sm:$0xf0] }
 0x130   :  { %v2071_v62 = vld [vmem:[%s3347_s0 + $0x134] sm:$0xf] }
 0x131   :  { %v1331_v7 = vmax.f32 %v1182_v4, 0.0  ;;  %v1060_v8 = vadd.f32 %v1059_v6, %v801_v5  ;;  %839 = vmatmul.bf16.gmra.mxu0 %v1708_v63  ;;  %964 = vmatmul.bf16.gmra.mxu2 %v1908_v0  ;;  %v1725_v63 = vld [vmem:[%s3347_s0 + $0x138] sm:$0xf0] }
 0x132   :  { %1098 = vmatmul.bf16.gmra.mxu1 %v1712_v2  ;;  %1223 = vmatmul.bf16.gmra.mxu3 %v1912_v3  ;;  %v2121_v2 = vld [vmem:[%s3347_s0 + $0x2c4] sm:$0xf]  ;;  %v1925_v3 = vld [vmem:[%s3347_s0 + $0x2c8] sm:$0xf0] }
 0x133   :  { %v1431_v9 = vpack.c.bf16 %v1331_v7, %v1331_v7  ;;  %v1282_v10 = vmax.f32 %v1060_v8, 0.0  ;;  %v1724_v8 = vor.u32 %v2072_v59, %v1723_v56 }
 0x134   :  { %v925_v11 = vpop.f32.mrf.mxu2 }
 0x135   :  { %1532 = vst.msk [vmem:[%s3348_s3 + $0x10c] sm:$0xf] %vm1464_vm0, %v1431_v9  ;;  %v1382_v12 = vpack.c.bf16 %v1282_v10, %v1282_v10  ;;  %v926_v13 = vadd.f32 %v2430_v48, %v925_v11  ;;  %v1184_v14 = vpop.f32.mrf.mxu3  ;;  %v1924_v9 = vor.u32 %v2122_v61, %v1923_v60  ;;  %v1728_v11 = vor.u32 %v2071_v62, %v1725_v63 }
 0x136   :  { %v802_v15 = vpop.f32.mrf.mxu0 }
 0x137   :  { %1483 = vst.msk [vmem:[%s3348_s3 + $0x48] sm:$0xf] %vm1464_vm0, %v1382_v12  ;;  %v1185_v16 = vadd.f32 %v1184_v14, %v926_v13  ;;  %v803_v17 = vadd.f32 %v2430_v48, %v802_v15  ;;  %v1061_v18 = vpop.f32.mrf.mxu1  ;;  %v1928_v12 = vor.u32 %v2121_v2, %v1925_v3 }
 0x139   :  { %v1332_v20 = vmax.f32 %v1185_v16, 0.0  ;;  %v1062_v21 = vadd.f32 %v1061_v18, %v803_v17 }
 0x13b   :  { %v1432_v27 = vpack.c.bf16 %v1332_v20, %v1332_v20  ;;  %v1283_v28 = vmax.f32 %v1062_v21, 0.0 }
 0x13c   :  { %v927_v31 = vpop.f32.mrf.mxu2 }
 0x13d   :  { %1533 = vst.msk [vmem:[%s3348_s3 + $0x110] sm:$0xf] %vm1464_vm0, %v1432_v27  ;;  %v1383_v32 = vpack.c.bf16 %v1283_v28, %v1283_v28  ;;  %v928_v33 = vadd.f32 %v2430_v48, %v927_v31  ;;  %v1186_v34 = vpop.f32.mrf.mxu3  ;;  %v2074_v31 = vld [vmem:[%s3347_s0 + $0x144] sm:$0xf0] }
 0x13e   :  { %v805_v37 = vpop.f32.mrf.mxu0 }
 0x13f   :  { %1484 = vst.msk [vmem:[%s3348_s3 + $0x4c] sm:$0xf] %vm1464_vm0, %v1383_v32  ;;  %v1187_v40 = vadd.f32 %v1186_v34, %v928_v33  ;;  %v806_v41 = vadd.f32 %v2430_v48, %v805_v37  ;;  %v1064_v42 = vpop.f32.mrf.mxu1  ;;  %v1931_v32 = vld [vmem:[%s3347_s0 + $0x2d0] sm:$0xf]  ;;  %v2124_v33 = vld [vmem:[%s3347_s0 + $0x2d4] sm:$0xf0] }
 0x140   :  { %v2073_v34 = vld [vmem:[%s3347_s0 + $0x144] sm:$0xf] }
 0x141   :  { %v1333_v43 = vmax.f32 %v1187_v40, 0.0  ;;  %v1065_v44 = vadd.f32 %v1064_v42, %v806_v41  ;;  %844 = vmatmul.bf16.gmra.mxu0 %v1716_v35  ;;  %969 = vmatmul.bf16.gmra.mxu2 %v1916_v36  ;;  %v1733_v35 = vld [vmem:[%s3347_s0 + $0x148] sm:$0xf0] }
 0x142   :  { %1103 = vmatmul.bf16.gmra.mxu1 %v1720_v38  ;;  %1228 = vmatmul.bf16.gmra.mxu3 %v1920_v39  ;;  %v2123_v38 = vld [vmem:[%s3347_s0 + $0x2d4] sm:$0xf]  ;;  %v1933_v39 = vld [vmem:[%s3347_s0 + $0x2d8] sm:$0xf0] }
 0x143   :  { %v1433_v45 = vpack.c.bf16 %v1333_v43, %v1333_v43  ;;  %v1284_v46 = vmax.f32 %v1065_v44, 0.0 }
 0x144   :  { %v930_v47 = vpop.f32.mrf.mxu2 }
 0x145   :  { %1534 = vst.msk [vmem:[%s3348_s3 + $0x114] sm:$0xf] %vm1464_vm0, %v1433_v45  ;;  %v1384_v49 = vpack.c.bf16 %v1284_v46, %v1284_v46  ;;  %v931_v50 = vadd.f32 %v2430_v48, %v930_v47  ;;  %v1189_v51 = vpop.f32.mrf.mxu3  ;;  %v1932_v45 = vor.u32 %v2124_v33, %v1931_v32  ;;  %v1736_v47 = vor.u32 %v2073_v34, %v1733_v35 }
 0x146   :  { %v807_v52 = vpop.f32.mrf.mxu0 }
 0x147   :  { %1485 = vst.msk [vmem:[%s3348_s3 + $0x50] sm:$0xf] %vm1464_vm0, %v1384_v49  ;;  %v1190_v53 = vadd.f32 %v1189_v51, %v931_v50  ;;  %v808_v54 = vadd.f32 %v2430_v48, %v807_v52  ;;  %v1066_v55 = vpop.f32.mrf.mxu1  ;;  %v1936_v49 = vor.u32 %v2123_v38, %v1933_v39 }
 0x149   :  { %v1334_v57 = vmax.f32 %v1190_v53, 0.0  ;;  %v1067_v58 = vadd.f32 %v1066_v55, %v808_v54 }
 0x14b   :  { %v1434_v0 = vpack.c.bf16 %v1334_v57, %v1334_v57  ;;  %v1285_v1 = vmax.f32 %v1067_v58, 0.0 }
 0x14c   :  { %v932_v4 = vpop.f32.mrf.mxu2 }
 0x14d   :  { %1535 = vst.msk [vmem:[%s3348_s3 + $0x118] sm:$0xf] %vm1464_vm0, %v1434_v0  ;;  %v1385_v5 = vpack.c.bf16 %v1285_v1, %v1285_v1  ;;  %v933_v6 = vadd.f32 %v2430_v48, %v932_v4  ;;  %v1191_v7 = vpop.f32.mrf.mxu3  ;;  %v1739_v1 = vld [vmem:[%s3347_s0 + $0x150] sm:$0xf]  ;;  %v2076_v4 = vld [vmem:[%s3347_s0 + $0x154] sm:$0xf0] }
 0x14e   :  { %v810_v10 = vpop.f32.mrf.mxu0 }
 0x14f   :  { %1486 = vst.msk [vmem:[%s3348_s3 + $0x54] sm:$0xf] %vm1464_vm0, %v1385_v5  ;;  %v1192_v13 = vadd.f32 %v1191_v7, %v933_v6  ;;  %v811_v14 = vadd.f32 %v2430_v48, %v810_v10  ;;  %v1069_v15 = vpop.f32.mrf.mxu1  ;;  %v1939_v5 = vld [vmem:[%s3347_s0 + $0x2e0] sm:$0xf]  ;;  %v2126_v6 = vld [vmem:[%s3347_s0 + $0x2e4] sm:$0xf0] }
 0x150   :  { %v2075_v7 = vld [vmem:[%s3347_s0 + $0x154] sm:$0xf] }
 0x151   :  { %v1335_v16 = vmax.f32 %v1192_v13, 0.0  ;;  %v1070_v17 = vadd.f32 %v1069_v15, %v811_v14  ;;  %849 = vmatmul.bf16.gmra.mxu0 %v1724_v8  ;;  %974 = vmatmul.bf16.gmra.mxu2 %v1924_v9  ;;  %v1741_v8 = vld [vmem:[%s3347_s0 + $0x158] sm:$0xf0] }
 0x152   :  { %1108 = vmatmul.bf16.gmra.mxu1 %v1728_v11  ;;  %1233 = vmatmul.bf16.gmra.mxu3 %v1928_v12  ;;  %v2125_v11 = vld [vmem:[%s3347_s0 + $0x2e4] sm:$0xf]  ;;  %v1941_v12 = vld [vmem:[%s3347_s0 + $0x2e8] sm:$0xf0] }
 0x153   :  { %v1435_v18 = vpack.c.bf16 %v1335_v16, %v1335_v16  ;;  %v1286_v19 = vmax.f32 %v1070_v17, 0.0  ;;  %v1740_v17 = vor.u32 %v2076_v4, %v1739_v1 }
 0x154   :  { %v935_v20 = vpop.f32.mrf.mxu2 }
 0x155   :  { %1536 = vst.msk [vmem:[%s3348_s3 + $0x11c] sm:$0xf] %vm1464_vm0, %v1435_v18  ;;  %v1386_v21 = vpack.c.bf16 %v1286_v19, %v1286_v19  ;;  %v936_v22 = vadd.f32 %v2430_v48, %v935_v20  ;;  %v1194_v23 = vpop.f32.mrf.mxu3  ;;  %v1731_v48 = vld [vmem:[%s3347_s0 + $0x140] sm:$0xf]  ;;  %v1940_v18 = vor.u32 %v2126_v6, %v1939_v5  ;;  %v1744_v20 = vor.u32 %v2075_v7, %v1741_v8 }
 0x156   :  { %v812_v24 = vpop.f32.mrf.mxu0  ;;  %v1732_v44 = vor.u32 %v2074_v31, %v1731_v48 }
 0x157   :  { %1487 = vst.msk [vmem:[%s3348_s3 + $0x58] sm:$0xf] %vm1464_vm0, %v1386_v21  ;;  %v1195_v25 = vadd.f32 %v1194_v23, %v936_v22  ;;  %v813_v27 = vadd.f32 %v2949_v26, %v812_v24  ;;  %v1071_v28 = vpop.f32.mrf.mxu1  ;;  %v1944_v21 = vor.u32 %v2125_v11, %v1941_v12 }
 0x159   :  { %v1336_v29 = vmax.f32 %v1195_v25, 0.0  ;;  %v1072_v30 = vadd.f32 %v1071_v28, %v813_v27 }
 0x15b   :  { %v1436_v36 = vpack.c.bf16 %v1336_v29, %v1336_v29  ;;  %v1287_v37 = vmax.f32 %v1072_v30, 0.0 }
 0x15c   :  { %v937_v40 = vpop.f32.mrf.mxu2 }
 0x15d   :  { %1537 = vst.msk [vmem:[%s3348_s3 + $0x120] sm:$0xf] %vm1464_vm0, %v1436_v36  ;;  %v1387_v41 = vpack.c.bf16 %v1287_v37, %v1287_v37  ;;  %v938_v42 = vadd.f32 %v2949_v26, %v937_v40  ;;  %v1196_v43 = vpop.f32.mrf.mxu3  ;;  %v1747_v37 = vld [vmem:[%s3347_s0 + $0x160] sm:$0xf]  ;;  %v2078_v40 = vld [vmem:[%s3347_s0 + $0x164] sm:$0xf0] }
 0x15e   :  { %v815_v46 = vpop.f32.mrf.mxu0 }
 0x15f   :  { %1488 = vst.msk [vmem:[%s3348_s3 + $0x5c] sm:$0xf] %vm1464_vm0, %v1387_v41  ;;  %v1197_v50 = vadd.f32 %v1196_v43, %v938_v42  ;;  %v816_v51 = vadd.f32 %v2949_v26, %v815_v46  ;;  %v1074_v52 = vpop.f32.mrf.mxu1  ;;  %v1947_v41 = vld [vmem:[%s3347_s0 + $0x2f0] sm:$0xf]  ;;  %v2128_v42 = vld [vmem:[%s3347_s0 + $0x2f4] sm:$0xf0] }
 0x160   :  { %v2077_v43 = vld [vmem:[%s3347_s0 + $0x164] sm:$0xf] }
 0x161   :  { %v1337_v53 = vmax.f32 %v1197_v50, 0.0  ;;  %v1075_v54 = vadd.f32 %v1074_v52, %v816_v51  ;;  %854 = vmatmul.bf16.gmra.mxu0 %v1732_v44  ;;  %979 = vmatmul.bf16.gmra.mxu2 %v1932_v45  ;;  %v1749_v44 = vld [vmem:[%s3347_s0 + $0x168] sm:$0xf0] }
 0x162   :  { %1113 = vmatmul.bf16.gmra.mxu1 %v1736_v47  ;;  %1238 = vmatmul.bf16.gmra.mxu3 %v1936_v49  ;;  %v2127_v47 = vld [vmem:[%s3347_s0 + $0x2f4] sm:$0xf]  ;;  %v1949_v49 = vld [vmem:[%s3347_s0 + $0x2f8] sm:$0xf0] }
 0x163   :  { %v1437_v55 = vpack.c.bf16 %v1337_v53, %v1337_v53  ;;  %v1288_v56 = vmax.f32 %v1075_v54, 0.0  ;;  %v1748_v54 = vor.u32 %v2078_v40, %v1747_v37 }
 0x164   :  { %v940_v57 = vpop.f32.mrf.mxu2 }
 0x165   :  { %1538 = vst.msk [vmem:[%s3348_s3 + $0x124] sm:$0xf] %vm1464_vm0, %v1437_v55  ;;  %v1388_v58 = vpack.c.bf16 %v1288_v56, %v1288_v56  ;;  %v941_v59 = vadd.f32 %v2949_v26, %v940_v57  ;;  %v1199_v60 = vpop.f32.mrf.mxu3  ;;  %v1948_v55 = vor.u32 %v2128_v42, %v1947_v41  ;;  %v1752_v57 = vor.u32 %v2077_v43, %v1749_v44 }
 0x166   :  { %v817_v61 = vpop.f32.mrf.mxu0 }
 0x167   :  { %1489 = vst.msk [vmem:[%s3348_s3 + $0x60] sm:$0xf] %vm1464_vm0, %v1388_v58  ;;  %v1200_v62 = vadd.f32 %v1199_v60, %v941_v59  ;;  %v818_v63 = vadd.f32 %v2949_v26, %v817_v61  ;;  %v1076_v0 = vpop.f32.mrf.mxu1  ;;  %v1952_v58 = vor.u32 %v2127_v47, %v1949_v49 }
 0x169   :  { %v1338_v2 = vmax.f32 %v1200_v62, 0.0  ;;  %v1077_v3 = vadd.f32 %v1076_v0, %v818_v63 }
 0x16b   :  { %v1438_v9 = vpack.c.bf16 %v1338_v2, %v1338_v2  ;;  %v1289_v10 = vmax.f32 %v1077_v3, 0.0 }
 0x16c   :  { %v942_v13 = vpop.f32.mrf.mxu2 }
 0x16d   :  { %1539 = vst.msk [vmem:[%s3348_s3 + $0x128] sm:$0xf] %vm1464_vm0, %v1438_v9  ;;  %v1389_v14 = vpack.c.bf16 %v1289_v10, %v1289_v10  ;;  %v943_v15 = vadd.f32 %v2949_v26, %v942_v13  ;;  %v1201_v16 = vpop.f32.mrf.mxu3  ;;  %v1755_v10 = vld [vmem:[%s3347_s0 + $0x170] sm:$0xf]  ;;  %v2080_v13 = vld [vmem:[%s3347_s0 + $0x174] sm:$0xf0] }
 0x16e   :  { %v820_v19 = vpop.f32.mrf.mxu0 }
 0x16f   :  { %1490 = vst.msk [vmem:[%s3348_s3 + $0x64] sm:$0xf] %vm1464_vm0, %v1389_v14  ;;  %v1202_v22 = vadd.f32 %v1201_v16, %v943_v15  ;;  %v821_v23 = vadd.f32 %v2949_v26, %v820_v19  ;;  %v1079_v24 = vpop.f32.mrf.mxu1  ;;  %v1955_v14 = vld [vmem:[%s3347_s0 + $0x300] sm:$0xf]  ;;  %v2130_v15 = vld [vmem:[%s3347_s0 + $0x304] sm:$0xf0] }
 0x170   :  { %v2079_v16 = vld [vmem:[%s3347_s0 + $0x174] sm:$0xf] }
 0x171   :  { %v1339_v25 = vmax.f32 %v1202_v22, 0.0  ;;  %v1080_v27 = vadd.f32 %v1079_v24, %v821_v23  ;;  %859 = vmatmul.bf16.gmra.mxu0 %v1740_v17  ;;  %984 = vmatmul.bf16.gmra.mxu2 %v1940_v18  ;;  %v1757_v17 = vld [vmem:[%s3347_s0 + $0x178] sm:$0xf0] }
 0x172   :  { %1118 = vmatmul.bf16.gmra.mxu1 %v1744_v20  ;;  %1243 = vmatmul.bf16.gmra.mxu3 %v1944_v21  ;;  %v2129_v20 = vld [vmem:[%s3347_s0 + $0x304] sm:$0xf]  ;;  %v1957_v21 = vld [vmem:[%s3347_s0 + $0x308] sm:$0xf0] }
 0x173   :  { %v1439_v28 = vpack.c.bf16 %v1339_v25, %v1339_v25  ;;  %v1290_v48 = vmax.f32 %v1080_v27, 0.0  ;;  %v1756_v27 = vor.u32 %v2080_v13, %v1755_v10 }
 0x174   :  { %v945_v29 = vpop.f32.mrf.mxu2 }
 0x175   :  { %1540 = vst.msk [vmem:[%s3348_s3 + $0x12c] sm:$0xf] %vm1464_vm0, %v1439_v28  ;;  %v1390_v30 = vpack.c.bf16 %v1290_v48, %v1290_v48  ;;  %v946_v31 = vadd.f32 %v2949_v26, %v945_v29  ;;  %v1204_v32 = vpop.f32.mrf.mxu3  ;;  %v1956_v28 = vor.u32 %v2130_v15, %v1955_v14  ;;  %v1760_v29 = vor.u32 %v2079_v16, %v1757_v17 }
 0x176   :  { %v822_v33 = vpop.f32.mrf.mxu0 }
 0x177   :  { %1491 = vst.msk [vmem:[%s3348_s3 + $0x68] sm:$0xf] %vm1464_vm0, %v1390_v30  ;;  %v1205_v34 = vadd.f32 %v1204_v32, %v946_v31  ;;  %v823_v35 = vadd.f32 %v2949_v26, %v822_v33  ;;  %v1081_v36 = vpop.f32.mrf.mxu1  ;;  %v1960_v30 = vor.u32 %v2129_v20, %v1957_v21 }
 0x179   :  { %v1340_v38 = vmax.f32 %v1205_v34, 0.0  ;;  %v1082_v39 = vadd.f32 %v1081_v36, %v823_v35 }
 0x17b   :  { %v1440_v45 = vpack.c.bf16 %v1340_v38, %v1340_v38  ;;  %v1291_v46 = vmax.f32 %v1082_v39, 0.0 }
 0x17c   :  { %v947_v50 = vpop.f32.mrf.mxu2 }
 0x17d   :  { %1541 = vst.msk [vmem:[%s3348_s3 + $0x130] sm:$0xf] %vm1464_vm0, %v1440_v45  ;;  %v1391_v51 = vpack.c.bf16 %v1291_v46, %v1291_v46  ;;  %v948_v52 = vadd.f32 %v2949_v26, %v947_v50  ;;  %v1206_v53 = vpop.f32.mrf.mxu3  ;;  %v1763_v46 = vld [vmem:[%s3347_s0 + $0x180] sm:$0xf]  ;;  %v2082_v50 = vld [vmem:[%s3347_s0 + $0x184] sm:$0xf0] }
 0x17e   :  { %v825_v56 = vpop.f32.mrf.mxu0 }
 0x17f   :  { %1492 = vst.msk [vmem:[%s3348_s3 + $0x6c] sm:$0xf] %vm1464_vm0, %v1391_v51  ;;  %v1207_v59 = vadd.f32 %v1206_v53, %v948_v52  ;;  %v826_v60 = vadd.f32 %v2949_v26, %v825_v56  ;;  %v1084_v61 = vpop.f32.mrf.mxu1  ;;  %v1963_v51 = vld [vmem:[%s3347_s0 + $0x310] sm:$0xf]  ;;  %v2132_v52 = vld [vmem:[%s3347_s0 + $0x314] sm:$0xf0] }
 0x180   :  { %v2081_v53 = vld [vmem:[%s3347_s0 + $0x184] sm:$0xf] }
 0x181   :  { %v1341_v62 = vmax.f32 %v1207_v59, 0.0  ;;  %v1085_v63 = vadd.f32 %v1084_v61, %v826_v60  ;;  %864 = vmatmul.bf16.gmra.mxu0 %v1748_v54  ;;  %989 = vmatmul.bf16.gmra.mxu2 %v1948_v55  ;;  %v1765_v54 = vld [vmem:[%s3347_s0 + $0x188] sm:$0xf0] }
 0x182   :  { %1123 = vmatmul.bf16.gmra.mxu1 %v1752_v57  ;;  %1248 = vmatmul.bf16.gmra.mxu3 %v1952_v58  ;;  %v2131_v57 = vld [vmem:[%s3347_s0 + $0x314] sm:$0xf]  ;;  %v1965_v58 = vld [vmem:[%s3347_s0 + $0x318] sm:$0xf0] }
 0x183   :  { %v1441_v0 = vpack.c.bf16 %v1341_v62, %v1341_v62  ;;  %v1292_v1 = vmax.f32 %v1085_v63, 0.0  ;;  %v1764_v63 = vor.u32 %v2082_v50, %v1763_v46 }
 0x184   :  { %v950_v2 = vpop.f32.mrf.mxu2 }
 0x185   :  { %1542 = vst.msk [vmem:[%s3348_s3 + $0x134] sm:$0xf] %vm1464_vm0, %v1441_v0  ;;  %v1392_v3 = vpack.c.bf16 %v1292_v1, %v1292_v1  ;;  %v951_v4 = vadd.f32 %v2949_v26, %v950_v2  ;;  %v1209_v5 = vpop.f32.mrf.mxu3  ;;  %v1964_v0 = vor.u32 %v2132_v52, %v1963_v51  ;;  %v1768_v2 = vor.u32 %v2081_v53, %v1765_v54 }
 0x186   :  { %v827_v6 = vpop.f32.mrf.mxu0 }
 0x187   :  { %1493 = vst.msk [vmem:[%s3348_s3 + $0x70] sm:$0xf] %vm1464_vm0, %v1392_v3  ;;  %v1210_v7 = vadd.f32 %v1209_v5, %v951_v4  ;;  %v828_v8 = vadd.f32 %v2949_v26, %v827_v6  ;;  %v1086_v9 = vpop.f32.mrf.mxu1  ;;  %v1968_v3 = vor.u32 %v2131_v57, %v1965_v58 }
 0x189   :  { %v1342_v11 = vmax.f32 %v1210_v7, 0.0  ;;  %v1087_v12 = vadd.f32 %v1086_v9, %v828_v8 }
 0x18b   :  { %v1442_v18 = vpack.c.bf16 %v1342_v11, %v1342_v11  ;;  %v1293_v19 = vmax.f32 %v1087_v12, 0.0 }
 0x18c   :  { %v952_v22 = vpop.f32.mrf.mxu2 }
 0x18d   :  { %1543 = vst.msk [vmem:[%s3348_s3 + $0x138] sm:$0xf] %vm1464_vm0, %v1442_v18  ;;  %v1393_v23 = vpack.c.bf16 %v1293_v19, %v1293_v19  ;;  %v953_v24 = vadd.f32 %v2949_v26, %v952_v22  ;;  %v1211_v25 = vpop.f32.mrf.mxu3 }
 0x18e   :  { %v830_v48 = vpop.f32.mrf.mxu0 }
 0x18f   :  { %1494 = vst.msk [vmem:[%s3348_s3 + $0x74] sm:$0xf] %vm1464_vm0, %v1393_v23  ;;  %v1212_v31 = vadd.f32 %v1211_v25, %v953_v24  ;;  %v831_v32 = vadd.f32 %v2949_v26, %v830_v48  ;;  %v1089_v33 = vpop.f32.mrf.mxu1 }
 0x191   :  { %v1343_v34 = vmax.f32 %v1212_v31, 0.0  ;;  %v1090_v35 = vadd.f32 %v1089_v33, %v831_v32  ;;  %869 = vmatmul.bf16.gmra.mxu0 %v1756_v27  ;;  %994 = vmatmul.bf16.gmra.mxu2 %v1956_v28 }
 0x192   :  { %1128 = vmatmul.bf16.gmra.mxu1 %v1760_v29  ;;  %1253 = vmatmul.bf16.gmra.mxu3 %v1960_v30 }
 0x193   :  { %v1443_v36 = vpack.c.bf16 %v1343_v34, %v1343_v34  ;;  %v1294_v37 = vmax.f32 %v1090_v35, 0.0 }
 0x194   :  { %v955_v38 = vpop.f32.mrf.mxu2 }
 0x195   :  { %1544 = vst.msk [vmem:[%s3348_s3 + $0x13c] sm:$0xf] %vm1464_vm0, %v1443_v36  ;;  %v1394_v39 = vpack.c.bf16 %v1294_v37, %v1294_v37  ;;  %v956_v40 = vadd.f32 %v2949_v26, %v955_v38  ;;  %v1214_v41 = vpop.f32.mrf.mxu3 }
 0x196   :  { %v832_v42 = vpop.f32.mrf.mxu0 }
 0x197   :  { %1495 = vst.msk [vmem:[%s3348_s3 + $0x78] sm:$0xf] %vm1464_vm0, %v1394_v39  ;;  %v1215_v43 = vadd.f32 %v1214_v41, %v956_v40  ;;  %v833_v44 = vadd.f32 %v2949_v26, %v832_v42  ;;  %v1091_v45 = vpop.f32.mrf.mxu1 }
 0x199   :  { %v1344_v47 = vmax.f32 %v1215_v43, 0.0  ;;  %v1092_v49 = vadd.f32 %v1091_v45, %v833_v44 }
 0x19b   :  { %v1444_v55 = vpack.c.bf16 %v1344_v47, %v1344_v47  ;;  %v1295_v56 = vmax.f32 %v1092_v49, 0.0 }
 0x19c   :  { %v957_v59 = vpop.f32.mrf.mxu2 }
 0x19d   :  { %1545 = vst.msk [vmem:[%s3348_s3 + $0x140] sm:$0xf] %vm1464_vm0, %v1444_v55  ;;  %v1395_v60 = vpack.c.bf16 %v1295_v56, %v1295_v56  ;;  %v958_v61 = vadd.f32 %v2949_v26, %v957_v59  ;;  %v1216_v62 = vpop.f32.mrf.mxu3 }
 0x19e   :  { %v835_v1 = vpop.f32.mrf.mxu0 }
 0x19f   :  { %1496 = vst.msk [vmem:[%s3348_s3 + $0x7c] sm:$0xf] %vm1464_vm0, %v1395_v60  ;;  %v1217_v4 = vadd.f32 %v1216_v62, %v958_v61  ;;  %v836_v5 = vadd.f32 %v2949_v26, %v835_v1  ;;  %v1094_v6 = vpop.f32.mrf.mxu1 }
 0x1a1   :  { %v1345_v7 = vmax.f32 %v1217_v4, 0.0  ;;  %v1095_v8 = vadd.f32 %v1094_v6, %v836_v5  ;;  %874 = vmatmul.bf16.gmra.mxu0 %v1764_v63  ;;  %999 = vmatmul.bf16.gmra.mxu2 %v1964_v0 }
 0x1a2   :  { %1133 = vmatmul.bf16.gmra.mxu1 %v1768_v2  ;;  %1258 = vmatmul.bf16.gmra.mxu3 %v1968_v3 }
 0x1a3   :  { %v1445_v9 = vpack.c.bf16 %v1345_v7, %v1345_v7  ;;  %v1296_v10 = vmax.f32 %v1095_v8, 0.0 }
 0x1a4   :  { %v960_v11 = vpop.f32.mrf.mxu2 }
 0x1a5   :  { %1546 = vst.msk [vmem:[%s3348_s3 + $0x144] sm:$0xf] %vm1464_vm0, %v1445_v9  ;;  %v1396_v12 = vpack.c.bf16 %v1296_v10, %v1296_v10  ;;  %v961_v13 = vadd.f32 %v2949_v26, %v960_v11  ;;  %v1219_v14 = vpop.f32.mrf.mxu3 }
 0x1a6   :  { %v837_v15 = vpop.f32.mrf.mxu0 }
 0x1a7   :  { %1497 = vst.msk [vmem:[%s3348_s3 + $0x80] sm:$0xf] %vm1464_vm0, %v1396_v12  ;;  %v1220_v16 = vadd.f32 %v1219_v14, %v961_v13  ;;  %v838_v17 = vadd.f32 %v2949_v26, %v837_v15  ;;  %v1096_v18 = vpop.f32.mrf.mxu1 }
 0x1a9   :  { %v1346_v19 = vmax.f32 %v1220_v16, 0.0  ;;  %v1097_v20 = vadd.f32 %v1096_v18, %v838_v17 }
 0x1ab   :  { %v1446_v21 = vpack.c.bf16 %v1346_v19, %v1346_v19  ;;  %v1297_v22 = vmax.f32 %v1097_v20, 0.0 }
 0x1ac   :  { %v962_v23 = vpop.f32.mrf.mxu2 }
 0x1ad   :  { %1547 = vst.msk [vmem:[%s3348_s3 + $0x148] sm:$0xf] %vm1464_vm0, %v1446_v21  ;;  %v1397_v24 = vpack.c.bf16 %v1297_v22, %v1297_v22  ;;  %v963_v25 = vadd.f32 %v2949_v26, %v962_v23  ;;  %v1221_v27 = vpop.f32.mrf.mxu3 }
 0x1ae   :  { %v840_v28 = vpop.f32.mrf.mxu0 }
 0x1af   :  { %1498 = vst.msk [vmem:[%s3348_s3 + $0x84] sm:$0xf] %vm1464_vm0, %v1397_v24  ;;  %v1222_v48 = vadd.f32 %v1221_v27, %v963_v25  ;;  %v841_v29 = vadd.f32 %v2949_v26, %v840_v28  ;;  %v1099_v30 = vpop.f32.mrf.mxu1 }
 0x1b1   :  { %v1347_v31 = vmax.f32 %v1222_v48, 0.0  ;;  %v1100_v32 = vadd.f32 %v1099_v30, %v841_v29 }
 0x1b3   :  { %v1447_v33 = vpack.c.bf16 %v1347_v31, %v1347_v31  ;;  %v1298_v34 = vmax.f32 %v1100_v32, 0.0 }
 0x1b4   :  { %v965_v35 = vpop.f32.mrf.mxu2 }
 0x1b5   :  { %1548 = vst.msk [vmem:[%s3348_s3 + $0x14c] sm:$0xf] %vm1464_vm0, %v1447_v33  ;;  %v1398_v36 = vpack.c.bf16 %v1298_v34, %v1298_v34  ;;  %v966_v37 = vadd.f32 %v2949_v26, %v965_v35  ;;  %v1224_v38 = vpop.f32.mrf.mxu3 }
 0x1b6   :  { %v842_v39 = vpop.f32.mrf.mxu0 }
 0x1b7   :  { %1499 = vst.msk [vmem:[%s3348_s3 + $0x88] sm:$0xf] %vm1464_vm0, %v1398_v36  ;;  %v1225_v40 = vadd.f32 %v1224_v38, %v966_v37  ;;  %v843_v41 = vadd.f32 %v2949_v26, %v842_v39  ;;  %v1101_v42 = vpop.f32.mrf.mxu1 }
 0x1b9   :  { %v1348_v43 = vmax.f32 %v1225_v40, 0.0  ;;  %v1102_v44 = vadd.f32 %v1101_v42, %v843_v41 }
 0x1bb   :  { %v1448_v45 = vpack.c.bf16 %v1348_v43, %v1348_v43  ;;  %v1299_v46 = vmax.f32 %v1102_v44, 0.0 }
 0x1bc   :  { %v967_v47 = vpop.f32.mrf.mxu2 }
 0x1bd   :  { %1549 = vst.msk [vmem:[%s3348_s3 + $0x150] sm:$0xf] %vm1464_vm0, %v1448_v45  ;;  %v1399_v49 = vpack.c.bf16 %v1299_v46, %v1299_v46  ;;  %v968_v50 = vadd.f32 %v2949_v26, %v967_v47  ;;  %v1226_v51 = vpop.f32.mrf.mxu3 }
 0x1be   :  { %v845_v52 = vpop.f32.mrf.mxu0 }
 0x1bf   :  { %1500 = vst.msk [vmem:[%s3348_s3 + $0x8c] sm:$0xf] %vm1464_vm0, %v1399_v49  ;;  %v1227_v53 = vadd.f32 %v1226_v51, %v968_v50  ;;  %v846_v54 = vadd.f32 %v2949_v26, %v845_v52  ;;  %v1104_v55 = vpop.f32.mrf.mxu1 }
 0x1c1   :  { %v1349_v56 = vmax.f32 %v1227_v53, 0.0  ;;  %v1105_v57 = vadd.f32 %v1104_v55, %v846_v54 }
 0x1c3   :  { %v1449_v58 = vpack.c.bf16 %v1349_v56, %v1349_v56  ;;  %v1300_v59 = vmax.f32 %v1105_v57, 0.0 }
 0x1c4   :  { %v970_v60 = vpop.f32.mrf.mxu2 }
 0x1c5   :  { %1550 = vst.msk [vmem:[%s3348_s3 + $0x154] sm:$0xf] %vm1464_vm0, %v1449_v58  ;;  %v1400_v61 = vpack.c.bf16 %v1300_v59, %v1300_v59  ;;  %v971_v62 = vadd.f32 %v2949_v26, %v970_v60  ;;  %v1229_v63 = vpop.f32.mrf.mxu3 }
 0x1c6   :  { %v847_v0 = vpop.f32.mrf.mxu0 }
 0x1c7   :  { %1501 = vst.msk [vmem:[%s3348_s3 + $0x90] sm:$0xf] %vm1464_vm0, %v1400_v61  ;;  %v1230_v1 = vadd.f32 %v1229_v63, %v971_v62  ;;  %v848_v2 = vadd.f32 %v2949_v26, %v847_v0  ;;  %v1106_v3 = vpop.f32.mrf.mxu1 }
 0x1c9   :  { %v1350_v4 = vmax.f32 %v1230_v1, 0.0  ;;  %v1107_v5 = vadd.f32 %v1106_v3, %v848_v2 }
 0x1cb   :  { %v1450_v6 = vpack.c.bf16 %v1350_v4, %v1350_v4  ;;  %v1301_v7 = vmax.f32 %v1107_v5, 0.0 }
 0x1cc   :  { %v972_v8 = vpop.f32.mrf.mxu2 }
 0x1cd   :  { %1551 = vst.msk [vmem:[%s3348_s3 + $0x158] sm:$0xf] %vm1464_vm0, %v1450_v6  ;;  %v1401_v9 = vpack.c.bf16 %v1301_v7, %v1301_v7  ;;  %v973_v10 = vadd.f32 %v2949_v26, %v972_v8  ;;  %v1231_v11 = vpop.f32.mrf.mxu3 }
 0x1ce   :  { %v850_v12 = vpop.f32.mrf.mxu0 }
 0x1cf   :  { %1502 = vst.msk [vmem:[%s3348_s3 + $0x94] sm:$0xf] %vm1464_vm0, %v1401_v9  ;;  %v1232_v13 = vadd.f32 %v1231_v11, %v973_v10  ;;  %v851_v14 = vadd.f32 %v2949_v26, %v850_v12  ;;  %v1109_v15 = vpop.f32.mrf.mxu1 }
 0x1d1   :  { %v1351_v16 = vmax.f32 %v1232_v13, 0.0  ;;  %v1110_v17 = vadd.f32 %v1109_v15, %v851_v14 }
 0x1d3   :  { %v1451_v18 = vpack.c.bf16 %v1351_v16, %v1351_v16  ;;  %v1302_v19 = vmax.f32 %v1110_v17, 0.0 }
 0x1d4   :  { %v975_v20 = vpop.f32.mrf.mxu2 }
 0x1d5   :  { %1552 = vst.msk [vmem:[%s3348_s3 + $0x15c] sm:$0xf] %vm1464_vm0, %v1451_v18  ;;  %v1402_v21 = vpack.c.bf16 %v1302_v19, %v1302_v19  ;;  %v976_v22 = vadd.f32 %v2949_v26, %v975_v20  ;;  %v1234_v23 = vpop.f32.mrf.mxu3 }
 0x1d6   :  { %v852_v24 = vpop.f32.mrf.mxu0 }
 0x1d7   :  { %1503 = vst.msk [vmem:[%s3348_s3 + $0x98] sm:$0xf] %vm1464_vm0, %v1402_v21  ;;  %v1235_v25 = vadd.f32 %v1234_v23, %v976_v22  ;;  %v853_v27 = vadd.f32 %v2949_v26, %v852_v24  ;;  %v1111_v28 = vpop.f32.mrf.mxu1 }
 0x1d9   :  { %v1352_v48 = vmax.f32 %v1235_v25, 0.0  ;;  %v1112_v29 = vadd.f32 %v1111_v28, %v853_v27 }
 0x1db   :  { %v1452_v30 = vpack.c.bf16 %v1352_v48, %v1352_v48  ;;  %v1303_v31 = vmax.f32 %v1112_v29, 0.0 }
 0x1dc   :  { %v977_v32 = vpop.f32.mrf.mxu2 }
 0x1dd   :  { %1553 = vst.msk [vmem:[%s3348_s3 + $0x160] sm:$0xf] %vm1464_vm0, %v1452_v30  ;;  %v1403_v33 = vpack.c.bf16 %v1303_v31, %v1303_v31  ;;  %v978_v34 = vadd.f32 %v2949_v26, %v977_v32  ;;  %v1236_v35 = vpop.f32.mrf.mxu3 }
 0x1de   :  { %v855_v36 = vpop.f32.mrf.mxu0 }
 0x1df   :  { %1504 = vst.msk [vmem:[%s3348_s3 + $0x9c] sm:$0xf] %vm1464_vm0, %v1403_v33  ;;  %v1237_v37 = vadd.f32 %v1236_v35, %v978_v34  ;;  %v856_v38 = vadd.f32 %v2949_v26, %v855_v36  ;;  %v1114_v39 = vpop.f32.mrf.mxu1 }
 0x1e1   :  { %v1353_v40 = vmax.f32 %v1237_v37, 0.0  ;;  %v1115_v41 = vadd.f32 %v1114_v39, %v856_v38 }
 0x1e3   :  { %v1453_v42 = vpack.c.bf16 %v1353_v40, %v1353_v40  ;;  %v1304_v43 = vmax.f32 %v1115_v41, 0.0 }
 0x1e4   :  { %v980_v44 = vpop.f32.mrf.mxu2 }
 0x1e5   :  { %1554 = vst.msk [vmem:[%s3348_s3 + $0x164] sm:$0xf] %vm1464_vm0, %v1453_v42  ;;  %v1404_v45 = vpack.c.bf16 %v1304_v43, %v1304_v43  ;;  %v981_v46 = vadd.f32 %v2949_v26, %v980_v44  ;;  %v1239_v47 = vpop.f32.mrf.mxu3 }
 0x1e6   :  { %v857_v49 = vpop.f32.mrf.mxu0 }
 0x1e7   :  { %1505 = vst.msk [vmem:[%s3348_s3 + $0xa0] sm:$0xf] %vm1464_vm0, %v1404_v45  ;;  %v1240_v50 = vadd.f32 %v1239_v47, %v981_v46  ;;  %v858_v51 = vadd.f32 %v2949_v26, %v857_v49  ;;  %v1116_v52 = vpop.f32.mrf.mxu1 }
 0x1e9   :  { %v1354_v53 = vmax.f32 %v1240_v50, 0.0  ;;  %v1117_v54 = vadd.f32 %v1116_v52, %v858_v51 }
 0x1eb   :  { %v1454_v55 = vpack.c.bf16 %v1354_v53, %v1354_v53  ;;  %v1305_v56 = vmax.f32 %v1117_v54, 0.0 }
 0x1ec   :  { %v982_v57 = vpop.f32.mrf.mxu2 }
 0x1ed   :  { %1555 = vst.msk [vmem:[%s3348_s3 + $0x168] sm:$0xf] %vm1464_vm0, %v1454_v55  ;;  %v1405_v58 = vpack.c.bf16 %v1305_v56, %v1305_v56  ;;  %v983_v59 = vadd.f32 %v2949_v26, %v982_v57  ;;  %v1241_v60 = vpop.f32.mrf.mxu3 }
 0x1ee   :  { %v860_v61 = vpop.f32.mrf.mxu0 }
 0x1ef   :  { %1506 = vst.msk [vmem:[%s3348_s3 + $0xa4] sm:$0xf] %vm1464_vm0, %v1405_v58  ;;  %v1242_v62 = vadd.f32 %v1241_v60, %v983_v59  ;;  %v861_v63 = vadd.f32 %v2949_v26, %v860_v61  ;;  %v1119_v0 = vpop.f32.mrf.mxu1 }
 0x1f1   :  { %v1355_v1 = vmax.f32 %v1242_v62, 0.0  ;;  %v1120_v2 = vadd.f32 %v1119_v0, %v861_v63 }
 0x1f3   :  { %v1455_v3 = vpack.c.bf16 %v1355_v1, %v1355_v1  ;;  %v1306_v4 = vmax.f32 %v1120_v2, 0.0 }
 0x1f4   :  { %v985_v5 = vpop.f32.mrf.mxu2 }
 0x1f5   :  { %1556 = vst.msk [vmem:[%s3348_s3 + $0x16c] sm:$0xf] %vm1464_vm0, %v1455_v3  ;;  %v1406_v6 = vpack.c.bf16 %v1306_v4, %v1306_v4  ;;  %v986_v7 = vadd.f32 %v2949_v26, %v985_v5  ;;  %v1244_v8 = vpop.f32.mrf.mxu3 }
 0x1f6   :  { %v862_v9 = vpop.f32.mrf.mxu0 }
 0x1f7   :  { %1507 = vst.msk [vmem:[%s3348_s3 + $0xa8] sm:$0xf] %vm1464_vm0, %v1406_v6  ;;  %v1245_v10 = vadd.f32 %v1244_v8, %v986_v7  ;;  %v863_v11 = vadd.f32 %v2949_v26, %v862_v9  ;;  %v1121_v12 = vpop.f32.mrf.mxu1 }
 0x1f9   :  { %v1356_v13 = vmax.f32 %v1245_v10, 0.0  ;;  %v1122_v14 = vadd.f32 %v1121_v12, %v863_v11 }
 0x1fb   :  { %v1456_v15 = vpack.c.bf16 %v1356_v13, %v1356_v13  ;;  %v1307_v16 = vmax.f32 %v1122_v14, 0.0 }
 0x1fc   :  { %v987_v17 = vpop.f32.mrf.mxu2 }
 0x1fd   :  { %1557 = vst.msk [vmem:[%s3348_s3 + $0x170] sm:$0xf] %vm1464_vm0, %v1456_v15  ;;  %v1407_v18 = vpack.c.bf16 %v1307_v16, %v1307_v16  ;;  %v988_v19 = vadd.f32 %v2949_v26, %v987_v17  ;;  %v1246_v20 = vpop.f32.mrf.mxu3 }
 0x1fe   :  { %v865_v21 = vpop.f32.mrf.mxu0 }
 0x1ff   :  { %1508 = vst.msk [vmem:[%s3348_s3 + $0xac] sm:$0xf] %vm1464_vm0, %v1407_v18  ;;  %v1247_v22 = vadd.f32 %v1246_v20, %v988_v19  ;;  %v866_v23 = vadd.f32 %v2949_v26, %v865_v21  ;;  %v1124_v24 = vpop.f32.mrf.mxu1 }
 0x201   :  { %v1357_v25 = vmax.f32 %v1247_v22, 0.0  ;;  %v1125_v27 = vadd.f32 %v1124_v24, %v866_v23 }
 0x203   :  { %v1457_v28 = vpack.c.bf16 %v1357_v25, %v1357_v25  ;;  %v1308_v48 = vmax.f32 %v1125_v27, 0.0 }
 0x204   :  { %v990_v29 = vpop.f32.mrf.mxu2 }
 0x205   :  { %1558 = vst.msk [vmem:[%s3348_s3 + $0x174] sm:$0xf] %vm1464_vm0, %v1457_v28  ;;  %v1408_v30 = vpack.c.bf16 %v1308_v48, %v1308_v48  ;;  %v991_v31 = vadd.f32 %v2949_v26, %v990_v29  ;;  %v1249_v32 = vpop.f32.mrf.mxu3 }
 0x206   :  { %v867_v33 = vpop.f32.mrf.mxu0 }
 0x207   :  { %1509 = vst.msk [vmem:[%s3348_s3 + $0xb0] sm:$0xf] %vm1464_vm0, %v1408_v30  ;;  %v1250_v34 = vadd.f32 %v1249_v32, %v991_v31  ;;  %v868_v35 = vadd.f32 %v2949_v26, %v867_v33  ;;  %v1126_v36 = vpop.f32.mrf.mxu1 }
 0x209   :  { %v1358_v37 = vmax.f32 %v1250_v34, 0.0  ;;  %v1127_v38 = vadd.f32 %v1126_v36, %v868_v35 }
 0x20b   :  { %v1458_v39 = vpack.c.bf16 %v1358_v37, %v1358_v37  ;;  %v1309_v40 = vmax.f32 %v1127_v38, 0.0 }
 0x20c   :  { %v992_v41 = vpop.f32.mrf.mxu2 }
 0x20d   :  { %1559 = vst.msk [vmem:[%s3348_s3 + $0x178] sm:$0xf] %vm1464_vm0, %v1458_v39  ;;  %v1409_v42 = vpack.c.bf16 %v1309_v40, %v1309_v40  ;;  %v993_v43 = vadd.f32 %v2949_v26, %v992_v41  ;;  %v1251_v44 = vpop.f32.mrf.mxu3 }
 0x20e   :  { %v870_v45 = vpop.f32.mrf.mxu0 }
 0x20f   :  { %1510 = vst.msk [vmem:[%s3348_s3 + $0xb4] sm:$0xf] %vm1464_vm0, %v1409_v42  ;;  %v1252_v46 = vadd.f32 %v1251_v44, %v993_v43  ;;  %v871_v47 = vadd.f32 %v2949_v26, %v870_v45  ;;  %v1129_v49 = vpop.f32.mrf.mxu1 }
 0x211   :  { %v1359_v50 = vmax.f32 %v1252_v46, 0.0  ;;  %v1130_v51 = vadd.f32 %v1129_v49, %v871_v47 }
 0x213   :  { %v1459_v52 = vpack.c.bf16 %v1359_v50, %v1359_v50  ;;  %v1310_v53 = vmax.f32 %v1130_v51, 0.0 }
 0x214   :  { %v995_v54 = vpop.f32.mrf.mxu2 }
 0x215   :  { %1560 = vst.msk [vmem:[%s3348_s3 + $0x17c] sm:$0xf] %vm1464_vm0, %v1459_v52  ;;  %v1410_v55 = vpack.c.bf16 %v1310_v53, %v1310_v53  ;;  %v996_v56 = vadd.f32 %v2949_v26, %v995_v54  ;;  %v1254_v57 = vpop.f32.mrf.mxu3 }
 0x216   :  { %v872_v58 = vpop.f32.mrf.mxu0 }
 0x217   :  { %1511 = vst.msk [vmem:[%s3348_s3 + $0xb8] sm:$0xf] %vm1464_vm0, %v1410_v55  ;;  %v1255_v59 = vadd.f32 %v1254_v57, %v996_v56  ;;  %v873_v60 = vadd.f32 %v2949_v26, %v872_v58  ;;  %v1131_v61 = vpop.f32.mrf.mxu1 }
 0x219   :  { %v1360_v62 = vmax.f32 %v1255_v59, 0.0  ;;  %v1132_v63 = vadd.f32 %v1131_v61, %v873_v60 }
 0x21b   :  { %v1460_v0 = vpack.c.bf16 %v1360_v62, %v1360_v62  ;;  %v1311_v1 = vmax.f32 %v1132_v63, 0.0 }
 0x21c   :  { %v997_v2 = vpop.f32.mrf.mxu2 }
 0x21d   :  { %1561 = vst.msk [vmem:[%s3348_s3 + $0x180] sm:$0xf] %vm1464_vm0, %v1460_v0  ;;  %v1411_v3 = vpack.c.bf16 %v1311_v1, %v1311_v1  ;;  %v998_v4 = vadd.f32 %v2949_v26, %v997_v2  ;;  %v1256_v5 = vpop.f32.mrf.mxu3 }
 0x21e   :  { %v875_v6 = vpop.f32.mrf.mxu0 }
 0x21f   :  { %1512 = vst.msk [vmem:[%s3348_s3 + $0xbc] sm:$0xf] %vm1464_vm0, %v1411_v3  ;;  %v1257_v7 = vadd.f32 %v1256_v5, %v998_v4  ;;  %v876_v8 = vadd.f32 %v2949_v26, %v875_v6  ;;  %v1134_v9 = vpop.f32.mrf.mxu1 }
 0x221   :  { %v1361_v10 = vmax.f32 %v1257_v7, 0.0  ;;  %v1135_v11 = vadd.f32 %v1134_v9, %v876_v8 }
 0x223   :  { %v1461_v12 = vpack.c.bf16 %v1361_v10, %v1361_v10  ;;  %v1312_v13 = vmax.f32 %v1135_v11, 0.0 }
 0x224   :  { %v1000_v14 = vpop.f32.mrf.mxu2 }
 0x225   :  { %1562 = vst.msk [vmem:[%s3348_s3 + $0x184] sm:$0xf] %vm1464_vm0, %v1461_v12  ;;  %v1412_v15 = vpack.c.bf16 %v1312_v13, %v1312_v13  ;;  %v1001_v16 = vadd.f32 %v2949_v26, %v1000_v14  ;;  %v1259_v17 = vpop.f32.mrf.mxu3 }
 0x226   :  { %v877_v18 = vpop.f32.mrf.mxu0 }
 0x227   :  { %1513 = vst.msk [vmem:[%s3348_s3 + $0xc0] sm:$0xf] %vm1464_vm0, %v1412_v15  ;;  %v1260_v19 = vadd.f32 %v1259_v17, %v1001_v16  ;;  %v878_v20 = vadd.f32 %v2949_v26, %v877_v18  ;;  %v1136_v21 = vpop.f32.mrf.mxu1 }
 0x229   :  { %v1362_v22 = vmax.f32 %v1260_v19, 0.0  ;;  %v1137_v23 = vadd.f32 %v1136_v21, %v878_v20 }
 0x22b   :  { %v1462_v24 = vpack.c.bf16 %v1362_v22, %v1362_v22  ;;  %v1313_v25 = vmax.f32 %v1137_v23, 0.0 }
 0x22c   :  { %v1002_v27 = vpop.f32.mrf.mxu2 }
 0x22d   :  { %1563 = vst.msk [vmem:[%s3348_s3 + $0x188] sm:$0xf] %vm1464_vm0, %v1462_v24  ;;  %v1413_v28 = vpack.c.bf16 %v1313_v25, %v1313_v25  ;;  %v1003_v48 = vadd.f32 %v2949_v26, %v1002_v27  ;;  %v1261_v29 = vpop.f32.mrf.mxu3 }
 0x22f   :  { %1514 = vst.msk [vmem:[%s3348_s3 + $0xc4] sm:$0xf] %vm1464_vm0, %v1413_v28  ;;  %v1262_v30 = vadd.f32 %v1261_v29, %v1003_v48 }
 0x231   :  { %v1363_v31 = vmax.f32 %v1262_v30, 0.0 }
 0x233   :  { %v1463_v32 = vpack.c.bf16 %v1363_v31, %v1363_v31 }
 0x235   :  { %1564 = vst.msk [vmem:[%s3348_s3 + $0x18c] sm:$0xf] %vm1464_vm0, %v1463_v32 }

// kernel: state_action_critic_forward.5
= control target key start
LH: loop header
LB: loop body
LE: loop exit
PB: predicated region body
PF: predicated region fallthrough
CT: control target
= control target key end

     0   :  { %vm838_vm0 = vcmask 519168   ;;  %s1861_s0 = inlined_call_operand.vmem [shape: bf16[162,512], index: 0, kind: input, shape index: {}]   ;;  %s1862_s1 = inlined_call_operand.vmem [shape: bf16[512,64], index: 1, kind: input, shape index: {}]   ;;  %s1863_s2 = inlined_call_operand.vmem [shape: f32[1,64], index: 2, kind: input, shape index: {}]   ;;  %s1864_s3 = inlined_call_operand.vmem [shape: bf16[162,64], index: 3, kind: output, shape index: {}]  }
   0x1   :  { %v1345_v0 = vld [vmem:[%s1862_s1 + $0x38] sm:$0xff]  ;;  %v1344_v4 = vld [vmem:[%s1862_s1 + $0x30] sm:$0xff]  ;;  %v1343_v8 = vld [vmem:[%s1862_s1 + $0x28] sm:$0xff] }
   0x2   :  { %v1353_v1 = vld [vmem:[%s1862_s1 + $0x78] sm:$0xff]  ;;  %538 = vmatpush.bf16.msra.mxu0 %v1345_v0  ;;  %v1352_v5 = vld [vmem:[%s1862_s1 + $0x70] sm:$0xff]  ;;  %v1351_v9 = vld [vmem:[%s1862_s1 + $0x68] sm:$0xff] }
   0x3   :  { %v1361_v2 = vld [vmem:[%s1862_s1 + $0xb8] sm:$0xff]  ;;  %602 = vmatpush.bf16.msra.mxu1 %v1353_v1  ;;  %v1360_v6 = vld [vmem:[%s1862_s1 + $0xb0] sm:$0xff]  ;;  %v1359_v10 = vld [vmem:[%s1862_s1 + $0xa8] sm:$0xff] }
   0x4   :  { %v1369_v3 = vld [vmem:[%s1862_s1 + $0xf8] sm:$0xff]  ;;  %666 = vmatpush.bf16.msra.mxu2 %v1361_v2  ;;  %v1368_v7 = vld [vmem:[%s1862_s1 + $0xf0] sm:$0xff]  ;;  %v1367_v11 = vld [vmem:[%s1862_s1 + $0xe8] sm:$0xff] }
   0x5   :  { %730 = vmatpush.bf16.msra.mxu3 %v1369_v3  ;;  %v1342_v12 = vld [vmem:[%s1862_s1 + $0x20] sm:$0xff]  ;;  %v1341_v16 = vld [vmem:[%s1862_s1 + $0x18] sm:$0xff]  ;;  %v1340_v20 = vld [vmem:[%s1862_s1 + $0x10] sm:$0xff] }
   0x6   :  { %539 = vmatpush.bf16.msra.mxu0 %v1344_v4  ;;  %v1350_v13 = vld [vmem:[%s1862_s1 + $0x60] sm:$0xff]  ;;  %v1349_v17 = vld [vmem:[%s1862_s1 + $0x58] sm:$0xff]  ;;  %v1348_v21 = vld [vmem:[%s1862_s1 + $0x50] sm:$0xff] }
   0x7   :  { %603 = vmatpush.bf16.msra.mxu1 %v1352_v5  ;;  %v1358_v14 = vld [vmem:[%s1862_s1 + $0xa0] sm:$0xff]  ;;  %v1357_v18 = vld [vmem:[%s1862_s1 + $0x98] sm:$0xff]  ;;  %v1356_v22 = vld [vmem:[%s1862_s1 + $0x90] sm:$0xff] }
   0x8   :  { %667 = vmatpush.bf16.msra.mxu2 %v1360_v6  ;;  %v1366_v15 = vld [vmem:[%s1862_s1 + $0xe0] sm:$0xff]  ;;  %v1365_v19 = vld [vmem:[%s1862_s1 + $0xd8] sm:$0xff]  ;;  %v1364_v23 = vld [vmem:[%s1862_s1 + $0xd0] sm:$0xff] }
   0x9   :  { %731 = vmatpush.bf16.msra.mxu3 %v1368_v7  ;;  %v1339_v24 = vld [vmem:[%s1862_s1 + $0x8] sm:$0xff]  ;;  %v1338_v28 = vld [vmem:[%s1862_s1] sm:$0xff]  ;;  %v1296_v33 = vld [vmem:[%s1861_s0 + $0xc] sm:$0xf0] }
   0xa   :  { %540 = vmatpush.bf16.msra.mxu0 %v1343_v8  ;;  %v1347_v25 = vld [vmem:[%s1862_s1 + $0x48] sm:$0xff]  ;;  %v1346_v29 = vld [vmem:[%s1862_s1 + $0x40] sm:$0xff]  ;;  %v994_v35 = vld [vmem:[%s1861_s0 + $0x10] sm:$0xf0] }
   0xb   :  { %604 = vmatpush.bf16.msra.mxu1 %v1351_v9  ;;  %v1355_v26 = vld [vmem:[%s1862_s1 + $0x88] sm:$0xff]  ;;  %v1354_v30 = vld [vmem:[%s1862_s1 + $0x80] sm:$0xff]  ;;  %v1297_v37 = vld [vmem:[%s1861_s0 + $0x14] sm:$0xf0] }
   0xc   :  { %668 = vmatpush.bf16.msra.mxu2 %v1359_v10  ;;  %v1363_v27 = vld [vmem:[%s1862_s1 + $0xc8] sm:$0xff]  ;;  %v1362_v31 = vld [vmem:[%s1862_s1 + $0xc0] sm:$0xff]  ;;  %v1002_v39 = vld [vmem:[%s1861_s0 + $0x18] sm:$0xf0] }
   0xd   :  { %732 = vmatpush.bf16.msra.mxu3 %v1367_v11  ;;  %v992_v32 = vld [vmem:[%s1861_s0] sm:$0xf]  ;;  %v1294_v34 = vld [vmem:[%s1861_s0 + $0x4] sm:$0xf]  ;;  %v1000_v36 = vld [vmem:[%s1861_s0 + $0x8] sm:$0xf] }
   0xe   :  { %541 = vmatpush.bf16.msra.mxu0 %v1342_v12  ;;  %v1295_v38 = vld [vmem:[%s1861_s0 + $0xc] sm:$0xf]  ;;  %v993_v40 = vor.u32 %v1296_v33, %v992_v32  ;;  %v997_v41 = vor.u32 %v1294_v34, %v994_v35  ;;  %v1001_v42 = vor.u32 %v1297_v37, %v1000_v36  ;;  %v1008_v44 = vld [vmem:[%s1861_s0 + $0x20] sm:$0xf]  ;;  %v1300_v45 = vld [vmem:[%s1861_s0 + $0x2c] sm:$0xf0] }
   0xf   :  { %605 = vmatpush.bf16.msra.mxu1 %v1350_v13  ;;  %v1005_v43 = vor.u32 %v1295_v38, %v1002_v39  ;;  %v1298_v46 = vld [vmem:[%s1861_s0 + $0x24] sm:$0xf]  ;;  %v1010_v47 = vld [vmem:[%s1861_s0 + $0x30] sm:$0xf0]  ;;  %v1016_v48 = vld [vmem:[%s1861_s0 + $0x28] sm:$0xf]  ;;  %v1009_v52 = vor.u32 %v1300_v45, %v1008_v44 }
  0x10   :  { %669 = vmatpush.bf16.msra.mxu2 %v1358_v14  ;;  %v1301_v49 = vld [vmem:[%s1861_s0 + $0x34] sm:$0xf0]  ;;  %v1299_v50 = vld [vmem:[%s1861_s0 + $0x2c] sm:$0xf]  ;;  %v1018_v51 = vld [vmem:[%s1861_s0 + $0x38] sm:$0xf0]  ;;  %v1013_v53 = vor.u32 %v1298_v46, %v1010_v47 }
  0x11   :  { %733 = vmatpush.bf16.msra.mxu3 %v1366_v15  ;;  %v1017_v54 = vor.u32 %v1301_v49, %v1016_v48  ;;  %v1021_v55 = vor.u32 %v1299_v50, %v1018_v51  ;;  %v1024_v56 = vld [vmem:[%s1861_s0 + $0x40] sm:$0xf]  ;;  %v1304_v57 = vld [vmem:[%s1861_s0 + $0x4c] sm:$0xf0]  ;;  %v1302_v58 = vld [vmem:[%s1861_s0 + $0x44] sm:$0xf] }
  0x12   :  { %542 = vmatpush.bf16.msra.mxu0 %v1341_v16  ;;  %v1026_v59 = vld [vmem:[%s1861_s0 + $0x50] sm:$0xf0]  ;;  %v1032_v60 = vld [vmem:[%s1861_s0 + $0x48] sm:$0xf]  ;;  %v1305_v61 = vld [vmem:[%s1861_s0 + $0x54] sm:$0xf0]  ;;  %v1025_v0 = vor.u32 %v1304_v57, %v1024_v56 }
  0x13   :  { %606 = vmatpush.bf16.msra.mxu1 %v1349_v17  ;;  %v1303_v62 = vld [vmem:[%s1861_s0 + $0x4c] sm:$0xf]  ;;  %v1034_v63 = vld [vmem:[%s1861_s0 + $0x58] sm:$0xf0]  ;;  %v1029_v1 = vor.u32 %v1302_v58, %v1026_v59  ;;  %v1033_v2 = vor.u32 %v1305_v61, %v1032_v60  ;;  %v1040_v4 = vld [vmem:[%s1861_s0 + $0x60] sm:$0xf] }
  0x14   :  { %670 = vmatpush.bf16.msra.mxu2 %v1357_v18  ;;  %v1037_v3 = vor.u32 %v1303_v62, %v1034_v63  ;;  %v1308_v5 = vld [vmem:[%s1861_s0 + $0x6c] sm:$0xf0]  ;;  %v1306_v6 = vld [vmem:[%s1861_s0 + $0x64] sm:$0xf]  ;;  %v1042_v7 = vld [vmem:[%s1861_s0 + $0x70] sm:$0xf0] }
  0x15   :  { %734 = vmatpush.bf16.msra.mxu3 %v1365_v19  ;;  %v1048_v8 = vld [vmem:[%s1861_s0 + $0x68] sm:$0xf]  ;;  %v1309_v9 = vld [vmem:[%s1861_s0 + $0x74] sm:$0xf0]  ;;  %v1307_v10 = vld [vmem:[%s1861_s0 + $0x6c] sm:$0xf]  ;;  %v1041_v12 = vor.u32 %v1308_v5, %v1040_v4  ;;  %v1045_v13 = vor.u32 %v1306_v6, %v1042_v7 }
  0x16   :  { %543 = vmatpush.bf16.msra.mxu0 %v1340_v20  ;;  %v1050_v11 = vld [vmem:[%s1861_s0 + $0x78] sm:$0xf0]  ;;  %v1049_v14 = vor.u32 %v1309_v9, %v1048_v8  ;;  %v1056_v16 = vld [vmem:[%s1861_s0 + $0x80] sm:$0xf]  ;;  %v1312_v17 = vld [vmem:[%s1861_s0 + $0x8c] sm:$0xf0] }
  0x17   :  { %607 = vmatpush.bf16.msra.mxu1 %v1348_v21  ;;  %v1053_v15 = vor.u32 %v1307_v10, %v1050_v11  ;;  %v1310_v18 = vld [vmem:[%s1861_s0 + $0x84] sm:$0xf]  ;;  %v1058_v19 = vld [vmem:[%s1861_s0 + $0x90] sm:$0xf0]  ;;  %v1064_v20 = vld [vmem:[%s1861_s0 + $0x88] sm:$0xf] }
  0x18   :  { %671 = vmatpush.bf16.msra.mxu2 %v1356_v22  ;;  %v1313_v21 = vld [vmem:[%s1861_s0 + $0x94] sm:$0xf0]  ;;  %v1311_v22 = vld [vmem:[%s1861_s0 + $0x8c] sm:$0xf]  ;;  %v1080_v32 = vld [vmem:[%s1861_s0 + $0xa8] sm:$0xf] }
  0x19   :  { %735 = vmatpush.bf16.msra.mxu3 %v1364_v23  ;;  %v1066_v23 = vld [vmem:[%s1861_s0 + $0x98] sm:$0xf0]  ;;  %v1317_v33 = vld [vmem:[%s1861_s0 + $0xb4] sm:$0xf0]  ;;  %v1315_v34 = vld [vmem:[%s1861_s0 + $0xac] sm:$0xf] }
  0x1a   :  { %544 = vmatpush.bf16.msra.mxu0 %v1339_v24  ;;  %v1057_v24 = vor.u32 %v1312_v17, %v1056_v16  ;;  %v1082_v35 = vld [vmem:[%s1861_s0 + $0xb8] sm:$0xf0]  ;;  %v1081_v38 = vor.u32 %v1317_v33, %v1080_v32  ;;  %v1096_v44 = vld [vmem:[%s1861_s0 + $0xc8] sm:$0xf]  ;;  %v1321_v45 = vld [vmem:[%s1861_s0 + $0xd4] sm:$0xf0] }
  0x1b   :  { %608 = vmatpush.bf16.msra.mxu1 %v1347_v25  ;;  %v1061_v25 = vor.u32 %v1310_v18, %v1058_v19  ;;  %v1085_v39 = vor.u32 %v1315_v34, %v1082_v35  ;;  %v1319_v46 = vld [vmem:[%s1861_s0 + $0xcc] sm:$0xf]  ;;  %v1098_v47 = vld [vmem:[%s1861_s0 + $0xd8] sm:$0xf0]  ;;  %v1097_v50 = vor.u32 %v1321_v45, %v1096_v44  ;;  %v1112_v56 = vld [vmem:[%s1861_s0 + $0xe8] sm:$0xf] }
  0x1c   :  { %672 = vmatpush.bf16.msra.mxu2 %v1355_v26  ;;  %v1065_v26 = vor.u32 %v1313_v21, %v1064_v20  ;;  %v1101_v51 = vor.u32 %v1319_v46, %v1098_v47  ;;  %v1325_v57 = vld [vmem:[%s1861_s0 + $0xf4] sm:$0xf0]  ;;  %v1323_v58 = vld [vmem:[%s1861_s0 + $0xec] sm:$0xf]  ;;  %v1114_v59 = vld [vmem:[%s1861_s0 + $0xf8] sm:$0xf0] }
  0x1d   :  { %736 = vmatpush.bf16.msra.mxu3 %v1363_v27  ;;  %v1069_v27 = vor.u32 %v1311_v22, %v1066_v23  ;;  %v1113_v62 = vor.u32 %v1325_v57, %v1112_v56  ;;  %v1117_v63 = vor.u32 %v1323_v58, %v1114_v59  ;;  %v1122_v4 = vld [vmem:[%s1861_s0 + $0x110] sm:$0xf0]  ;;  %v1128_v5 = vld [vmem:[%s1861_s0 + $0x108] sm:$0xf]  ;;  %v1329_v6 = vld [vmem:[%s1861_s0 + $0x114] sm:$0xf0] }
  0x1e   :  { %545 = vmatpush.bf16.msra.mxu0 %v1338_v28  ;;  %v1072_v28 = vld [vmem:[%s1861_s0 + $0xa0] sm:$0xf]  ;;  %v1327_v7 = vld [vmem:[%s1861_s0 + $0x10c] sm:$0xf]  ;;  %v1130_v8 = vld [vmem:[%s1861_s0 + $0x118] sm:$0xf0] }
  0x1f   :  { %609 = vmatpush.bf16.msra.mxu1 %v1346_v29  ;;  %v1316_v29 = vld [vmem:[%s1861_s0 + $0xac] sm:$0xf0]  ;;  %v1146_v32 = vld [vmem:[%s1861_s0 + $0x138] sm:$0xf0]  ;;  %v1152_v57 = vld [vmem:[%s1861_s0 + $0x140] sm:$0xf] }
  0x20   :  { %673 = vmatpush.bf16.msra.mxu2 %v1354_v30  ;;  %v1314_v30 = vld [vmem:[%s1861_s0 + $0xa4] sm:$0xf]  ;;  %v1073_v36 = vor.u32 %v1316_v29, %v1072_v28  ;;  %v1138_v28 = vld [vmem:[%s1861_s0 + $0x130] sm:$0xf0]  ;;  %v1144_v29 = vld [vmem:[%s1861_s0 + $0x128] sm:$0xf] }
  0x21   :  { %737 = vmatpush.bf16.msra.mxu3 %v1362_v31  ;;  %546 = vmatmul.bf16.vlgmr.msra.gmra.mxu0 %v993_v40  ;;  %v1074_v31 = vld [vmem:[%s1861_s0 + $0xb0] sm:$0xf0]  ;;  %v1088_v40 = vld [vmem:[%s1861_s0 + $0xc0] sm:$0xf]  ;;  %v1336_v58 = vld [vmem:[%s1861_s0 + $0x14c] sm:$0xf0] }
  0x22   :  { %610 = vmatmul.bf16.vlgmr.msra.gmra.mxu1 %v997_v41  ;;  %v1077_v37 = vor.u32 %v1314_v30, %v1074_v31  ;;  %v1320_v41 = vld [vmem:[%s1861_s0 + $0xcc] sm:$0xf0]  ;;  %v1333_v30 = vld [vmem:[%s1861_s0 + $0x134] sm:$0xf0]  ;;  %v1331_v31 = vld [vmem:[%s1861_s0 + $0x12c] sm:$0xf] }
  0x23   :  { %674 = vmatmul.bf16.vlgmr.msra.gmra.mxu2 %v1001_v42  ;;  %v1318_v42 = vld [vmem:[%s1861_s0 + $0xc4] sm:$0xf]  ;;  %v1089_v48 = vor.u32 %v1320_v41, %v1088_v40 }
  0x24   :  { %738 = vmatmul.bf16.vlgmr.msra.gmra.mxu3 %v1005_v43  ;;  %v1090_v43 = vld [vmem:[%s1861_s0 + $0xd0] sm:$0xf0]  ;;  %v1334_v59 = vld [vmem:[%s1861_s0 + $0x144] sm:$0xf] }
  0x25   :  { %v1093_v49 = vor.u32 %v1318_v42, %v1090_v43  ;;  %v1145_v42 = vor.u32 %v1333_v30, %v1144_v29  ;;  %v1149_v43 = vor.u32 %v1331_v31, %v1146_v32 }
  0x31   :  { %551 = vmatmul.bf16.gmra.mxu0 %v1009_v52  ;;  %v1104_v52 = vld [vmem:[%s1861_s0 + $0xe0] sm:$0xf] }
  0x32   :  { %615 = vmatmul.bf16.gmra.mxu1 %v1013_v53  ;;  %v1324_v53 = vld [vmem:[%s1861_s0 + $0xec] sm:$0xf0] }
  0x33   :  { %679 = vmatmul.bf16.gmra.mxu2 %v1017_v54  ;;  %v1322_v54 = vld [vmem:[%s1861_s0 + $0xe4] sm:$0xf]  ;;  %v1105_v60 = vor.u32 %v1324_v53, %v1104_v52 }
  0x34   :  { %743 = vmatmul.bf16.gmra.mxu3 %v1021_v55  ;;  %v1106_v55 = vld [vmem:[%s1861_s0 + $0xf0] sm:$0xf0] }
  0x35   :  { %v1109_v61 = vor.u32 %v1322_v54, %v1106_v55 }
  0x41   :  { %556 = vmatmul.bf16.gmra.mxu0 %v1025_v0  ;;  %v1682_v0 = vld [vmem:[%s1863_s2] ss:$0 sm:$0xff] }
  0x42   :  { %620 = vmatmul.bf16.gmra.mxu1 %v1029_v1  ;;  %v1120_v1 = vld [vmem:[%s1861_s0 + $0x100] sm:$0xf] }
  0x43   :  { %684 = vmatmul.bf16.gmra.mxu2 %v1033_v2  ;;  %v1328_v2 = vld [vmem:[%s1861_s0 + $0x10c] sm:$0xf0] }
  0x44   :  { %748 = vmatmul.bf16.gmra.mxu3 %v1037_v3  ;;  %v1326_v3 = vld [vmem:[%s1861_s0 + $0x104] sm:$0xf]  ;;  %v1121_v9 = vor.u32 %v1328_v2, %v1120_v1  ;;  %v1335_v1 = vld [vmem:[%s1861_s0 + $0x14c] sm:$0xf]  ;;  %v1162_v2 = vld [vmem:[%s1861_s0 + $0x158] sm:$0xf0] }
  0x45   :  { %v1125_v10 = vor.u32 %v1326_v3, %v1122_v4 }
  0x51   :  { %561 = vmatmul.bf16.gmra.mxu0 %v1041_v12 }
  0x52   :  { %625 = vmatmul.bf16.gmra.mxu1 %v1045_v13  ;;  %v1129_v13 = vor.u32 %v1329_v6, %v1128_v5 }
  0x53   :  { %689 = vmatmul.bf16.gmra.mxu2 %v1049_v14  ;;  %v1133_v14 = vor.u32 %v1327_v7, %v1130_v8  ;;  %v1153_v7 = vor.u32 %v1336_v58, %v1152_v57 }
  0x54   :  { %753 = vmatmul.bf16.gmra.mxu3 %v1053_v15 }
  0x61   :  { %566 = vmatmul.bf16.gmra.mxu0 %v1057_v24  ;;  %v1136_v24 = vld [vmem:[%s1861_s0 + $0x120] sm:$0xf] }
  0x62   :  { %630 = vmatmul.bf16.gmra.mxu1 %v1061_v25  ;;  %v1332_v25 = vld [vmem:[%s1861_s0 + $0x12c] sm:$0xf0] }
  0x63   :  { %694 = vmatmul.bf16.gmra.mxu2 %v1065_v26  ;;  %v1330_v26 = vld [vmem:[%s1861_s0 + $0x124] sm:$0xf] }
  0x64   :  { %758 = vmatmul.bf16.gmra.mxu3 %v1069_v27 }
  0x71   :  { %571 = vmatmul.bf16.gmra.mxu0 %v1073_v36 }
  0x72   :  { %635 = vmatmul.bf16.gmra.mxu1 %v1077_v37  ;;  %v1137_v37 = vor.u32 %v1332_v25, %v1136_v24 }
  0x73   :  { %699 = vmatmul.bf16.gmra.mxu2 %v1081_v38  ;;  %v1141_v38 = vor.u32 %v1330_v26, %v1138_v28 }
  0x74   :  { %763 = vmatmul.bf16.gmra.mxu3 %v1085_v39 }
  0x81   :  { %576 = vmatmul.bf16.gmra.mxu0 %v1089_v48 }
  0x82   :  { %640 = vmatmul.bf16.gmra.mxu1 %v1093_v49 }
  0x83   :  { %704 = vmatmul.bf16.gmra.mxu2 %v1097_v50 }
  0x84   :  { %768 = vmatmul.bf16.gmra.mxu3 %v1101_v51 }
  0x91   :  { %581 = vmatmul.bf16.gmra.mxu0 %v1105_v60 }
  0x92   :  { %645 = vmatmul.bf16.gmra.mxu1 %v1109_v61  ;;  %v1154_v61 = vld [vmem:[%s1861_s0 + $0x150] sm:$0xf0] }
  0x93   :  { %709 = vmatmul.bf16.gmra.mxu2 %v1113_v62  ;;  %v1160_v62 = vld [vmem:[%s1861_s0 + $0x148] sm:$0xf]  ;;  %v1157_v8 = vor.u32 %v1334_v59, %v1154_v61 }
  0x94   :  { %773 = vmatmul.bf16.gmra.mxu3 %v1117_v63  ;;  %v1337_v63 = vld [vmem:[%s1861_s0 + $0x154] sm:$0xf0] }
  0x9e   :  { %v547_v11 = vpop.f32.mrf.mxu0 }
  0x9f   :  { %v611_v12 = vpop.f32.mrf.mxu1  ;;  %v548_v15 = vadd.f32 %v1682_v0, %v547_v11 }
  0xa1   :  { %586 = vmatmul.bf16.gmra.mxu0 %v1121_v9  ;;  %v612_v16 = vadd.f32 %v611_v12, %v548_v15 }
  0xa2   :  { %650 = vmatmul.bf16.gmra.mxu1 %v1125_v10 }
  0xa3   :  { %714 = vmatmul.bf16.gmra.mxu2 %v1129_v13  ;;  %v1161_v13 = vor.u32 %v1337_v63, %v1160_v62 }
  0xa4   :  { %778 = vmatmul.bf16.gmra.mxu3 %v1133_v14  ;;  %v1165_v14 = vor.u32 %v1335_v1, %v1162_v2 }
  0xa6   :  { %v675_v17 = vpop.f32.mrf.mxu2  ;;  %v549_v20 = vpop.f32.mrf.mxu0 }
  0xa7   :  { %v739_v18 = vpop.f32.mrf.mxu3  ;;  %v676_v19 = vadd.f32 %v675_v17, %v612_v16  ;;  %v613_v21 = vpop.f32.mrf.mxu1  ;;  %v550_v23 = vadd.f32 %v1682_v0, %v549_v20 }
  0xa9   :  { %v740_v22 = vadd.f32 %v739_v18, %v676_v19  ;;  %v614_v34 = vadd.f32 %v613_v21, %v550_v23 }
  0xab   :  { %v794_v27 = vmax.f32 %v740_v22, 0.0 }
  0xad   :  { %v816_v33 = vpack.c.bf16 %v794_v27, %v794_v27 }
  0xae   :  { %v677_v35 = vpop.f32.mrf.mxu2  ;;  %v552_v40 = vpop.f32.mrf.mxu0 }
  0xaf   :  { %v741_v36 = vpop.f32.mrf.mxu3  ;;  %839 = vst.msk [vmem:[#allocation2] sm:$0xf] %vm838_vm0, %v816_v33  ;;  %v678_v39 = vadd.f32 %v677_v35, %v614_v34  ;;  %v616_v41 = vpop.f32.mrf.mxu1  ;;  %v553_v44 = vadd.f32 %v1682_v0, %v552_v40 }
  0xb1   :  { %v742_v45 = vadd.f32 %v741_v36, %v678_v39  ;;  %591 = vmatmul.bf16.gmra.mxu0 %v1137_v37  ;;  %v617_v47 = vadd.f32 %v616_v41, %v553_v44 }
  0xb2   :  { %655 = vmatmul.bf16.gmra.mxu1 %v1141_v38 }
  0xb3   :  { %v795_v46 = vmax.f32 %v742_v45, 0.0  ;;  %719 = vmatmul.bf16.gmra.mxu2 %v1145_v42 }
  0xb4   :  { %783 = vmatmul.bf16.gmra.mxu3 %v1149_v43 }
  0xb5   :  { %v817_v48 = vpack.c.bf16 %v795_v46, %v795_v46 }
  0xb6   :  { %v879_v49 = vld [vmem:[#allocation2] sm:$0xf]  ;;  %v680_v50 = vpop.f32.mrf.mxu2  ;;  %v554_v53 = vpop.f32.mrf.mxu0 }
  0xb7   :  { %v744_v51 = vpop.f32.mrf.mxu3  ;;  %880 = vst [vmem:[%s1864_s3] sm:$0xf] %v879_v49  ;;  %v681_v52 = vadd.f32 %v680_v50, %v617_v47  ;;  %v618_v54 = vpop.f32.mrf.mxu1  ;;  %v555_v56 = vadd.f32 %v1682_v0, %v554_v53 }
  0xb8   :  { %840 = vst.msk [vmem:[#allocation2 + $0x4] sm:$0xf] %vm838_vm0, %v817_v48 }
  0xb9   :  { %v745_v55 = vadd.f32 %v744_v51, %v681_v52  ;;  %v619_v4 = vadd.f32 %v618_v54, %v555_v56 }
  0xbb   :  { %v796_v60 = vmax.f32 %v745_v55, 0.0 }
  0xbd   :  { %v818_v3 = vpack.c.bf16 %v796_v60, %v796_v60 }
  0xbe   :  { %v682_v5 = vpop.f32.mrf.mxu2  ;;  %v557_v11 = vpop.f32.mrf.mxu0 }
  0xbf   :  { %v746_v6 = vpop.f32.mrf.mxu3  ;;  %v881_v9 = vld [vmem:[#allocation2 + $0x4] sm:$0xf]  ;;  %841 = vst.msk [vmem:[#allocation2 + $0x8] sm:$0xf] %vm838_vm0, %v818_v3  ;;  %v683_v10 = vadd.f32 %v682_v5, %v619_v4  ;;  %v621_v12 = vpop.f32.mrf.mxu1  ;;  %v558_v15 = vadd.f32 %v1682_v0, %v557_v11 }
  0xc0   :  { %882 = vst [vmem:[%s1864_s3 + $0x4] sm:$0xf] %v881_v9 }
  0xc1   :  { %v747_v16 = vadd.f32 %v746_v6, %v683_v10  ;;  %596 = vmatmul.bf16.gmra.mxu0 %v1153_v7  ;;  %v622_v18 = vadd.f32 %v621_v12, %v558_v15 }
  0xc2   :  { %660 = vmatmul.bf16.gmra.mxu1 %v1157_v8 }
  0xc3   :  { %v797_v17 = vmax.f32 %v747_v16, 0.0  ;;  %724 = vmatmul.bf16.gmra.mxu2 %v1161_v13 }
  0xc4   :  { %788 = vmatmul.bf16.gmra.mxu3 %v1165_v14 }
  0xc5   :  { %v819_v19 = vpack.c.bf16 %v797_v17, %v797_v17 }
  0xc6   :  { %v883_v20 = vld [vmem:[#allocation2 + $0x8] sm:$0xf]  ;;  %v685_v21 = vpop.f32.mrf.mxu2  ;;  %v559_v24 = vpop.f32.mrf.mxu0 }
  0xc7   :  { %v749_v22 = vpop.f32.mrf.mxu3  ;;  %884 = vst [vmem:[%s1864_s3 + $0x8] sm:$0xf] %v883_v20  ;;  %v686_v23 = vadd.f32 %v685_v21, %v622_v18  ;;  %v623_v25 = vpop.f32.mrf.mxu1  ;;  %v560_v27 = vadd.f32 %v1682_v0, %v559_v24 }
  0xc8   :  { %842 = vst.msk [vmem:[#allocation2 + $0xc] sm:$0xf] %vm838_vm0, %v819_v19 }
  0xc9   :  { %v750_v26 = vadd.f32 %v749_v22, %v686_v23  ;;  %v624_v30 = vadd.f32 %v623_v25, %v560_v27 }
  0xcb   :  { %v798_v28 = vmax.f32 %v750_v26, 0.0 }
  0xcd   :  { %v820_v29 = vpack.c.bf16 %v798_v28, %v798_v28 }
  0xce   :  { %v687_v31 = vpop.f32.mrf.mxu2  ;;  %v562_v35 = vpop.f32.mrf.mxu0 }
  0xcf   :  { %v751_v32 = vpop.f32.mrf.mxu3  ;;  %v885_v33 = vld [vmem:[#allocation2 + $0xc] sm:$0xf]  ;;  %843 = vst.msk [vmem:[#allocation2 + $0x10] sm:$0xf] %vm838_vm0, %v820_v29  ;;  %v688_v34 = vadd.f32 %v687_v31, %v624_v30  ;;  %v626_v36 = vpop.f32.mrf.mxu1  ;;  %v563_v37 = vadd.f32 %v1682_v0, %v562_v35 }
  0xd0   :  { %886 = vst [vmem:[%s1864_s3 + $0xc] sm:$0xf] %v885_v33 }
  0xd1   :  { %v752_v38 = vadd.f32 %v751_v32, %v688_v34  ;;  %v627_v40 = vadd.f32 %v626_v36, %v563_v37 }
  0xd3   :  { %v799_v39 = vmax.f32 %v752_v38, 0.0 }
  0xd5   :  { %v821_v41 = vpack.c.bf16 %v799_v39, %v799_v39 }
  0xd6   :  { %v887_v42 = vld [vmem:[#allocation2 + $0x10] sm:$0xf]  ;;  %v690_v43 = vpop.f32.mrf.mxu2  ;;  %v564_v46 = vpop.f32.mrf.mxu0 }
  0xd7   :  { %v754_v44 = vpop.f32.mrf.mxu3  ;;  %888 = vst [vmem:[%s1864_s3 + $0x10] sm:$0xf] %v887_v42  ;;  %v691_v45 = vadd.f32 %v690_v43, %v627_v40  ;;  %v628_v47 = vpop.f32.mrf.mxu1  ;;  %v565_v49 = vadd.f32 %v1682_v0, %v564_v46 }
  0xd8   :  { %844 = vst.msk [vmem:[#allocation2 + $0x14] sm:$0xf] %vm838_vm0, %v821_v41 }
  0xd9   :  { %v755_v48 = vadd.f32 %v754_v44, %v691_v45  ;;  %v629_v52 = vadd.f32 %v628_v47, %v565_v49 }
  0xdb   :  { %v800_v50 = vmax.f32 %v755_v48, 0.0 }
  0xdd   :  { %v822_v51 = vpack.c.bf16 %v800_v50, %v800_v50 }
  0xde   :  { %v692_v53 = vpop.f32.mrf.mxu2  ;;  %v567_v57 = vpop.f32.mrf.mxu0 }
  0xdf   :  { %v756_v54 = vpop.f32.mrf.mxu3  ;;  %v889_v55 = vld [vmem:[#allocation2 + $0x14] sm:$0xf]  ;;  %845 = vst.msk [vmem:[#allocation2 + $0x18] sm:$0xf] %vm838_vm0, %v822_v51  ;;  %v693_v56 = vadd.f32 %v692_v53, %v629_v52  ;;  %v631_v58 = vpop.f32.mrf.mxu1  ;;  %v568_v59 = vadd.f32 %v1682_v0, %v567_v57 }
  0xe0   :  { %890 = vst [vmem:[%s1864_s3 + $0x14] sm:$0xf] %v889_v55 }
  0xe1   :  { %v757_v60 = vadd.f32 %v756_v54, %v693_v56  ;;  %v632_v62 = vadd.f32 %v631_v58, %v568_v59 }
  0xe3   :  { %v801_v61 = vmax.f32 %v757_v60, 0.0 }
  0xe5   :  { %v823_v63 = vpack.c.bf16 %v801_v61, %v801_v61 }
  0xe6   :  { %v891_v1 = vld [vmem:[#allocation2 + $0x18] sm:$0xf]  ;;  %v695_v2 = vpop.f32.mrf.mxu2  ;;  %v569_v5 = vpop.f32.mrf.mxu0 }
  0xe7   :  { %v759_v3 = vpop.f32.mrf.mxu3  ;;  %892 = vst [vmem:[%s1864_s3 + $0x18] sm:$0xf] %v891_v1  ;;  %v696_v4 = vadd.f32 %v695_v2, %v632_v62  ;;  %v633_v6 = vpop.f32.mrf.mxu1  ;;  %v570_v8 = vadd.f32 %v1682_v0, %v569_v5 }
  0xe8   :  { %846 = vst.msk [vmem:[#allocation2 + $0x1c] sm:$0xf] %vm838_vm0, %v823_v63 }
  0xe9   :  { %v760_v7 = vadd.f32 %v759_v3, %v696_v4  ;;  %v634_v11 = vadd.f32 %v633_v6, %v570_v8 }
  0xeb   :  { %v802_v9 = vmax.f32 %v760_v7, 0.0 }
  0xed   :  { %v824_v10 = vpack.c.bf16 %v802_v9, %v802_v9 }
  0xee   :  { %v697_v12 = vpop.f32.mrf.mxu2  ;;  %v572_v16 = vpop.f32.mrf.mxu0 }
  0xef   :  { %v761_v13 = vpop.f32.mrf.mxu3  ;;  %v893_v14 = vld [vmem:[#allocation2 + $0x1c] sm:$0xf]  ;;  %847 = vst.msk [vmem:[#allocation2 + $0x20] sm:$0xf] %vm838_vm0, %v824_v10  ;;  %v698_v15 = vadd.f32 %v697_v12, %v634_v11  ;;  %v636_v17 = vpop.f32.mrf.mxu1  ;;  %v573_v18 = vadd.f32 %v1682_v0, %v572_v16 }
  0xf0   :  { %894 = vst [vmem:[%s1864_s3 + $0x1c] sm:$0xf] %v893_v14 }
  0xf1   :  { %v762_v19 = vadd.f32 %v761_v13, %v698_v15  ;;  %v637_v21 = vadd.f32 %v636_v17, %v573_v18 }
  0xf3   :  { %v803_v20 = vmax.f32 %v762_v19, 0.0 }
  0xf5   :  { %v825_v22 = vpack.c.bf16 %v803_v20, %v803_v20 }
  0xf6   :  { %v895_v23 = vld [vmem:[#allocation2 + $0x20] sm:$0xf]  ;;  %v700_v24 = vpop.f32.mrf.mxu2  ;;  %v574_v27 = vpop.f32.mrf.mxu0 }
  0xf7   :  { %v764_v25 = vpop.f32.mrf.mxu3  ;;  %896 = vst [vmem:[%s1864_s3 + $0x20] sm:$0xf] %v895_v23  ;;  %v701_v26 = vadd.f32 %v700_v24, %v637_v21  ;;  %v638_v28 = vpop.f32.mrf.mxu1  ;;  %v575_v30 = vadd.f32 %v1682_v0, %v574_v27 }
  0xf8   :  { %848 = vst.msk [vmem:[#allocation2 + $0x24] sm:$0xf] %vm838_vm0, %v825_v22 }
  0xf9   :  { %v765_v29 = vadd.f32 %v764_v25, %v701_v26  ;;  %v639_v33 = vadd.f32 %v638_v28, %v575_v30 }
  0xfb   :  { %v804_v31 = vmax.f32 %v765_v29, 0.0 }
  0xfd   :  { %v826_v32 = vpack.c.bf16 %v804_v31, %v804_v31 }
  0xfe   :  { %v702_v34 = vpop.f32.mrf.mxu2  ;;  %v577_v38 = vpop.f32.mrf.mxu0 }
  0xff   :  { %v766_v35 = vpop.f32.mrf.mxu3  ;;  %v897_v36 = vld [vmem:[#allocation2 + $0x24] sm:$0xf]  ;;  %849 = vst.msk [vmem:[#allocation2 + $0x28] sm:$0xf] %vm838_vm0, %v826_v32  ;;  %v703_v37 = vadd.f32 %v702_v34, %v639_v33  ;;  %v641_v39 = vpop.f32.mrf.mxu1  ;;  %v578_v40 = vadd.f32 %v1682_v0, %v577_v38 }
 0x100   :  { %898 = vst [vmem:[%s1864_s3 + $0x24] sm:$0xf] %v897_v36 }
 0x101   :  { %v767_v41 = vadd.f32 %v766_v35, %v703_v37  ;;  %v642_v43 = vadd.f32 %v641_v39, %v578_v40 }
 0x103   :  { %v805_v42 = vmax.f32 %v767_v41, 0.0 }
 0x105   :  { %v827_v44 = vpack.c.bf16 %v805_v42, %v805_v42 }
 0x106   :  { %v899_v45 = vld [vmem:[#allocation2 + $0x28] sm:$0xf]  ;;  %v705_v46 = vpop.f32.mrf.mxu2  ;;  %v579_v49 = vpop.f32.mrf.mxu0 }
 0x107   :  { %v769_v47 = vpop.f32.mrf.mxu3  ;;  %900 = vst [vmem:[%s1864_s3 + $0x28] sm:$0xf] %v899_v45  ;;  %v706_v48 = vadd.f32 %v705_v46, %v642_v43  ;;  %v643_v50 = vpop.f32.mrf.mxu1  ;;  %v580_v52 = vadd.f32 %v1682_v0, %v579_v49 }
 0x108   :  { %850 = vst.msk [vmem:[#allocation2 + $0x2c] sm:$0xf] %vm838_vm0, %v827_v44 }
 0x109   :  { %v770_v51 = vadd.f32 %v769_v47, %v706_v48  ;;  %v644_v55 = vadd.f32 %v643_v50, %v580_v52 }
 0x10b   :  { %v806_v53 = vmax.f32 %v770_v51, 0.0 }
 0x10d   :  { %v828_v54 = vpack.c.bf16 %v806_v53, %v806_v53 }
 0x10e   :  { %v707_v56 = vpop.f32.mrf.mxu2  ;;  %v582_v60 = vpop.f32.mrf.mxu0 }
 0x10f   :  { %v771_v57 = vpop.f32.mrf.mxu3  ;;  %v901_v58 = vld [vmem:[#allocation2 + $0x2c] sm:$0xf]  ;;  %851 = vst.msk [vmem:[#allocation2 + $0x30] sm:$0xf] %vm838_vm0, %v828_v54  ;;  %v708_v59 = vadd.f32 %v707_v56, %v644_v55  ;;  %v646_v61 = vpop.f32.mrf.mxu1  ;;  %v583_v62 = vadd.f32 %v1682_v0, %v582_v60 }
 0x110   :  { %902 = vst [vmem:[%s1864_s3 + $0x2c] sm:$0xf] %v901_v58 }
 0x111   :  { %v772_v63 = vadd.f32 %v771_v57, %v708_v59  ;;  %v647_v2 = vadd.f32 %v646_v61, %v583_v62 }
 0x113   :  { %v807_v1 = vmax.f32 %v772_v63, 0.0 }
 0x115   :  { %v829_v3 = vpack.c.bf16 %v807_v1, %v807_v1 }
 0x116   :  { %v903_v4 = vld [vmem:[#allocation2 + $0x30] sm:$0xf]  ;;  %v710_v5 = vpop.f32.mrf.mxu2  ;;  %v584_v8 = vpop.f32.mrf.mxu0 }
 0x117   :  { %v774_v6 = vpop.f32.mrf.mxu3  ;;  %904 = vst [vmem:[%s1864_s3 + $0x30] sm:$0xf] %v903_v4  ;;  %v711_v7 = vadd.f32 %v710_v5, %v647_v2  ;;  %v648_v9 = vpop.f32.mrf.mxu1  ;;  %v585_v11 = vadd.f32 %v1682_v0, %v584_v8 }
 0x118   :  { %852 = vst.msk [vmem:[#allocation2 + $0x34] sm:$0xf] %vm838_vm0, %v829_v3 }
 0x119   :  { %v775_v10 = vadd.f32 %v774_v6, %v711_v7  ;;  %v649_v14 = vadd.f32 %v648_v9, %v585_v11 }
 0x11b   :  { %v808_v12 = vmax.f32 %v775_v10, 0.0 }
 0x11d   :  { %v830_v13 = vpack.c.bf16 %v808_v12, %v808_v12 }
 0x11e   :  { %v712_v15 = vpop.f32.mrf.mxu2  ;;  %v587_v19 = vpop.f32.mrf.mxu0 }
 0x11f   :  { %v776_v16 = vpop.f32.mrf.mxu3  ;;  %v905_v17 = vld [vmem:[#allocation2 + $0x34] sm:$0xf]  ;;  %853 = vst.msk [vmem:[#allocation2 + $0x38] sm:$0xf] %vm838_vm0, %v830_v13  ;;  %v713_v18 = vadd.f32 %v712_v15, %v649_v14  ;;  %v651_v20 = vpop.f32.mrf.mxu1  ;;  %v588_v21 = vadd.f32 %v1682_v0, %v587_v19 }
 0x120   :  { %906 = vst [vmem:[%s1864_s3 + $0x34] sm:$0xf] %v905_v17 }
 0x121   :  { %v777_v22 = vadd.f32 %v776_v16, %v713_v18  ;;  %v652_v24 = vadd.f32 %v651_v20, %v588_v21 }
 0x123   :  { %v809_v23 = vmax.f32 %v777_v22, 0.0 }
 0x125   :  { %v831_v25 = vpack.c.bf16 %v809_v23, %v809_v23 }
 0x126   :  { %v907_v26 = vld [vmem:[#allocation2 + $0x38] sm:$0xf]  ;;  %v715_v27 = vpop.f32.mrf.mxu2  ;;  %v589_v30 = vpop.f32.mrf.mxu0 }
 0x127   :  { %v779_v28 = vpop.f32.mrf.mxu3  ;;  %908 = vst [vmem:[%s1864_s3 + $0x38] sm:$0xf] %v907_v26  ;;  %v716_v29 = vadd.f32 %v715_v27, %v652_v24  ;;  %v653_v31 = vpop.f32.mrf.mxu1  ;;  %v590_v33 = vadd.f32 %v1682_v0, %v589_v30 }
 0x128   :  { %854 = vst.msk [vmem:[#allocation2 + $0x3c] sm:$0xf] %vm838_vm0, %v831_v25 }
 0x129   :  { %v780_v32 = vadd.f32 %v779_v28, %v716_v29  ;;  %v654_v36 = vadd.f32 %v653_v31, %v590_v33 }
 0x12b   :  { %v810_v34 = vmax.f32 %v780_v32, 0.0 }
 0x12d   :  { %v832_v35 = vpack.c.bf16 %v810_v34, %v810_v34 }
 0x12e   :  { %v717_v37 = vpop.f32.mrf.mxu2  ;;  %v592_v41 = vpop.f32.mrf.mxu0 }
 0x12f   :  { %v781_v38 = vpop.f32.mrf.mxu3  ;;  %v909_v39 = vld [vmem:[#allocation2 + $0x3c] sm:$0xf]  ;;  %855 = vst.msk [vmem:[#allocation2 + $0x40] sm:$0xf] %vm838_vm0, %v832_v35  ;;  %v718_v40 = vadd.f32 %v717_v37, %v654_v36  ;;  %v656_v42 = vpop.f32.mrf.mxu1  ;;  %v593_v43 = vadd.f32 %v1682_v0, %v592_v41 }
 0x130   :  { %910 = vst [vmem:[%s1864_s3 + $0x3c] sm:$0xf] %v909_v39 }
 0x131   :  { %v782_v44 = vadd.f32 %v781_v38, %v718_v40  ;;  %v657_v46 = vadd.f32 %v656_v42, %v593_v43 }
 0x133   :  { %v811_v45 = vmax.f32 %v782_v44, 0.0 }
 0x135   :  { %v833_v47 = vpack.c.bf16 %v811_v45, %v811_v45 }
 0x136   :  { %v911_v48 = vld [vmem:[#allocation2 + $0x40] sm:$0xf]  ;;  %v720_v49 = vpop.f32.mrf.mxu2  ;;  %v594_v52 = vpop.f32.mrf.mxu0 }
 0x137   :  { %v784_v50 = vpop.f32.mrf.mxu3  ;;  %912 = vst [vmem:[%s1864_s3 + $0x40] sm:$0xf] %v911_v48  ;;  %v721_v51 = vadd.f32 %v720_v49, %v657_v46  ;;  %v658_v53 = vpop.f32.mrf.mxu1  ;;  %v595_v55 = vadd.f32 %v1682_v0, %v594_v52 }
 0x138   :  { %856 = vst.msk [vmem:[#allocation2 + $0x44] sm:$0xf] %vm838_vm0, %v833_v47 }
 0x139   :  { %v785_v54 = vadd.f32 %v784_v50, %v721_v51  ;;  %v659_v58 = vadd.f32 %v658_v53, %v595_v55 }
 0x13b   :  { %v812_v56 = vmax.f32 %v785_v54, 0.0 }
 0x13d   :  { %v834_v57 = vpack.c.bf16 %v812_v56, %v812_v56 }
 0x13e   :  { %v722_v59 = vpop.f32.mrf.mxu2  ;;  %v597_v63 = vpop.f32.mrf.mxu0 }
 0x13f   :  { %v786_v60 = vpop.f32.mrf.mxu3  ;;  %v913_v61 = vld [vmem:[#allocation2 + $0x44] sm:$0xf]  ;;  %857 = vst.msk [vmem:[#allocation2 + $0x48] sm:$0xf] %vm838_vm0, %v834_v57  ;;  %v723_v62 = vadd.f32 %v722_v59, %v659_v58  ;;  %v598_v1 = vadd.f32 %v1682_v0, %v597_v63  ;;  %v661_v3 = vpop.f32.mrf.mxu1 }
 0x140   :  { %914 = vst [vmem:[%s1864_s3 + $0x44] sm:$0xf] %v913_v61 }
 0x141   :  { %v787_v2 = vadd.f32 %v786_v60, %v723_v62  ;;  %v662_v5 = vadd.f32 %v661_v3, %v598_v1 }
 0x143   :  { %v813_v4 = vmax.f32 %v787_v2, 0.0 }
 0x145   :  { %v835_v6 = vpack.c.bf16 %v813_v4, %v813_v4 }
 0x146   :  { %v915_v7 = vld [vmem:[#allocation2 + $0x48] sm:$0xf]  ;;  %v725_v8 = vpop.f32.mrf.mxu2  ;;  %v599_v11 = vpop.f32.mrf.mxu0 }
 0x147   :  { %v789_v9 = vpop.f32.mrf.mxu3  ;;  %916 = vst [vmem:[%s1864_s3 + $0x48] sm:$0xf] %v915_v7  ;;  %v726_v10 = vadd.f32 %v725_v8, %v662_v5  ;;  %v663_v14 = vpop.f32.mrf.mxu1 }
 0x148   :  { %858 = vst.msk [vmem:[#allocation2 + $0x4c] sm:$0xf] %vm838_vm0, %v835_v6 }
 0x149   :  { %v790_v12 = vadd.f32 %v789_v9, %v726_v10 }
 0x14b   :  { %v814_v13 = vmax.f32 %v790_v12, 0.0 }
 0x14d   :  { %v836_v0 = vpack.c.bf16 %v814_v13, %v814_v13 }
 0x14e   :  { %v727_v15 = vpop.f32.mrf.mxu2 }
 0x14f   :  { %v917_v16 = vld [vmem:[#allocation2 + $0x4c] sm:$0xf]  ;;  %859 = vst.msk [vmem:[#allocation2 + $0x50] sm:$0xf] %vm838_vm0, %v836_v0  ;;  %v791_v17 = vpop.f32.mrf.mxu3 }
 0x150   :  { %918 = vst [vmem:[%s1864_s3 + $0x4c] sm:$0xf] %v917_v16 }
 0x156   :  { %v919_v18 = vld [vmem:[#allocation2 + $0x50] sm:$0xf] }
 0x157   :  { %920 = vst [vmem:[%s1864_s3 + $0x50] sm:$0xf] %v919_v18 }

// kernel: state_action_critic_forward.6
= control target key start
LH: loop header
LB: loop body
LE: loop exit
PB: predicated region body
PF: predicated region fallthrough
CT: control target
= control target key end

     0   :  { %vm524_vm0 = vcmask 523264   ;;  %vm794_vm1 = vcmask 519168   ;;  %s1735_s0 = inlined_call_operand.vmem [shape: bf16[98,576], index: 0, kind: input, shape index: {}]   ;;  %s1736_s1 = inlined_call_operand.vmem [shape: bf16[576,64], index: 1, kind: input, shape index: {}]   ;;  %s1737_s2 = inlined_call_operand.vmem [shape: f32[1,64], index: 2, kind: input, shape index: {}]   ;;  %s1738_s3 = inlined_call_operand.vmem [shape: bf16[98,64], index: 3, kind: output, shape index: {}]  }
   0x1   :  { %v1239_v0 = vld [vmem:[%s1736_s1 + $0x38] sm:$0xff]  ;;  %v1238_v1 = vld [vmem:[%s1736_s1 + $0x30] sm:$0xff]  ;;  %v1237_v2 = vld [vmem:[%s1736_s1 + $0x28] sm:$0xff] }
   0x2   :  { %1268 = vmatpush.bf16.msra.mxu1 %v1239_v0  ;;  %1269 = vmatpush.bf16.msra.mxu2 %v1239_v0  ;;  %v1236_v3 = vld [vmem:[%s1736_s1 + $0x20] sm:$0xff]  ;;  %v1235_v4 = vld [vmem:[%s1736_s1 + $0x18] sm:$0xff]  ;;  %v1234_v5 = vld [vmem:[%s1736_s1 + $0x10] sm:$0xff] }
   0x3   :  { %1270 = vmatpush.bf16.msra.mxu3 %v1239_v0  ;;  %546 = vmatpush.bf16.msra.mxu0 %v1239_v0  ;;  %v1233_v6 = vld [vmem:[%s1736_s1 + $0x8] sm:$0xff]  ;;  %v1232_v7 = vld [vmem:[%s1736_s1] sm:$0xff]  ;;  %v948_v8 = vld [vmem:[%s1735_s0 + $0x50] sm:$0xf] }
   0x4   :  { %v1209_v9 = vld [vmem:[%s1735_s0 + $0x60] sm:$0xf0]  ;;  %v988_v10 = vld [vmem:[%s1735_s0 + $0xa0] sm:$0xf]  ;;  %v1219_v11 = vld [vmem:[%s1735_s0 + $0xb0] sm:$0xf0] }
   0x5   :  { %v1263_v12 = vld [vmem:[%s1736_s1 + $0xf8] sm:$0xff]  ;;  %v908_v13 = vld [vmem:[%s1735_s0] sm:$0xf]  ;;  %v1199_v14 = vld [vmem:[%s1735_s0 + $0x10] sm:$0xf0]  ;;  %v949_v18 = vor.u32 %v1209_v9, %v948_v8  ;;  %v989_v19 = vor.u32 %v1219_v11, %v988_v10 }
   0x6   :  { %1271 = vmatpush.bf16.msra.mxu1 %v1238_v1  ;;  %1272 = vmatpush.bf16.msra.mxu2 %v1238_v1  ;;  %v1255_v15 = vld [vmem:[%s1736_s1 + $0xb8] sm:$0xff]  ;;  %v1028_v16 = vld [vmem:[%s1735_s0 + $0xf0] sm:$0xf]  ;;  %v1229_v17 = vld [vmem:[%s1735_s0 + $0x100] sm:$0xf0]  ;;  %v909_v21 = vor.u32 %v1199_v14, %v908_v13 }
   0x7   :  { %1273 = vmatpush.bf16.msra.mxu3 %v1238_v1  ;;  %547 = vmatpush.bf16.msra.mxu0 %v1238_v1  ;;  %v1247_v20 = vld [vmem:[%s1736_s1 + $0x78] sm:$0xff]  ;;  %v1029_v22 = vor.u32 %v1229_v17, %v1028_v16  ;;  %v1262_v24 = vld [vmem:[%s1736_s1 + $0xf0] sm:$0xff]  ;;  %v1261_v28 = vld [vmem:[%s1736_s1 + $0xe8] sm:$0xff] }
   0x8   :  { %v1267_v23 = vld [vmem:[%s1736_s1 + $0x118] sm:$0xff]  ;;  %v1254_v25 = vld [vmem:[%s1736_s1 + $0xb0] sm:$0xff]  ;;  %v1253_v29 = vld [vmem:[%s1736_s1 + $0xa8] sm:$0xff] }
   0x9   :  { %v1246_v26 = vld [vmem:[%s1736_s1 + $0x70] sm:$0xff]  ;;  %v1245_v30 = vld [vmem:[%s1736_s1 + $0x68] sm:$0xff]  ;;  %v1260_v32 = vld [vmem:[%s1736_s1 + $0xe0] sm:$0xff] }
   0xa   :  { %1274 = vmatpush.bf16.msra.mxu1 %v1237_v2  ;;  %1275 = vmatpush.bf16.msra.mxu2 %v1237_v2  ;;  %v1266_v27 = vld [vmem:[%s1736_s1 + $0x110] sm:$0xff]  ;;  %v1265_v31 = vld [vmem:[%s1736_s1 + $0x108] sm:$0xff]  ;;  %v1252_v33 = vld [vmem:[%s1736_s1 + $0xa0] sm:$0xff] }
   0xb   :  { %1276 = vmatpush.bf16.msra.mxu3 %v1237_v2  ;;  %548 = vmatpush.bf16.msra.mxu0 %v1237_v2  ;;  %v1244_v34 = vld [vmem:[%s1736_s1 + $0x60] sm:$0xff]  ;;  %v968_v35 = vld [vmem:[%s1735_s0 + $0x78] sm:$0xf]  ;;  %v1214_v36 = vld [vmem:[%s1735_s0 + $0x88] sm:$0xf0] }
   0xc   :  { %v1008_v37 = vld [vmem:[%s1735_s0 + $0xc8] sm:$0xf]  ;;  %v1224_v38 = vld [vmem:[%s1735_s0 + $0xd8] sm:$0xf0]  ;;  %v1264_v41 = vld [vmem:[%s1736_s1 + $0x100] sm:$0xff]  ;;  %v969_v44 = vor.u32 %v1214_v36, %v968_v35 }
   0xd   :  { %v928_v39 = vld [vmem:[%s1735_s0 + $0x28] sm:$0xf]  ;;  %v1204_v40 = vld [vmem:[%s1735_s0 + $0x38] sm:$0xf0]  ;;  %v1009_v45 = vor.u32 %v1224_v38, %v1008_v37  ;;  %v1258_v48 = vld [vmem:[%s1736_s1 + $0xd0] sm:$0xff] }
   0xe   :  { %1277 = vmatpush.bf16.msra.mxu1 %v1236_v3  ;;  %1278 = vmatpush.bf16.msra.mxu2 %v1236_v3  ;;  %v1259_v42 = vld [vmem:[%s1736_s1 + $0xd8] sm:$0xff]  ;;  %v929_v47 = vor.u32 %v1204_v40, %v928_v39  ;;  %v1250_v49 = vld [vmem:[%s1736_s1 + $0x90] sm:$0xff]  ;;  %v1257_v51 = vld [vmem:[%s1736_s1 + $0xc8] sm:$0xff] }
   0xf   :  { %1279 = vmatpush.bf16.msra.mxu3 %v1236_v3  ;;  %549 = vmatpush.bf16.msra.mxu0 %v1236_v3  ;;  %v1251_v43 = vld [vmem:[%s1736_s1 + $0x98] sm:$0xff]  ;;  %v1242_v50 = vld [vmem:[%s1736_s1 + $0x50] sm:$0xff]  ;;  %v1249_v52 = vld [vmem:[%s1736_s1 + $0x88] sm:$0xff] }
  0x10   :  { %v1243_v46 = vld [vmem:[%s1736_s1 + $0x58] sm:$0xff]  ;;  %v1241_v53 = vld [vmem:[%s1736_s1 + $0x48] sm:$0xff]  ;;  %v1256_v54 = vld [vmem:[%s1736_s1 + $0xc0] sm:$0xff] }
  0x11   :  { %v1248_v55 = vld [vmem:[%s1736_s1 + $0x80] sm:$0xff]  ;;  %v1198_v56 = vld [vmem:[%s1735_s0 + $0xc] sm:$0xf]  ;;  %v910_v60 = vld [vmem:[%s1735_s0 + $0x14] sm:$0xf0] }
  0x12   :  { %1280 = vmatpush.bf16.msra.mxu1 %v1235_v4  ;;  %1281 = vmatpush.bf16.msra.mxu2 %v1235_v4  ;;  %v918_v57 = vld [vmem:[%s1735_s0 + $0x1c] sm:$0xf0]  ;;  %v1197_v59 = vld [vmem:[%s1735_s0 + $0x4] sm:$0xf]  ;;  %v916_v61 = vld [vmem:[%s1735_s0 + $0x8] sm:$0xf] }
  0x13   :  { %1282 = vmatpush.bf16.msra.mxu3 %v1235_v4  ;;  %550 = vmatpush.bf16.msra.mxu0 %v1235_v4  ;;  %v1240_v58 = vld [vmem:[%s1736_s1 + $0x40] sm:$0xff]  ;;  %v1200_v62 = vld [vmem:[%s1735_s0 + $0x18] sm:$0xf0]  ;;  %v921_v63 = vor.u32 %v1198_v56, %v918_v57  ;;  %v924_v0 = vld [vmem:[%s1735_s0 + $0x10] sm:$0xf]  ;;  %v913_v2 = vor.u32 %v1197_v59, %v910_v60 }
  0x14   :  { %v1201_v1 = vld [vmem:[%s1735_s0 + $0x20] sm:$0xf0]  ;;  %v917_v3 = vor.u32 %v1200_v62, %v916_v61  ;;  %v930_v8 = vld [vmem:[%s1735_s0 + $0x3c] sm:$0xf0]  ;;  %v936_v9 = vld [vmem:[%s1735_s0 + $0x30] sm:$0xf] }
  0x15   :  { %v925_v4 = vor.u32 %v1201_v1, %v924_v0  ;;  %v1205_v10 = vld [vmem:[%s1735_s0 + $0x40] sm:$0xf0]  ;;  %v1206_v13 = vld [vmem:[%s1735_s0 + $0x48] sm:$0xf0]  ;;  %v1208_v17 = vld [vmem:[%s1735_s0 + $0x5c] sm:$0xf] }
  0x16   :  { %1283 = vmatpush.bf16.msra.mxu1 %v1234_v5  ;;  %1284 = vmatpush.bf16.msra.mxu2 %v1234_v5  ;;  %v984_v36 = vld [vmem:[%s1735_s0 + $0x88] sm:$0xf]  ;;  %v1216_v37 = vld [vmem:[%s1735_s0 + $0x98] sm:$0xf0]  ;;  %v1010_v56 = vld [vmem:[%s1735_s0 + $0xdc] sm:$0xf0] }
  0x17   :  { %1285 = vmatpush.bf16.msra.mxu3 %v1234_v5  ;;  %551 = vmatpush.bf16.msra.mxu0 %v1234_v5  ;;  %v1203_v5 = vld [vmem:[%s1735_s0 + $0x34] sm:$0xf]  ;;  %v985_v40 = vor.u32 %v1216_v37, %v984_v36  ;;  %v1016_v57 = vld [vmem:[%s1735_s0 + $0xd0] sm:$0xf]  ;;  %v1024_v60 = vld [vmem:[%s1735_s0 + $0xd8] sm:$0xf] }
  0x18   :  { %v1226_v61 = vld [vmem:[%s1735_s0 + $0xe8] sm:$0xf0]  ;;  %v1228_v1 = vld [vmem:[%s1735_s0 + $0xfc] sm:$0xf] }
  0x19   :  { %v1025_v0 = vor.u32 %v1226_v61, %v1024_v60 }
  0x1a   :  { %1286 = vmatpush.bf16.msra.mxu1 %v1233_v6  ;;  %1287 = vmatpush.bf16.msra.mxu2 %v1233_v6 }
  0x1b   :  { %1288 = vmatpush.bf16.msra.mxu3 %v1233_v6  ;;  %552 = vmatpush.bf16.msra.mxu0 %v1233_v6  ;;  %v938_v6 = vld [vmem:[%s1735_s0 + $0x44] sm:$0xf0] }
  0x1c   :  { %v941_v11 = vor.u32 %v1203_v5, %v938_v6  ;;  %v1036_v5 = vld [vmem:[%s1735_s0 + $0xf8] sm:$0xf]  ;;  %v1230_v6 = vld [vmem:[%s1735_s0 + $0x108] sm:$0xf0] }
  0x1e   :  { %1289 = vmatpush.bf16.msra.mxu1 %v1232_v7  ;;  %1290 = vmatpush.bf16.msra.mxu2 %v1232_v7 }
  0x1f   :  { %1291 = vmatpush.bf16.msra.mxu3 %v1232_v7  ;;  %553 = vmatpush.bf16.msra.mxu0 %v1232_v7  ;;  %v1202_v7 = vld [vmem:[%s1735_s0 + $0x2c] sm:$0xf] }
  0x20   :  { %v933_v14 = vor.u32 %v1202_v7, %v930_v8  ;;  %v1044_v8 = vld [vmem:[%s1735_s0 + $0x100] sm:$0xf] }
  0x21   :  { %564 = vmatmul.bf16.vlgmr.msra.gmra.mxu1 %v949_v18  ;;  %574 = vmatmul.bf16.vlgmr.msra.gmra.mxu2 %v989_v19  ;;  %v958_v18 = vld [vmem:[%s1735_s0 + $0x6c] sm:$0xf0]  ;;  %v1207_v19 = vld [vmem:[%s1735_s0 + $0x54] sm:$0xf] }
  0x22   :  { %634 = vmatpush.bf16.msrb.mxu2 %v1255_v15  ;;  %590 = vmatpush.bf16.msrb.mxu1 %v1247_v20  ;;  %v937_v15 = vor.u32 %v1205_v10, %v936_v9  ;;  %v950_v20 = vld [vmem:[%s1735_s0 + $0x64] sm:$0xf0]  ;;  %v1231_v9 = vld [vmem:[%s1735_s0 + $0x110] sm:$0xf0] }
  0x23   :  { %678 = vmatpush.bf16.msrb.mxu3 %v1263_v12  ;;  %554 = vmatmul.bf16.vlgmr.msra.gmra.mxu0 %v909_v21  ;;  %v944_v12 = vld [vmem:[%s1735_s0 + $0x38] sm:$0xf] }
  0x24   :  { %584 = vmatmul.bf16.vlgmr.msra.gmra.mxu3 %v1029_v22  ;;  %726 = vmatpush.bf16.msrb.mxu0 %v1267_v23  ;;  %v945_v16 = vor.u32 %v1206_v13, %v944_v12  ;;  %v956_v21 = vld [vmem:[%s1735_s0 + $0x58] sm:$0xf]  ;;  %v1210_v22 = vld [vmem:[%s1735_s0 + $0x68] sm:$0xf0]  ;;  %v961_v23 = vor.u32 %v1208_v17, %v958_v18  ;;  %v1045_v13 = vor.u32 %v1231_v9, %v1044_v8 }
  0x26   :  { %635 = vmatpush.bf16.msrb.mxu2 %v1254_v25  ;;  %591 = vmatpush.bf16.msrb.mxu1 %v1246_v26  ;;  %v1211_v25 = vld [vmem:[%s1735_s0 + $0x70] sm:$0xf0]  ;;  %v953_v26 = vor.u32 %v1207_v19, %v950_v20 }
  0x27   :  { %679 = vmatpush.bf16.msrb.mxu3 %v1262_v24  ;;  %v964_v24 = vld [vmem:[%s1735_s0 + $0x60] sm:$0xf] }
  0x28   :  { %727 = vmatpush.bf16.msrb.mxu0 %v1266_v27  ;;  %v957_v27 = vor.u32 %v1210_v22, %v956_v21 }
  0x2a   :  { %636 = vmatpush.bf16.msrb.mxu2 %v1253_v29  ;;  %592 = vmatpush.bf16.msrb.mxu1 %v1245_v30  ;;  %v1213_v29 = vld [vmem:[%s1735_s0 + $0x84] sm:$0xf]  ;;  %v978_v30 = vld [vmem:[%s1735_s0 + $0x94] sm:$0xf0] }
  0x2b   :  { %680 = vmatpush.bf16.msrb.mxu3 %v1261_v28  ;;  %v965_v28 = vor.u32 %v1211_v25, %v964_v24  ;;  %v981_v35 = vor.u32 %v1213_v29, %v978_v30 }
  0x2c   :  { %728 = vmatpush.bf16.msrb.mxu0 %v1265_v31  ;;  %v1212_v31 = vld [vmem:[%s1735_s0 + $0x7c] sm:$0xf] }
  0x2e   :  { %637 = vmatpush.bf16.msrb.mxu2 %v1252_v33  ;;  %593 = vmatpush.bf16.msrb.mxu1 %v1244_v34  ;;  %v976_v33 = vld [vmem:[%s1735_s0 + $0x80] sm:$0xf]  ;;  %v1215_v34 = vld [vmem:[%s1735_s0 + $0x90] sm:$0xf0] }
  0x2f   :  { %681 = vmatpush.bf16.msrb.mxu3 %v1260_v32  ;;  %v970_v32 = vld [vmem:[%s1735_s0 + $0x8c] sm:$0xf0]  ;;  %v977_v39 = vor.u32 %v1215_v34, %v976_v33 }
  0x30   :  { %729 = vmatpush.bf16.msrb.mxu0 %v1264_v41  ;;  %v973_v38 = vor.u32 %v1212_v31, %v970_v32  ;;  %v1218_v41 = vld [vmem:[%s1735_s0 + $0xac] sm:$0xf] }
  0x31   :  { %569 = vmatmul.bf16.gmra.mxu1 %v969_v44  ;;  %579 = vmatmul.bf16.gmra.mxu2 %v1009_v45  ;;  %v990_v44 = vld [vmem:[%s1735_s0 + $0xb4] sm:$0xf0]  ;;  %v996_v45 = vld [vmem:[%s1735_s0 + $0xa8] sm:$0xf] }
  0x32   :  { %638 = vmatpush.bf16.msrb.mxu2 %v1251_v43  ;;  %594 = vmatpush.bf16.msrb.mxu1 %v1243_v46  ;;  %v1217_v43 = vld [vmem:[%s1735_s0 + $0xa4] sm:$0xf]  ;;  %v1220_v46 = vld [vmem:[%s1735_s0 + $0xb8] sm:$0xf0] }
  0x33   :  { %682 = vmatpush.bf16.msrb.mxu3 %v1259_v42  ;;  %559 = vmatmul.bf16.gmra.mxu0 %v929_v47  ;;  %v998_v42 = vld [vmem:[%s1735_s0 + $0xbc] sm:$0xf0] }
  0x34   :  { %v1001_v47 = vor.u32 %v1218_v41, %v998_v42 }
  0x36   :  { %639 = vmatpush.bf16.msrb.mxu2 %v1250_v49  ;;  %595 = vmatpush.bf16.msrb.mxu1 %v1242_v50  ;;  %v1221_v49 = vld [vmem:[%s1735_s0 + $0xc0] sm:$0xf0]  ;;  %v993_v50 = vor.u32 %v1217_v43, %v990_v44 }
  0x37   :  { %683 = vmatpush.bf16.msrb.mxu3 %v1258_v48  ;;  %v1004_v48 = vld [vmem:[%s1735_s0 + $0xb0] sm:$0xf] }
  0x3a   :  { %640 = vmatpush.bf16.msrb.mxu2 %v1249_v52  ;;  %596 = vmatpush.bf16.msrb.mxu1 %v1241_v53  ;;  %v1005_v52 = vor.u32 %v1221_v49, %v1004_v48  ;;  %v1223_v53 = vld [vmem:[%s1735_s0 + $0xd4] sm:$0xf] }
  0x3b   :  { %684 = vmatpush.bf16.msrb.mxu3 %v1257_v51  ;;  %v997_v51 = vor.u32 %v1220_v46, %v996_v45 }
  0x3e   :  { %641 = vmatpush.bf16.msrb.mxu2 %v1248_v55  ;;  %597 = vmatpush.bf16.msrb.mxu1 %v1240_v58  ;;  %v1222_v55 = vld [vmem:[%s1735_s0 + $0xcc] sm:$0xf]  ;;  %v1225_v58 = vld [vmem:[%s1735_s0 + $0xe0] sm:$0xf0] }
  0x3f   :  { %685 = vmatpush.bf16.msrb.mxu3 %v1256_v54  ;;  %v1018_v54 = vld [vmem:[%s1735_s0 + $0xe4] sm:$0xf0]  ;;  %v1013_v62 = vor.u32 %v1222_v55, %v1010_v56 }
  0x40   :  { %v1021_v59 = vor.u32 %v1223_v53, %v1018_v54 }
  0x41   :  { %598 = vmatmul.bf16.vlgmr.msrb.gmra.mxu1 %v913_v2  ;;  %642 = vmatmul.bf16.vlgmr.msrb.gmra.mxu2 %v917_v3  ;;  %v1038_v2 = vld [vmem:[%s1735_s0 + $0x10c] sm:$0xf0]  ;;  %v1227_v3 = vld [vmem:[%s1735_s0 + $0xf4] sm:$0xf] }
  0x42   :  { %686 = vmatmul.bf16.vlgmr.msrb.gmra.mxu3 %v921_v63  ;;  %v1017_v63 = vor.u32 %v1225_v58, %v1016_v57  ;;  %v1041_v7 = vor.u32 %v1228_v1, %v1038_v2 }
  0x43   :  { %1190 = vmatmul.msk.bf16.vlgmr.msrb.gmra.mxu0 %vm524_vm0, %v925_v4  ;;  %v1030_v4 = vld [vmem:[%s1735_s0 + $0x104] sm:$0xf0] }
  0x44   :  { %v1033_v10 = vor.u32 %v1227_v3, %v1030_v4 }
  0x51   :  { %603 = vmatmul.bf16.gmra.mxu1 %v933_v14  ;;  %647 = vmatmul.bf16.gmra.mxu2 %v937_v15  ;;  %v1643_v15 = vld [vmem:[%s1737_s2] ss:$0 sm:$0xff] }
  0x52   :  { %691 = vmatmul.bf16.gmra.mxu3 %v941_v11  ;;  %v1037_v11 = vor.u32 %v1230_v6, %v1036_v5 }
  0x53   :  { %1191 = vmatmul.msk.bf16.gmra.mxu0 %vm524_vm0, %v945_v16 }
  0x61   :  { %608 = vmatmul.bf16.gmra.mxu1 %v953_v26  ;;  %652 = vmatmul.bf16.gmra.mxu2 %v957_v27 }
  0x62   :  { %696 = vmatmul.bf16.gmra.mxu3 %v961_v23 }
  0x63   :  { %1192 = vmatmul.msk.bf16.gmra.mxu0 %vm524_vm0, %v965_v28 }
  0x71   :  { %613 = vmatmul.bf16.gmra.mxu1 %v973_v38  ;;  %657 = vmatmul.bf16.gmra.mxu2 %v977_v39 }
  0x72   :  { %701 = vmatmul.bf16.gmra.mxu3 %v981_v35 }
  0x73   :  { %1193 = vmatmul.msk.bf16.gmra.mxu0 %vm524_vm0, %v985_v40 }
  0x81   :  { %618 = vmatmul.bf16.gmra.mxu1 %v993_v50  ;;  %662 = vmatmul.bf16.gmra.mxu2 %v997_v51 }
  0x82   :  { %706 = vmatmul.bf16.gmra.mxu3 %v1001_v47 }
  0x83   :  { %1194 = vmatmul.msk.bf16.gmra.mxu0 %vm524_vm0, %v1005_v52 }
  0x91   :  { %623 = vmatmul.bf16.gmra.mxu1 %v1013_v62  ;;  %667 = vmatmul.bf16.gmra.mxu2 %v1017_v63 }
  0x92   :  { %711 = vmatmul.bf16.gmra.mxu3 %v1021_v59 }
  0x93   :  { %1195 = vmatmul.msk.bf16.gmra.mxu0 %vm524_vm0, %v1025_v0 }
  0x9e   :  { %v1637_v12 = vpop.f32.mrf.mxu1 }
  0xa0   :  { %v555_v14 = vpop.f32.mrf.mxu0 }
  0xa1   :  { %628 = vmatmul.bf16.gmra.mxu1 %v1033_v10  ;;  %672 = vmatmul.bf16.gmra.mxu2 %v1037_v11  ;;  %v556_v35 = vadd.f32 %v1643_v15, %v555_v14 }
  0xa2   :  { %716 = vmatmul.bf16.gmra.mxu3 %v1041_v7 }
  0xa3   :  { %1196 = vmatmul.msk.bf16.gmra.mxu0 %vm524_vm0, %v1045_v13 }
  0xa4   :  { %v575_v16 = vpop.f32.mrf.mxu2 }
  0xa5   :  { %v1646_v17 = vadd.f32 %v1643_v15, %v575_v16  ;;  %v566_v16 = vadd.f32 %v1643_v15, %v1637_v12 }
  0xa6   :  { %v1648_v18 = vpop.f32.mrf.mxu1 }
  0xa7   :  { %v585_v19 = vpop.f32.mrf.mxu3  ;;  %v568_v12 = vadd.f32 %v1643_v15, %v1648_v18 }
  0xa8   :  { %v557_v20 = vpop.f32.mrf.mxu0  ;;  %v1651_v21 = vadd.f32 %v1643_v15, %v585_v19 }
  0xa9   :  { %v558_v43 = vadd.f32 %v1643_v15, %v557_v20 }
  0xac   :  { %v577_v22 = vpop.f32.mrf.mxu2 }
  0xad   :  { %v1654_v23 = vadd.f32 %v1643_v15, %v577_v22 }
  0xae   :  { %v1656_v24 = vpop.f32.mrf.mxu1 }
  0xaf   :  { %v587_v25 = vpop.f32.mrf.mxu3  ;;  %v571_v18 = vadd.f32 %v1643_v15, %v1656_v24 }
  0xb0   :  { %v560_v26 = vpop.f32.mrf.mxu0 }
  0xb1   :  { %v561_v54 = vadd.f32 %v1643_v15, %v560_v26 }
  0xb4   :  { %v580_v27 = vpop.f32.mrf.mxu2 }
  0xb5   :  { %v1659_v28 = vadd.f32 %v1643_v15, %v580_v27 }
  0xb6   :  { %v1661_v29 = vpop.f32.mrf.mxu1 }
  0xb7   :  { %v573_v24 = vadd.f32 %v1643_v15, %v1661_v29 }
  0xb8   :  { %v562_v30 = vpop.f32.mrf.mxu0 }
  0xb9   :  { %v563_v2 = vadd.f32 %v1643_v15, %v562_v30 }
  0xbc   :  { %v582_v31 = vpop.f32.mrf.mxu2 }
  0xbd   :  { %v1664_v32 = vadd.f32 %v1643_v15, %v582_v31 }
  0xbe   :  { %v599_v33 = vpop.f32.mrf.mxu1 }
  0xbf   :  { %v600_v37 = vadd.f32 %v599_v33, %v556_v35 }
  0xc0   :  { %v731_v34 = vpop.f32.mrf.mxu0 }
  0xc4   :  { %v643_v38 = vpop.f32.mrf.mxu2 }
  0xc5   :  { %v687_v36 = vpop.f32.mrf.mxu3  ;;  %v644_v39 = vadd.f32 %v643_v38, %v600_v37 }
  0xc6   :  { %v601_v40 = vpop.f32.mrf.mxu1 }
  0xc7   :  { %v688_v41 = vadd.f32 %v687_v36, %v644_v39  ;;  %v602_v47 = vadd.f32 %v601_v40, %v558_v43 }
  0xc8   :  { %v733_v42 = vpop.f32.mrf.mxu0 }
  0xc9   :  { %v732_v44 = vadd.f32 %v731_v34, %v688_v41 }
  0xcb   :  { %v766_v46 = vmax.f32 %v732_v44, 0.0 }
  0xcc   :  { %v645_v48 = vpop.f32.mrf.mxu2 }
  0xcd   :  { %v689_v45 = vpop.f32.mrf.mxu3  ;;  %v780_v49 = vpack.c.bf16 %v766_v46, %v766_v46  ;;  %v646_v50 = vadd.f32 %v645_v48, %v602_v47 }
  0xce   :  { %v604_v51 = vpop.f32.mrf.mxu1 }
  0xcf   :  { %795 = vst.msk [vmem:[#allocation2] sm:$0xf] %vm794_vm1, %v780_v49  ;;  %v690_v52 = vadd.f32 %v689_v45, %v646_v50  ;;  %v605_v58 = vadd.f32 %v604_v51, %v561_v54 }
  0xd0   :  { %v736_v53 = vpop.f32.mrf.mxu0 }
  0xd1   :  { %v734_v55 = vadd.f32 %v733_v42, %v690_v52 }
  0xd3   :  { %v767_v57 = vmax.f32 %v734_v55, 0.0 }
  0xd4   :  { %v648_v59 = vpop.f32.mrf.mxu2 }
  0xd5   :  { %v692_v56 = vpop.f32.mrf.mxu3  ;;  %v781_v60 = vpack.c.bf16 %v767_v57, %v767_v57  ;;  %v649_v61 = vadd.f32 %v648_v59, %v605_v58 }
  0xd6   :  { %v827_v62 = vld [vmem:[#allocation2] sm:$0xf]  ;;  %v606_v63 = vpop.f32.mrf.mxu1 }
  0xd7   :  { %828 = vst [vmem:[%s1738_s3] sm:$0xf] %v827_v62  ;;  %v693_v0 = vadd.f32 %v692_v56, %v649_v61  ;;  %v607_v6 = vadd.f32 %v606_v63, %v563_v2 }
  0xd8   :  { %v738_v1 = vpop.f32.mrf.mxu0  ;;  %796 = vst.msk [vmem:[#allocation2 + $0x4] sm:$0xf] %vm794_vm1, %v781_v60 }
  0xd9   :  { %v737_v3 = vadd.f32 %v736_v53, %v693_v0 }
  0xdb   :  { %v768_v5 = vmax.f32 %v737_v3, 0.0 }
  0xdc   :  { %v650_v7 = vpop.f32.mrf.mxu2 }
  0xdd   :  { %v694_v4 = vpop.f32.mrf.mxu3  ;;  %v782_v8 = vpack.c.bf16 %v768_v5, %v768_v5  ;;  %v651_v9 = vadd.f32 %v650_v7, %v607_v6 }
  0xde   :  { %v609_v10 = vpop.f32.mrf.mxu1 }
  0xdf   :  { %v829_v11 = vld [vmem:[#allocation2 + $0x4] sm:$0xf]  ;;  %797 = vst.msk [vmem:[#allocation2 + $0x8] sm:$0xf] %vm794_vm1, %v782_v8  ;;  %v695_v13 = vadd.f32 %v694_v4, %v651_v9  ;;  %v610_v25 = vadd.f32 %v609_v10, %v566_v16 }
  0xe0   :  { %v741_v14 = vpop.f32.mrf.mxu0  ;;  %830 = vst [vmem:[%s1738_s3 + $0x4] sm:$0xf] %v829_v11 }
  0xe1   :  { %v739_v19 = vadd.f32 %v738_v1, %v695_v13 }
  0xe3   :  { %v769_v22 = vmax.f32 %v739_v19, 0.0 }
  0xe4   :  { %v653_v26 = vpop.f32.mrf.mxu2 }
  0xe5   :  { %v697_v20 = vpop.f32.mrf.mxu3  ;;  %v783_v27 = vpack.c.bf16 %v769_v22, %v769_v22  ;;  %v654_v30 = vadd.f32 %v653_v26, %v610_v25 }
  0xe6   :  { %v831_v31 = vld [vmem:[#allocation2 + $0x8] sm:$0xf]  ;;  %v611_v33 = vpop.f32.mrf.mxu1 }
  0xe7   :  { %832 = vst [vmem:[%s1738_s3 + $0x8] sm:$0xf] %v831_v31  ;;  %v698_v34 = vadd.f32 %v697_v20, %v654_v30  ;;  %v612_v39 = vadd.f32 %v611_v33, %v568_v12 }
  0xe8   :  { %v743_v35 = vpop.f32.mrf.mxu0  ;;  %798 = vst.msk [vmem:[#allocation2 + $0xc] sm:$0xf] %vm794_vm1, %v783_v27 }
  0xe9   :  { %v742_v36 = vadd.f32 %v741_v14, %v698_v34 }
  0xeb   :  { %v770_v38 = vmax.f32 %v742_v36, 0.0 }
  0xec   :  { %v655_v40 = vpop.f32.mrf.mxu2 }
  0xed   :  { %v699_v37 = vpop.f32.mrf.mxu3  ;;  %v784_v41 = vpack.c.bf16 %v770_v38, %v770_v38  ;;  %v656_v42 = vadd.f32 %v655_v40, %v612_v39 }
  0xee   :  { %v614_v43 = vpop.f32.mrf.mxu1 }
  0xef   :  { %v833_v44 = vld [vmem:[#allocation2 + $0xc] sm:$0xf]  ;;  %799 = vst.msk [vmem:[#allocation2 + $0x10] sm:$0xf] %vm794_vm1, %v784_v41  ;;  %v700_v45 = vadd.f32 %v699_v37, %v656_v42  ;;  %v615_v50 = vadd.f32 %v614_v43, %v571_v18 }
  0xf0   :  { %v746_v46 = vpop.f32.mrf.mxu0  ;;  %834 = vst [vmem:[%s1738_s3 + $0xc] sm:$0xf] %v833_v44 }
  0xf1   :  { %v744_v47 = vadd.f32 %v743_v35, %v700_v45 }
  0xf3   :  { %v771_v49 = vmax.f32 %v744_v47, 0.0 }
  0xf4   :  { %v658_v51 = vpop.f32.mrf.mxu2 }
  0xf5   :  { %v702_v48 = vpop.f32.mrf.mxu3  ;;  %v785_v52 = vpack.c.bf16 %v771_v49, %v771_v49  ;;  %v659_v53 = vadd.f32 %v658_v51, %v615_v50 }
  0xf6   :  { %v835_v54 = vld [vmem:[#allocation2 + $0x10] sm:$0xf]  ;;  %v616_v55 = vpop.f32.mrf.mxu1 }
  0xf7   :  { %836 = vst [vmem:[%s1738_s3 + $0x10] sm:$0xf] %v835_v54  ;;  %v703_v56 = vadd.f32 %v702_v48, %v659_v53  ;;  %v617_v61 = vadd.f32 %v616_v55, %v573_v24 }
  0xf8   :  { %v748_v57 = vpop.f32.mrf.mxu0  ;;  %800 = vst.msk [vmem:[#allocation2 + $0x14] sm:$0xf] %vm794_vm1, %v785_v52 }
  0xf9   :  { %v747_v58 = vadd.f32 %v746_v46, %v703_v56 }
  0xfb   :  { %v772_v60 = vmax.f32 %v747_v58, 0.0 }
  0xfc   :  { %v660_v62 = vpop.f32.mrf.mxu2 }
  0xfd   :  { %v704_v59 = vpop.f32.mrf.mxu3  ;;  %v786_v63 = vpack.c.bf16 %v772_v60, %v772_v60  ;;  %v661_v0 = vadd.f32 %v660_v62, %v617_v61 }
  0xfe   :  { %v619_v1 = vpop.f32.mrf.mxu1 }
  0xff   :  { %v837_v2 = vld [vmem:[#allocation2 + $0x14] sm:$0xf]  ;;  %801 = vst.msk [vmem:[#allocation2 + $0x18] sm:$0xf] %vm794_vm1, %v786_v63  ;;  %v705_v3 = vadd.f32 %v704_v59, %v661_v0  ;;  %v620_v29 = vadd.f32 %v619_v1, %v1646_v17 }
 0x100   :  { %v751_v4 = vpop.f32.mrf.mxu0  ;;  %838 = vst [vmem:[%s1738_s3 + $0x14] sm:$0xf] %v837_v2 }
 0x101   :  { %v749_v5 = vadd.f32 %v748_v57, %v705_v3 }
 0x103   :  { %v773_v15 = vmax.f32 %v749_v5, 0.0 }
 0x104   :  { %v663_v7 = vpop.f32.mrf.mxu2 }
 0x105   :  { %v707_v6 = vpop.f32.mrf.mxu3  ;;  %v787_v8 = vpack.c.bf16 %v773_v15, %v773_v15  ;;  %v664_v9 = vadd.f32 %v663_v7, %v620_v29 }
 0x106   :  { %v839_v10 = vld [vmem:[#allocation2 + $0x18] sm:$0xf]  ;;  %v621_v11 = vpop.f32.mrf.mxu1 }
 0x107   :  { %840 = vst [vmem:[%s1738_s3 + $0x18] sm:$0xf] %v839_v10  ;;  %v708_v13 = vadd.f32 %v707_v6, %v664_v9  ;;  %v622_v22 = vadd.f32 %v621_v11, %v1654_v23 }
 0x108   :  { %802 = vst.msk [vmem:[#allocation2 + $0x1c] sm:$0xf] %vm794_vm1, %v787_v8  ;;  %v753_v14 = vpop.f32.mrf.mxu0 }
 0x109   :  { %v752_v16 = vadd.f32 %v751_v4, %v708_v13 }
 0x10b   :  { %v774_v20 = vmax.f32 %v752_v16, 0.0 }
 0x10c   :  { %v665_v25 = vpop.f32.mrf.mxu2 }
 0x10d   :  { %v709_v19 = vpop.f32.mrf.mxu3  ;;  %v788_v17 = vpack.c.bf16 %v774_v20, %v774_v20  ;;  %v666_v26 = vadd.f32 %v665_v25, %v622_v22 }
 0x10e   :  { %v624_v27 = vpop.f32.mrf.mxu1 }
 0x10f   :  { %v841_v30 = vld [vmem:[#allocation2 + $0x1c] sm:$0xf]  ;;  %803 = vst.msk [vmem:[#allocation2 + $0x20] sm:$0xf] %vm794_vm1, %v788_v17  ;;  %v710_v31 = vadd.f32 %v709_v19, %v666_v26  ;;  %v625_v36 = vadd.f32 %v624_v27, %v1659_v28 }
 0x110   :  { %842 = vst [vmem:[%s1738_s3 + $0x1c] sm:$0xf] %v841_v30  ;;  %v756_v34 = vpop.f32.mrf.mxu0 }
 0x111   :  { %v754_v33 = vadd.f32 %v753_v14, %v710_v31 }
 0x113   :  { %v775_v12 = vmax.f32 %v754_v33, 0.0 }
 0x114   :  { %v668_v37 = vpop.f32.mrf.mxu2 }
 0x115   :  { %v712_v35 = vpop.f32.mrf.mxu3  ;;  %v789_v23 = vpack.c.bf16 %v775_v12, %v775_v12  ;;  %v669_v38 = vadd.f32 %v668_v37, %v625_v36 }
 0x116   :  { %v843_v39 = vld [vmem:[#allocation2 + $0x20] sm:$0xf]  ;;  %v626_v40 = vpop.f32.mrf.mxu1 }
 0x117   :  { %844 = vst [vmem:[%s1738_s3 + $0x20] sm:$0xf] %v843_v39  ;;  %v713_v41 = vadd.f32 %v712_v35, %v669_v38  ;;  %v627_v45 = vadd.f32 %v626_v40, %v1664_v32 }
 0x118   :  { %804 = vst.msk [vmem:[#allocation2 + $0x24] sm:$0xf] %vm794_vm1, %v789_v23  ;;  %v758_v46 = vpop.f32.mrf.mxu0 }
 0x119   :  { %v757_v42 = vadd.f32 %v756_v34, %v713_v41 }
 0x11b   :  { %v776_v44 = vmax.f32 %v757_v42, 0.0 }
 0x11c   :  { %v670_v18 = vpop.f32.mrf.mxu2 }
 0x11d   :  { %v714_v43 = vpop.f32.mrf.mxu3  ;;  %v790_v28 = vpack.c.bf16 %v776_v44, %v776_v44  ;;  %v671_v47 = vadd.f32 %v670_v18, %v627_v45 }
 0x11e   :  { %v629_v48 = vpop.f32.mrf.mxu1 }
 0x11f   :  { %v845_v49 = vld [vmem:[#allocation2 + $0x24] sm:$0xf]  ;;  %805 = vst.msk [vmem:[#allocation2 + $0x28] sm:$0xf] %vm794_vm1, %v790_v28  ;;  %v715_v50 = vadd.f32 %v714_v43, %v671_v47  ;;  %v630_v53 = vadd.f32 %v629_v48, %v1651_v21 }
 0x120   :  { %846 = vst [vmem:[%s1738_s3 + $0x24] sm:$0xf] %v845_v49  ;;  %v761_v24 = vpop.f32.mrf.mxu0 }
 0x121   :  { %v759_v51 = vadd.f32 %v758_v46, %v715_v50 }
 0x123   :  { %v777_v52 = vmax.f32 %v759_v51, 0.0 }
 0x124   :  { %v673_v55 = vpop.f32.mrf.mxu2 }
 0x125   :  { %v717_v54 = vpop.f32.mrf.mxu3  ;;  %v791_v32 = vpack.c.bf16 %v777_v52, %v777_v52  ;;  %v674_v56 = vadd.f32 %v673_v55, %v630_v53 }
 0x126   :  { %v847_v57 = vld [vmem:[#allocation2 + $0x28] sm:$0xf]  ;;  %v631_v59 = vpop.f32.mrf.mxu1 }
 0x127   :  { %848 = vst [vmem:[%s1738_s3 + $0x28] sm:$0xf] %v847_v57  ;;  %v718_v58 = vadd.f32 %v717_v54, %v674_v56 }
 0x128   :  { %806 = vst.msk [vmem:[#allocation2 + $0x2c] sm:$0xf] %vm794_vm1, %v791_v32  ;;  %v763_v1 = vpop.f32.mrf.mxu0 }
 0x129   :  { %v762_v60 = vadd.f32 %v761_v24, %v718_v58 }
 0x12b   :  { %v778_v61 = vmax.f32 %v762_v60, 0.0 }
 0x12c   :  { %v675_v62 = vpop.f32.mrf.mxu2 }
 0x12d   :  { %v792_v63 = vpack.c.bf16 %v778_v61, %v778_v61  ;;  %v719_v0 = vpop.f32.mrf.mxu3 }
 0x12f   :  { %v849_v21 = vld [vmem:[#allocation2 + $0x2c] sm:$0xf]  ;;  %807 = vst.msk [vmem:[#allocation2 + $0x30] sm:$0xf] %vm794_vm1, %v792_v63 }
 0x130   :  { %850 = vst [vmem:[%s1738_s3 + $0x2c] sm:$0xf] %v849_v21 }
 0x136   :  { %v851_v2 = vld [vmem:[#allocation2 + $0x30] sm:$0xf] }
 0x137   :  { %852 = vst [vmem:[%s1738_s3 + $0x30] sm:$0xf] %v851_v2 }

// kernel: state_action_critic_forward.7
= control target key start
LH: loop header
LB: loop body
LE: loop exit
PB: predicated region body
PF: predicated region fallthrough
CT: control target
= control target key end

     0   :  { %vm1668_vm0 = vcmask 523264   ;;  %vm2128_vm1 = vcmask 1024   ;;  %s3896_s2 = inlined_call_operand.vmem [shape: bf16[3136,64], index: 2, kind: input, shape index: {}]   ;;  %s3897_s0 = inlined_call_operand.vmem [shape: bf16[2,3136], index: 0, kind: input, shape index: {}]   ;;  %s3898_s4 = inlined_call_operand.vmem [shape: f32[1,64], index: 4, kind: input, shape index: {}]   ;;  %s3899_s1 = inlined_call_operand.vmem [shape: f32[2,3], index: 1, kind: input, shape index: {}]   ;;  %s3900_s6 = inlined_call_operand.vmem [shape: f32[1,64], index: 6, kind: input, shape index: {}]   ;;  %s3901_s5 = inlined_call_operand.vmem [shape: bf16[64,64], index: 5, kind: input, shape index: {}]   ;;  %s3902_s7 = inlined_call_operand.vmem [shape: bf16[64,1], index: 7, kind: input, shape index: {}]   ;;  %s3903_s3 = inlined_call_operand.vmem [shape: f32[3,64], index: 3, kind: input, shape index: {}]   ;;  %s3904_s8 = inlined_call_operand.<no memory space> [shape: f32[1,1], index: 8, kind: input, shape index: {}]   ;;  %s3905_s9 = inlined_call_operand.vmem [shape: f32[2,1], index: 9, kind: output, shape index: {}]  }
   0x1   :  { %v2960_v0 = vld [vmem:[%s3896_s2 + $0x38] sm:$0xff]  ;;  %v2959_v4 = vld [vmem:[%s3896_s2 + $0x30] sm:$0xff]  ;;  %v2958_v8 = vld [vmem:[%s3896_s2 + $0x28] sm:$0xff] }
   0x2   :  { %v2976_v1 = vld [vmem:[%s3896_s2 + $0xb8] sm:$0xff]  ;;  %1671 = vmatpush.bf16.msra.mxu0 %v2960_v0  ;;  %v2975_v5 = vld [vmem:[%s3896_s2 + $0xb0] sm:$0xff]  ;;  %v2974_v9 = vld [vmem:[%s3896_s2 + $0xa8] sm:$0xff] }
   0x3   :  { %v2984_v2 = vld [vmem:[%s3896_s2 + $0xf8] sm:$0xff]  ;;  %1697 = vmatpush.bf16.msra.mxu2 %v2976_v1  ;;  %v2983_v6 = vld [vmem:[%s3896_s2 + $0xf0] sm:$0xff]  ;;  %v2982_v10 = vld [vmem:[%s3896_s2 + $0xe8] sm:$0xff] }
   0x4   :  { %v2968_v3 = vld [vmem:[%s3896_s2 + $0x78] sm:$0xff]  ;;  %1710 = vmatpush.bf16.msra.mxu3 %v2984_v2  ;;  %v2967_v7 = vld [vmem:[%s3896_s2 + $0x70] sm:$0xff]  ;;  %v2966_v11 = vld [vmem:[%s3896_s2 + $0x68] sm:$0xff] }
   0x5   :  { %1684 = vmatpush.bf16.msra.mxu1 %v2968_v3  ;;  %v2957_v12 = vld [vmem:[%s3896_s2 + $0x20] sm:$0xff]  ;;  %v2956_v16 = vld [vmem:[%s3896_s2 + $0x18] sm:$0xff]  ;;  %v2955_v21 = vld [vmem:[%s3896_s2 + $0x10] sm:$0xff] }
   0x6   :  { %1672 = vmatpush.bf16.msra.mxu0 %v2959_v4  ;;  %v2973_v13 = vld [vmem:[%s3896_s2 + $0xa0] sm:$0xff]  ;;  %v2972_v17 = vld [vmem:[%s3896_s2 + $0x98] sm:$0xff]  ;;  %v2971_v22 = vld [vmem:[%s3896_s2 + $0x90] sm:$0xff] }
   0x7   :  { %1698 = vmatpush.bf16.msra.mxu2 %v2975_v5  ;;  %v2981_v14 = vld [vmem:[%s3896_s2 + $0xe0] sm:$0xff]  ;;  %v2980_v18 = vld [vmem:[%s3896_s2 + $0xd8] sm:$0xff]  ;;  %v2979_v23 = vld [vmem:[%s3896_s2 + $0xd0] sm:$0xff] }
   0x8   :  { %1711 = vmatpush.bf16.msra.mxu3 %v2983_v6  ;;  %v2965_v15 = vld [vmem:[%s3896_s2 + $0x60] sm:$0xff]  ;;  %v2964_v19 = vld [vmem:[%s3896_s2 + $0x58] sm:$0xff]  ;;  %v2963_v24 = vld [vmem:[%s3896_s2 + $0x50] sm:$0xff] }
   0x9   :  { %1685 = vmatpush.bf16.msra.mxu1 %v2967_v7  ;;  %v35_v20 = vld [vmem:[%s3897_s0] sm:$0xff]  ;;  %v2954_v25 = vld [vmem:[%s3896_s2 + $0x8] sm:$0xff]  ;;  %v2992_v32 = vld [vmem:[%s3896_s2 + $0x138] sm:$0xff] }
   0xa   :  { %1673 = vmatpush.bf16.msra.mxu0 %v2958_v8  ;;  %436 = vst [vmem:[#allocation1] ss:$9 sm:$0xff] %v35_v20  ;;  %v2970_v26 = vld [vmem:[%s3896_s2 + $0x88] sm:$0xff]  ;;  %v2953_v29 = vld [vmem:[%s3896_s2] sm:$0xff]  ;;  %v3008_v33 = vld [vmem:[%s3896_s2 + $0x1b8] sm:$0xff] }
   0xb   :  { %1699 = vmatpush.bf16.msra.mxu2 %v2974_v9  ;;  %v2978_v27 = vld [vmem:[%s3896_s2 + $0xc8] sm:$0xff]  ;;  %v2969_v30 = vld [vmem:[%s3896_s2 + $0x80] sm:$0xff]  ;;  %v3016_v34 = vld [vmem:[%s3896_s2 + $0x1f8] sm:$0xff] }
   0xc   :  { %1712 = vmatpush.bf16.msra.mxu3 %v2982_v10  ;;  %v2962_v28 = vld [vmem:[%s3896_s2 + $0x48] sm:$0xff]  ;;  %v2977_v31 = vld [vmem:[%s3896_s2 + $0xc0] sm:$0xff]  ;;  %v3000_v36 = vld [vmem:[%s3896_s2 + $0x178] sm:$0xff] }
   0xd   :  { %1686 = vmatpush.bf16.msra.mxu1 %v2966_v11  ;;  %v2961_v35 = vld [vmem:[%s3896_s2 + $0x40] sm:$0xff]  ;;  %v2991_v38 = vld [vmem:[%s3896_s2 + $0x130] sm:$0xff]  ;;  %v2990_v45 = vld [vmem:[%s3896_s2 + $0x128] sm:$0xff] }
   0xe   :  { %1674 = vmatpush.bf16.msra.mxu0 %v2957_v12  ;;  %v3007_v40 = vld [vmem:[%s3896_s2 + $0x1b0] sm:$0xff]  ;;  %v3006_v46 = vld [vmem:[%s3896_s2 + $0x1a8] sm:$0xff]  ;;  %v2989_v54 = vld [vmem:[%s3896_s2 + $0x120] sm:$0xff] }
   0xf   :  { %1700 = vmatpush.bf16.msra.mxu2 %v2973_v13  ;;  %v3015_v41 = vld [vmem:[%s3896_s2 + $0x1f0] sm:$0xff]  ;;  %v3014_v47 = vld [vmem:[%s3896_s2 + $0x1e8] sm:$0xff]  ;;  %v3005_v55 = vld [vmem:[%s3896_s2 + $0x1a0] sm:$0xff] }
  0x10   :  { %1713 = vmatpush.bf16.msra.mxu3 %v2981_v14  ;;  %v2999_v43 = vld [vmem:[%s3896_s2 + $0x170] sm:$0xff]  ;;  %v36_v48 = vld [vmem:[%s3897_s0 + $0x8] sm:$0xff]  ;;  %v3013_v56 = vld [vmem:[%s3896_s2 + $0x1e0] sm:$0xff] }
  0x11   :  { %1687 = vmatpush.bf16.msra.mxu1 %v2965_v15  ;;  %v439_v37 = vld [vmem:[#allocation1 + $0x12] sm:$0xff]  ;;  %v437_v39 = vld [vmem:[#allocation1] sm:$0xff]  ;;  %v438_v44 = vld [vmem:[#allocation1 + $0x9] sm:$0xff] }
  0x12   :  { %1675 = vmatpush.bf16.msra.mxu0 %v2956_v16  ;;  %v440_v42 = vld [vmem:[#allocation1 + $0x1b] sm:$0xff]  ;;  %v2998_v49 = vld [vmem:[%s3896_s2 + $0x168] sm:$0xff]  ;;  %v2987_v62 = vld [vmem:[%s3896_s2 + $0x110] sm:$0xff] }
  0x13   :  { %1701 = vmatpush.bf16.msra.mxu2 %v2972_v17  ;;  %v443_v50 = vld [vmem:[#allocation1 + $0x36] sm:$0xff]  ;;  %v441_v51 = vld [vmem:[#allocation1 + $0x24] sm:$0xff]  ;;  %v3362_v53 = vld [vmem:[#allocation1 + $0x2d] sm:$0xff] }
  0x14   :  { %1714 = vmatpush.bf16.msra.mxu3 %v2980_v18  ;;  %v444_v52 = vld [vmem:[#allocation1 + $0x3f] sm:$0xff]  ;;  %v3003_v63 = vld [vmem:[%s3896_s2 + $0x190] sm:$0xff]  ;;  %v2986_v2 = vld [vmem:[%s3896_s2 + $0x108] sm:$0xff] }
  0x15   :  { %1688 = vmatpush.bf16.msra.mxu1 %v2964_v19  ;;  %446 = vst [vmem:[#allocation1] ss:$9 sm:$0xff] %v36_v48  ;;  %v2997_v57 = vld [vmem:[%s3896_s2 + $0x160] sm:$0xff]  ;;  %v2988_v58 = vld [vmem:[%s3896_s2 + $0x118] sm:$0xff]  ;;  %v3011_v0 = vld [vmem:[%s3896_s2 + $0x1d0] sm:$0xff] }
  0x16   :  { %1676 = vmatpush.bf16.msra.mxu0 %v2955_v21  ;;  %v3004_v59 = vld [vmem:[%s3896_s2 + $0x198] sm:$0xff]  ;;  %v2995_v1 = vld [vmem:[%s3896_s2 + $0x150] sm:$0xff]  ;;  %v3002_v3 = vld [vmem:[%s3896_s2 + $0x188] sm:$0xff] }
  0x17   :  { %1702 = vmatpush.bf16.msra.mxu2 %v2971_v22  ;;  %v3012_v60 = vld [vmem:[%s3896_s2 + $0x1d8] sm:$0xff]  ;;  %v3010_v4 = vld [vmem:[%s3896_s2 + $0x1c8] sm:$0xff]  ;;  %v2985_v6 = vld [vmem:[%s3896_s2 + $0x100] sm:$0xff] }
  0x18   :  { %1715 = vmatpush.bf16.msra.mxu3 %v2979_v23  ;;  %v2996_v61 = vld [vmem:[%s3896_s2 + $0x158] sm:$0xff]  ;;  %v2994_v5 = vld [vmem:[%s3896_s2 + $0x148] sm:$0xff]  ;;  %v3001_v7 = vld [vmem:[%s3896_s2 + $0x180] sm:$0xff] }
  0x19   :  { %1689 = vmatpush.bf16.msra.mxu1 %v2963_v24  ;;  %v3009_v8 = vld [vmem:[%s3896_s2 + $0x1c0] sm:$0xff]  ;;  %v3024_v9 = vld [vmem:[%s3896_s2 + $0x238] sm:$0xff]  ;;  %v3023_v14 = vld [vmem:[%s3896_s2 + $0x230] sm:$0xff] }
  0x1a   :  { %1677 = vmatpush.bf16.msra.mxu0 %v2954_v25  ;;  %v3040_v10 = vld [vmem:[%s3896_s2 + $0x2b8] sm:$0xff]  ;;  %v2993_v12 = vld [vmem:[%s3896_s2 + $0x140] sm:$0xff]  ;;  %v3039_v15 = vld [vmem:[%s3896_s2 + $0x2b0] sm:$0xff] }
  0x1b   :  { %1703 = vmatpush.bf16.msra.mxu2 %v2970_v26  ;;  %v3048_v11 = vld [vmem:[%s3896_s2 + $0x2f8] sm:$0xff]  ;;  %v3047_v16 = vld [vmem:[%s3896_s2 + $0x2f0] sm:$0xff]  ;;  %v3022_v18 = vld [vmem:[%s3896_s2 + $0x228] sm:$0xff] }
  0x1c   :  { %1716 = vmatpush.bf16.msra.mxu3 %v2978_v27  ;;  %v3032_v13 = vld [vmem:[%s3896_s2 + $0x278] sm:$0xff]  ;;  %v3031_v17 = vld [vmem:[%s3896_s2 + $0x270] sm:$0xff]  ;;  %v3038_v19 = vld [vmem:[%s3896_s2 + $0x2a8] sm:$0xff] }
  0x1d   :  { %1690 = vmatpush.bf16.msra.mxu1 %v2962_v28  ;;  %v3046_v20 = vld [vmem:[%s3896_s2 + $0x2e8] sm:$0xff]  ;;  %v3021_v22 = vld [vmem:[%s3896_s2 + $0x220] sm:$0xff]  ;;  %v3020_v26 = vld [vmem:[%s3896_s2 + $0x218] sm:$0xff] }
  0x1e   :  { %1678 = vmatpush.bf16.msra.mxu0 %v2953_v29  ;;  %v3030_v21 = vld [vmem:[%s3896_s2 + $0x268] sm:$0xff]  ;;  %v3037_v23 = vld [vmem:[%s3896_s2 + $0x2a0] sm:$0xff]  ;;  %v3036_v27 = vld [vmem:[%s3896_s2 + $0x298] sm:$0xff] }
  0x1f   :  { %1704 = vmatpush.bf16.msra.mxu2 %v2969_v30  ;;  %v3045_v24 = vld [vmem:[%s3896_s2 + $0x2e0] sm:$0xff]  ;;  %v3044_v28 = vld [vmem:[%s3896_s2 + $0x2d8] sm:$0xff]  ;;  %v3019_v30 = vld [vmem:[%s3896_s2 + $0x210] sm:$0xff] }
  0x20   :  { %1717 = vmatpush.bf16.msra.mxu3 %v2977_v31  ;;  %v3029_v25 = vld [vmem:[%s3896_s2 + $0x260] sm:$0xff]  ;;  %v3028_v29 = vld [vmem:[%s3896_s2 + $0x258] sm:$0xff]  ;;  %v3035_v31 = vld [vmem:[%s3896_s2 + $0x290] sm:$0xff] }
  0x21   :  { %1691 = vmatpush.bf16.msra.mxu1 %v2961_v35  ;;  %1679 = vmatmul.bf16.vlgmr.msra.gmra.mxu0 %v437_v39  ;;  %v3034_v35 = vld [vmem:[%s3896_s2 + $0x288] sm:$0xff]  ;;  %v3033_v39 = vld [vmem:[%s3896_s2 + $0x280] sm:$0xff]  ;;  %v3064_v48 = vld [vmem:[%s3896_s2 + $0x378] sm:$0xff] }
  0x22   :  { %1723 = vmatpush.bf16.msrb.mxu0 %v2992_v32  ;;  %1705 = vmatmul.bf16.vlgmr.msra.gmra.mxu2 %v439_v37  ;;  %v3043_v32 = vld [vmem:[%s3896_s2 + $0x2d0] sm:$0xff]  ;;  %v3026_v37 = vld [vmem:[%s3896_s2 + $0x248] sm:$0xff] }
  0x23   :  { %1749 = vmatpush.bf16.msrb.mxu2 %v3008_v33  ;;  %1718 = vmatmul.bf16.vlgmr.msra.gmra.mxu3 %v440_v42  ;;  %v3027_v33 = vld [vmem:[%s3896_s2 + $0x250] sm:$0xff]  ;;  %v3072_v42 = vld [vmem:[%s3896_s2 + $0x3b8] sm:$0xff] }
  0x24   :  { %1762 = vmatpush.bf16.msrb.mxu3 %v3016_v34  ;;  %1692 = vmatmul.bf16.vlgmr.msra.gmra.mxu1 %v438_v44  ;;  %v3018_v34 = vld [vmem:[%s3896_s2 + $0x208] sm:$0xff]  ;;  %v37_v44 = vld [vmem:[%s3897_s0 + $0x10] sm:$0xff] }
  0x25   :  { %1736 = vmatpush.bf16.msrb.mxu1 %v3000_v36  ;;  %v3042_v36 = vld [vmem:[%s3896_s2 + $0x2c8] sm:$0xff] }
  0x26   :  { %1724 = vmatpush.bf16.msrb.mxu0 %v2991_v38  ;;  %v3017_v38 = vld [vmem:[%s3896_s2 + $0x200] sm:$0xff] }
  0x27   :  { %1750 = vmatpush.bf16.msrb.mxu2 %v3007_v40  ;;  %v3041_v40 = vld [vmem:[%s3896_s2 + $0x2c0] sm:$0xff] }
  0x28   :  { %1763 = vmatpush.bf16.msrb.mxu3 %v3015_v41  ;;  %v3056_v41 = vld [vmem:[%s3896_s2 + $0x338] sm:$0xff] }
  0x29   :  { %1737 = vmatpush.bf16.msrb.mxu1 %v2999_v43  ;;  %v3080_v43 = vld [vmem:[%s3896_s2 + $0x3f8] sm:$0xff] }
  0x2a   :  { %1725 = vmatpush.bf16.msrb.mxu0 %v2990_v45  ;;  %v3025_v45 = vld [vmem:[%s3896_s2 + $0x240] sm:$0xff] }
  0x2b   :  { %1751 = vmatpush.bf16.msrb.mxu2 %v3006_v46  ;;  %v447_v46 = vld [vmem:[#allocation1] sm:$0xff] }
  0x2c   :  { %1764 = vmatpush.bf16.msrb.mxu3 %v3014_v47  ;;  %v449_v47 = vld [vmem:[#allocation1 + $0x12] sm:$0xff] }
  0x2d   :  { %1738 = vmatpush.bf16.msrb.mxu1 %v2998_v49  ;;  %v448_v49 = vld [vmem:[#allocation1 + $0x9] sm:$0xff] }
  0x2e   :  { %1726 = vmatpush.bf16.msrb.mxu0 %v2989_v54  ;;  %v3545_v54 = vld [vmem:[#allocation1 + $0x24] sm:$0xff] }
  0x2f   :  { %1752 = vmatpush.bf16.msrb.mxu2 %v3005_v55  ;;  %v3547_v55 = vld [vmem:[#allocation1 + $0x36] sm:$0xff] }
  0x30   :  { %1765 = vmatpush.bf16.msrb.mxu3 %v3013_v56  ;;  %v3549_v56 = vld [vmem:[#allocation1 + $0x2d] sm:$0xff] }
  0x31   :  { %1739 = vmatpush.bf16.msrb.mxu1 %v2997_v57  ;;  %v3551_v57 = vld [vmem:[#allocation1 + $0x3f] sm:$0xff] }
  0x32   :  { %1727 = vmatpush.bf16.msrb.mxu0 %v2988_v58  ;;  %v3063_v58 = vld [vmem:[%s3896_s2 + $0x370] sm:$0xff] }
  0x33   :  { %1753 = vmatpush.bf16.msrb.mxu2 %v3004_v59  ;;  %v3054_v59 = vld [vmem:[%s3896_s2 + $0x328] sm:$0xff] }
  0x34   :  { %1766 = vmatpush.bf16.msrb.mxu3 %v3012_v60  ;;  %v3070_v60 = vld [vmem:[%s3896_s2 + $0x3a8] sm:$0xff] }
  0x35   :  { %1740 = vmatpush.bf16.msrb.mxu1 %v2996_v61  ;;  %v3078_v61 = vld [vmem:[%s3896_s2 + $0x3e8] sm:$0xff] }
  0x36   :  { %1728 = vmatpush.bf16.msrb.mxu0 %v2987_v62  ;;  %v3062_v62 = vld [vmem:[%s3896_s2 + $0x368] sm:$0xff] }
  0x37   :  { %1754 = vmatpush.bf16.msrb.mxu2 %v3003_v63  ;;  %v3053_v63 = vld [vmem:[%s3896_s2 + $0x320] sm:$0xff] }
  0x38   :  { %1767 = vmatpush.bf16.msrb.mxu3 %v3011_v0  ;;  %v3069_v0 = vld [vmem:[%s3896_s2 + $0x3a0] sm:$0xff] }
  0x39   :  { %1741 = vmatpush.bf16.msrb.mxu1 %v2995_v1  ;;  %v3077_v1 = vld [vmem:[%s3896_s2 + $0x3e0] sm:$0xff] }
  0x3a   :  { %1729 = vmatpush.bf16.msrb.mxu0 %v2986_v2  ;;  %v3061_v2 = vld [vmem:[%s3896_s2 + $0x360] sm:$0xff] }
  0x3b   :  { %1755 = vmatpush.bf16.msrb.mxu2 %v3002_v3  ;;  %v3052_v3 = vld [vmem:[%s3896_s2 + $0x318] sm:$0xff] }
  0x3c   :  { %1768 = vmatpush.bf16.msrb.mxu3 %v3010_v4  ;;  %v3068_v4 = vld [vmem:[%s3896_s2 + $0x398] sm:$0xff] }
  0x3d   :  { %1742 = vmatpush.bf16.msrb.mxu1 %v2994_v5  ;;  %v3076_v5 = vld [vmem:[%s3896_s2 + $0x3d8] sm:$0xff] }
  0x3e   :  { %1730 = vmatpush.bf16.msrb.mxu0 %v2985_v6  ;;  %v3060_v6 = vld [vmem:[%s3896_s2 + $0x358] sm:$0xff] }
  0x3f   :  { %1756 = vmatpush.bf16.msrb.mxu2 %v3001_v7  ;;  %v3051_v7 = vld [vmem:[%s3896_s2 + $0x310] sm:$0xff] }
  0x40   :  { %1769 = vmatpush.bf16.msrb.mxu3 %v3009_v8  ;;  %v3067_v8 = vld [vmem:[%s3896_s2 + $0x390] sm:$0xff] }
  0x41   :  { %1743 = vmatpush.bf16.msrb.mxu1 %v2993_v12  ;;  %1731 = vmatmul.bf16.vlgmr.msrb.gmra.mxu0 %v441_v51  ;;  %v3071_v51 = vld [vmem:[%s3896_s2 + $0x3b0] sm:$0xff]  ;;  %v3066_v12 = vld [vmem:[%s3896_s2 + $0x388] sm:$0xff] }
  0x42   :  { %1775 = vmatpush.bf16.msra.mxu0 %v3024_v9  ;;  %1757 = vmatmul.bf16.vlgmr.msrb.gmra.mxu2 %v443_v50  ;;  %v3055_v50 = vld [vmem:[%s3896_s2 + $0x330] sm:$0xff] }
  0x43   :  { %1801 = vmatpush.bf16.msra.mxu2 %v3040_v10  ;;  %1770 = vmatmul.bf16.vlgmr.msrb.gmra.mxu3 %v444_v52  ;;  %v450_v52 = vld [vmem:[#allocation1 + $0x1b] sm:$0xff]  ;;  %v3075_v9 = vld [vmem:[%s3896_s2 + $0x3d0] sm:$0xff] }
  0x44   :  { %1814 = vmatpush.bf16.msra.mxu3 %v3048_v11  ;;  %1744 = vmatmul.bf16.vlgmr.msrb.gmra.mxu1 %v3362_v53  ;;  %v3079_v53 = vld [vmem:[%s3896_s2 + $0x3f0] sm:$0xff]  ;;  %456 = vst [vmem:[#allocation1] ss:$9 sm:$0xff] %v37_v44  ;;  %v3050_v11 = vld [vmem:[%s3896_s2 + $0x308] sm:$0xff] }
  0x45   :  { %1788 = vmatpush.bf16.msra.mxu1 %v3032_v13  ;;  %v3059_v10 = vld [vmem:[%s3896_s2 + $0x350] sm:$0xff]  ;;  %v3074_v13 = vld [vmem:[%s3896_s2 + $0x3c8] sm:$0xff] }
  0x46   :  { %1776 = vmatpush.bf16.msra.mxu0 %v3023_v14  ;;  %v3058_v14 = vld [vmem:[%s3896_s2 + $0x348] sm:$0xff] }
  0x47   :  { %1802 = vmatpush.bf16.msra.mxu2 %v3039_v15  ;;  %v3049_v15 = vld [vmem:[%s3896_s2 + $0x300] sm:$0xff]  ;;  %v3098_v44 = vld [vmem:[%s3896_s2 + $0x488] sm:$0xff] }
  0x48   :  { %1815 = vmatpush.bf16.msra.mxu3 %v3047_v16  ;;  %v3065_v16 = vld [vmem:[%s3896_s2 + $0x380] sm:$0xff] }
  0x49   :  { %1789 = vmatpush.bf16.msra.mxu1 %v3031_v17  ;;  %v3088_v17 = vld [vmem:[%s3896_s2 + $0x438] sm:$0xff] }
  0x4a   :  { %1777 = vmatpush.bf16.msra.mxu0 %v3022_v18  ;;  %v3073_v18 = vld [vmem:[%s3896_s2 + $0x3c0] sm:$0xff] }
  0x4b   :  { %1803 = vmatpush.bf16.msra.mxu2 %v3038_v19  ;;  %v3104_v19 = vld [vmem:[%s3896_s2 + $0x4b8] sm:$0xff] }
  0x4c   :  { %1816 = vmatpush.bf16.msra.mxu3 %v3046_v20  ;;  %v3112_v20 = vld [vmem:[%s3896_s2 + $0x4f8] sm:$0xff] }
  0x4d   :  { %1790 = vmatpush.bf16.msra.mxu1 %v3030_v21  ;;  %v3057_v21 = vld [vmem:[%s3896_s2 + $0x340] sm:$0xff] }
  0x4e   :  { %1778 = vmatpush.bf16.msra.mxu0 %v3021_v22  ;;  %v3096_v22 = vld [vmem:[%s3896_s2 + $0x478] sm:$0xff] }
  0x4f   :  { %1804 = vmatpush.bf16.msra.mxu2 %v3037_v23  ;;  %v3087_v23 = vld [vmem:[%s3896_s2 + $0x430] sm:$0xff] }
  0x50   :  { %1817 = vmatpush.bf16.msra.mxu3 %v3045_v24  ;;  %v3103_v24 = vld [vmem:[%s3896_s2 + $0x4b0] sm:$0xff] }
  0x51   :  { %1791 = vmatpush.bf16.msra.mxu1 %v3029_v25  ;;  %v3111_v25 = vld [vmem:[%s3896_s2 + $0x4f0] sm:$0xff] }
  0x52   :  { %1779 = vmatpush.bf16.msra.mxu0 %v3020_v26  ;;  %v3095_v26 = vld [vmem:[%s3896_s2 + $0x470] sm:$0xff] }
  0x53   :  { %1805 = vmatpush.bf16.msra.mxu2 %v3036_v27  ;;  %v3086_v27 = vld [vmem:[%s3896_s2 + $0x428] sm:$0xff] }
  0x54   :  { %1818 = vmatpush.bf16.msra.mxu3 %v3044_v28  ;;  %v3102_v28 = vld [vmem:[%s3896_s2 + $0x4a8] sm:$0xff] }
  0x55   :  { %1792 = vmatpush.bf16.msra.mxu1 %v3028_v29  ;;  %v3110_v29 = vld [vmem:[%s3896_s2 + $0x4e8] sm:$0xff] }
  0x56   :  { %1780 = vmatpush.bf16.msra.mxu0 %v3019_v30  ;;  %v3094_v30 = vld [vmem:[%s3896_s2 + $0x468] sm:$0xff] }
  0x57   :  { %1806 = vmatpush.bf16.msra.mxu2 %v3035_v31  ;;  %v3085_v31 = vld [vmem:[%s3896_s2 + $0x420] sm:$0xff] }
  0x58   :  { %1819 = vmatpush.bf16.msra.mxu3 %v3043_v32  ;;  %v3101_v32 = vld [vmem:[%s3896_s2 + $0x4a0] sm:$0xff] }
  0x59   :  { %1793 = vmatpush.bf16.msra.mxu1 %v3027_v33  ;;  %v3109_v33 = vld [vmem:[%s3896_s2 + $0x4e0] sm:$0xff] }
  0x5a   :  { %1781 = vmatpush.bf16.msra.mxu0 %v3018_v34  ;;  %v3093_v34 = vld [vmem:[%s3896_s2 + $0x460] sm:$0xff] }
  0x5b   :  { %1807 = vmatpush.bf16.msra.mxu2 %v3034_v35  ;;  %v3084_v35 = vld [vmem:[%s3896_s2 + $0x418] sm:$0xff] }
  0x5c   :  { %1820 = vmatpush.bf16.msra.mxu3 %v3042_v36  ;;  %v3100_v36 = vld [vmem:[%s3896_s2 + $0x498] sm:$0xff] }
  0x5d   :  { %1794 = vmatpush.bf16.msra.mxu1 %v3026_v37  ;;  %v3108_v37 = vld [vmem:[%s3896_s2 + $0x4d8] sm:$0xff] }
  0x5e   :  { %1782 = vmatpush.bf16.msra.mxu0 %v3017_v38  ;;  %v3092_v38 = vld [vmem:[%s3896_s2 + $0x458] sm:$0xff] }
  0x5f   :  { %1808 = vmatpush.bf16.msra.mxu2 %v3033_v39  ;;  %v3083_v39 = vld [vmem:[%s3896_s2 + $0x410] sm:$0xff] }
  0x60   :  { %1821 = vmatpush.bf16.msra.mxu3 %v3041_v40  ;;  %v3099_v40 = vld [vmem:[%s3896_s2 + $0x490] sm:$0xff] }
  0x61   :  { %1795 = vmatpush.bf16.msra.mxu1 %v3025_v45  ;;  %1783 = vmatmul.bf16.vlgmr.msra.gmra.mxu0 %v447_v46  ;;  %v3106_v45 = vld [vmem:[%s3896_s2 + $0x4c8] sm:$0xff] }
  0x62   :  { %1827 = vmatpush.bf16.msrb.mxu0 %v3056_v41  ;;  %1809 = vmatmul.bf16.vlgmr.msra.gmra.mxu2 %v449_v47  ;;  %v3107_v41 = vld [vmem:[%s3896_s2 + $0x4d0] sm:$0xff]  ;;  %v3090_v46 = vld [vmem:[%s3896_s2 + $0x448] sm:$0xff]  ;;  %v3081_v47 = vld [vmem:[%s3896_s2 + $0x400] sm:$0xff] }
  0x63   :  { %1853 = vmatpush.bf16.msrb.mxu2 %v3072_v42  ;;  %1822 = vmatmul.bf16.vlgmr.msra.gmra.mxu3 %v450_v52  ;;  %v3091_v42 = vld [vmem:[%s3896_s2 + $0x450] sm:$0xff]  ;;  %v3136_v52 = vld [vmem:[%s3896_s2 + $0x5b8] sm:$0xff] }
  0x64   :  { %1866 = vmatpush.bf16.msrb.mxu3 %v3080_v43  ;;  %1796 = vmatmul.bf16.vlgmr.msra.gmra.mxu1 %v448_v49  ;;  %v3082_v43 = vld [vmem:[%s3896_s2 + $0x408] sm:$0xff]  ;;  %v3105_v49 = vld [vmem:[%s3896_s2 + $0x4c0] sm:$0xff] }
  0x65   :  { %1840 = vmatpush.bf16.msrb.mxu1 %v3064_v48  ;;  %v3097_v48 = vld [vmem:[%s3896_s2 + $0x480] sm:$0xff] }
  0x66   :  { %1828 = vmatpush.bf16.msrb.mxu0 %v3055_v50  ;;  %v38_v50 = vld [vmem:[%s3897_s0 + $0x18] sm:$0x1] }
  0x67   :  { %1854 = vmatpush.bf16.msrb.mxu2 %v3071_v51  ;;  %v3120_v51 = vld [vmem:[%s3896_s2 + $0x538] sm:$0xff] }
  0x68   :  { %1867 = vmatpush.bf16.msrb.mxu3 %v3079_v53  ;;  %v3144_v53 = vld [vmem:[%s3896_s2 + $0x5f8] sm:$0xff] }
  0x69   :  { %1841 = vmatpush.bf16.msrb.mxu1 %v3063_v58  ;;  %v458_v58 = vld [vmem:[#allocation1 + $0x9] sm:$0xff] }
  0x6a   :  { %1829 = vmatpush.bf16.msrb.mxu0 %v3054_v59  ;;  %v460_v59 = vld [vmem:[#allocation1 + $0x1b] sm:$0xff] }
  0x6b   :  { %1855 = vmatpush.bf16.msrb.mxu2 %v3070_v60  ;;  %v3119_v60 = vld [vmem:[%s3896_s2 + $0x530] sm:$0xff] }
  0x6c   :  { %1868 = vmatpush.bf16.msrb.mxu3 %v3078_v61  ;;  %v3746_v61 = vld [vmem:[#allocation1 + $0x24] sm:$0xff] }
  0x6d   :  { %1842 = vmatpush.bf16.msrb.mxu1 %v3062_v62  ;;  %v3748_v62 = vld [vmem:[#allocation1 + $0x36] sm:$0xff] }
  0x6e   :  { %1830 = vmatpush.bf16.msrb.mxu0 %v3053_v63  ;;  %v3750_v63 = vld [vmem:[#allocation1 + $0x3f] sm:$0xff] }
  0x6f   :  { %1856 = vmatpush.bf16.msrb.mxu2 %v3069_v0  ;;  %v3752_v0 = vld [vmem:[#allocation1 + $0x2d] sm:$0xff] }
  0x70   :  { %1869 = vmatpush.bf16.msrb.mxu3 %v3077_v1  ;;  %v3135_v1 = vld [vmem:[%s3896_s2 + $0x5b0] sm:$0xff] }
  0x71   :  { %1843 = vmatpush.bf16.msrb.mxu1 %v3061_v2  ;;  %v3143_v2 = vld [vmem:[%s3896_s2 + $0x5f0] sm:$0xff] }
  0x72   :  { %1831 = vmatpush.bf16.msrb.mxu0 %v3052_v3  ;;  %v3127_v3 = vld [vmem:[%s3896_s2 + $0x570] sm:$0xff] }
  0x73   :  { %1857 = vmatpush.bf16.msrb.mxu2 %v3068_v4  ;;  %v3118_v4 = vld [vmem:[%s3896_s2 + $0x528] sm:$0xff] }
  0x74   :  { %1870 = vmatpush.bf16.msrb.mxu3 %v3076_v5  ;;  %v3134_v5 = vld [vmem:[%s3896_s2 + $0x5a8] sm:$0xff] }
  0x75   :  { %1844 = vmatpush.bf16.msrb.mxu1 %v3060_v6  ;;  %v3142_v6 = vld [vmem:[%s3896_s2 + $0x5e8] sm:$0xff] }
  0x76   :  { %1832 = vmatpush.bf16.msrb.mxu0 %v3051_v7  ;;  %v3164_v7 = vld [vmem:[%s3898_s4] ss:$0 sm:$0xff] }
  0x77   :  { %1858 = vmatpush.bf16.msrb.mxu2 %v3067_v8  ;;  %v3126_v8 = vld [vmem:[%s3896_s2 + $0x568] sm:$0xff] }
  0x78   :  { %1871 = vmatpush.bf16.msrb.mxu3 %v3075_v9  ;;  %v3117_v9 = vld [vmem:[%s3896_s2 + $0x520] sm:$0xff] }
  0x79   :  { %1845 = vmatpush.bf16.msrb.mxu1 %v3059_v10  ;;  %v3133_v10 = vld [vmem:[%s3896_s2 + $0x5a0] sm:$0xff] }
  0x7a   :  { %1833 = vmatpush.bf16.msrb.mxu0 %v3050_v11  ;;  %v3141_v11 = vld [vmem:[%s3896_s2 + $0x5e0] sm:$0xff] }
  0x7b   :  { %1859 = vmatpush.bf16.msrb.mxu2 %v3066_v12 }
  0x7c   :  { %1872 = vmatpush.bf16.msrb.mxu3 %v3074_v13 }
  0x7d   :  { %1846 = vmatpush.bf16.msrb.mxu1 %v3058_v14  ;;  %v3125_v14 = vld [vmem:[%s3896_s2 + $0x560] sm:$0xff] }
  0x7e   :  { %1834 = vmatpush.bf16.msrb.mxu0 %v3049_v15  ;;  %v3116_v15 = vld [vmem:[%s3896_s2 + $0x518] sm:$0xff] }
  0x7f   :  { %1860 = vmatpush.bf16.msrb.mxu2 %v3065_v16 }
  0x80   :  { %1873 = vmatpush.bf16.msrb.mxu3 %v3073_v18  ;;  %v3140_v18 = vld [vmem:[%s3896_s2 + $0x5d8] sm:$0xff] }
  0x81   :  { %1847 = vmatpush.bf16.msrb.mxu1 %v3057_v21  ;;  %1835 = vmatmul.bf16.vlgmr.msrb.gmra.mxu0 %v3545_v54  ;;  %v3089_v54 = vld [vmem:[%s3896_s2 + $0x440] sm:$0xff]  ;;  %v3124_v21 = vld [vmem:[%s3896_s2 + $0x558] sm:$0xff] }
  0x82   :  { %1879 = vmatpush.bf16.msra.mxu0 %v3088_v17  ;;  %1861 = vmatmul.bf16.vlgmr.msrb.gmra.mxu2 %v3547_v55  ;;  %v457_v55 = vld [vmem:[#allocation1] sm:$0xff]  ;;  %v3132_v17 = vld [vmem:[%s3896_s2 + $0x598] sm:$0xff] }
  0x83   :  { %1905 = vmatpush.bf16.msra.mxu2 %v3104_v19  ;;  %1874 = vmatmul.bf16.vlgmr.msrb.gmra.mxu3 %v3551_v57  ;;  %v3128_v57 = vld [vmem:[%s3896_s2 + $0x578] sm:$0xff] }
  0x84   :  { %1918 = vmatpush.bf16.msra.mxu3 %v3112_v20  ;;  %1848 = vmatmul.bf16.vlgmr.msrb.gmra.mxu1 %v3549_v56  ;;  %v459_v56 = vld [vmem:[#allocation1 + $0x12] sm:$0xff] }
  0x85   :  { %1892 = vmatpush.bf16.msra.mxu1 %v3096_v22  ;;  %466 = vst [vmem:[#allocation1] ss:$9 sm:$0xff] %v38_v50 }
  0x86   :  { %1880 = vmatpush.bf16.msra.mxu0 %v3087_v23  ;;  %v1996_v23 = vld [vmem:[%s3899_s1] sm:$0x3] }
  0x87   :  { %1906 = vmatpush.bf16.msra.mxu2 %v3103_v24  ;;  %v3115_v24 = vld [vmem:[%s3896_s2 + $0x510] sm:$0xff] }
  0x88   :  { %1919 = vmatpush.bf16.msra.mxu3 %v3111_v25 }
  0x89   :  { %1893 = vmatpush.bf16.msra.mxu1 %v3095_v26  ;;  %v3171_v26 = vmov 0  }
  0x8a   :  { %1881 = vmatpush.bf16.msra.mxu0 %v3086_v27  ;;  %3160 = vset.pattern.permute.xlu0 %v3171_v26  ;;  %v3131_v27 = vld [vmem:[%s3896_s2 + $0x590] sm:$0xff] }
  0x8b   :  { %1907 = vmatpush.bf16.msra.mxu2 %v3102_v28  ;;  %v3139_v28 = vld [vmem:[%s3896_s2 + $0x5d0] sm:$0xff]  ;;  %2000 = vperm.xlu0 %3160, %v1996_v23  }
  0x8c   :  { %1920 = vmatpush.bf16.msra.mxu3 %v3110_v29 }
  0x8d   :  { %1894 = vmatpush.bf16.msra.mxu1 %v3094_v30 }
  0x8e   :  { %1882 = vmatpush.bf16.msra.mxu0 %v3085_v31  ;;  %v3172_v31 = vmov 2  }
  0x8f   :  { %1908 = vmatpush.bf16.msra.mxu2 %v3101_v32  ;;  %3162 = vset.pattern.permute.xlu1 %v3172_v31  ;;  %v3123_v32 = vld [vmem:[%s3896_s2 + $0x550] sm:$0xff] }
  0x90   :  { %1921 = vmatpush.bf16.msra.mxu3 %v3109_v33  ;;  %2014 = vperm.xlu1 %3162, %v1996_v23   ;;  %v3114_v33 = vld [vmem:[%s3896_s2 + $0x508] sm:$0xff] }
  0x91   :  { %1895 = vmatpush.bf16.msra.mxu1 %v3093_v34 }
  0x92   :  { %1883 = vmatpush.bf16.msra.mxu0 %v3084_v35  ;;  %v3130_v35 = vld [vmem:[%s3896_s2 + $0x588] sm:$0xff] }
  0x93   :  { %1909 = vmatpush.bf16.msra.mxu2 %v3100_v36  ;;  %v3138_v36 = vld [vmem:[%s3896_s2 + $0x5c8] sm:$0xff] }
  0x94   :  { %1922 = vmatpush.bf16.msra.mxu3 %v3108_v37 }
  0x95   :  { %1896 = vmatpush.bf16.msra.mxu1 %v3092_v38  ;;  %v3122_v38 = vld [vmem:[%s3896_s2 + $0x548] sm:$0xff] }
  0x96   :  { %1884 = vmatpush.bf16.msra.mxu0 %v3083_v39  ;;  %v3113_v39 = vld [vmem:[%s3896_s2 + $0x500] sm:$0xff] }
  0x97   :  { %1910 = vmatpush.bf16.msra.mxu2 %v3099_v40 }
  0x98   :  { %1923 = vmatpush.bf16.msra.mxu3 %v3107_v41  ;;  %v3129_v41 = vld [vmem:[%s3896_s2 + $0x580] sm:$0xff] }
  0x99   :  { %1897 = vmatpush.bf16.msra.mxu1 %v3091_v42  ;;  %v3137_v42 = vld [vmem:[%s3896_s2 + $0x5c0] sm:$0xff] }
  0x9a   :  { %1885 = vmatpush.bf16.msra.mxu0 %v3082_v43  ;;  %v3148_v43 = vld [vmem:[%s3896_s2 + $0x618] sm:$0xff] }
  0x9b   :  { %1911 = vmatpush.bf16.msra.mxu2 %v3098_v44  ;;  %v3173_v44 = vmov 1  }
  0x9c   :  { %1924 = vmatpush.bf16.msra.mxu3 %v3106_v45  ;;  %3161 = vset.pattern.permute.xlu0 %v3173_v44  ;;  %v3121_v45 = vld [vmem:[%s3896_s2 + $0x540] sm:$0xff] }
  0x9d   :  { %1898 = vmatpush.bf16.msra.mxu1 %v3090_v46  ;;  %2007 = vperm.xlu0 %3161, %v1996_v23   ;;  %v3147_v46 = vld [vmem:[%s3896_s2 + $0x610] sm:$0xff] }
  0x9e   :  { %1886 = vmatpush.bf16.msra.mxu0 %v3081_v47  ;;  %v1680_v12 = vpop.f32.mrf.mxu0  ;;  %v3146_v47 = vld [vmem:[%s3896_s2 + $0x608] sm:$0xff] }
  0x9f   :  { %1912 = vmatpush.bf16.msra.mxu2 %v3097_v48  ;;  %v1681_v13 = vadd.f32 %v3164_v7, %v1680_v12  ;;  %v3145_v48 = vld [vmem:[%s3896_s2 + $0x600] sm:$0xff] }
  0xa0   :  { %1925 = vmatpush.bf16.msra.mxu3 %v3105_v49 }
  0xa1   :  { %1899 = vmatpush.bf16.msra.mxu1 %v3089_v54  ;;  %1887 = vmatmul.bf16.vlgmr.msra.gmra.mxu0 %v457_v55  ;;  %v1693_v16 = vpop.f32.mrf.mxu1 }
  0xa2   :  { %1931 = vmatpush.bf16.msrb.mxu0 %v3120_v51  ;;  %1913 = vmatmul.bf16.vlgmr.msra.gmra.mxu2 %v459_v56  ;;  %v1694_v19 = vadd.f32 %v1693_v16, %v1681_v13 }
  0xa3   :  { %1957 = vmatpush.bf16.msrb.mxu2 %v3136_v52  ;;  %1926 = vmatmul.bf16.vlgmr.msra.gmra.mxu3 %v460_v59 }
  0xa4   :  { %1970 = vmatpush.bf16.msrb.mxu3 %v3144_v53  ;;  %1900 = vmatmul.bf16.vlgmr.msra.gmra.mxu1 %v458_v58  ;;  %v467_v53 = vld [vmem:[#allocation1] sm:$0xff] }
  0xa5   :  { %1944 = vmatpush.bf16.msrb.mxu1 %v3128_v57  ;;  %v1706_v20 = vpop.f32.mrf.mxu2  ;;  %3163 = vset.pattern.permute.xlu0 %v3172_v31 }
  0xa6   :  { %1932 = vmatpush.bf16.msrb.mxu0 %v3119_v60  ;;  %v1707_v22 = vadd.f32 %v1706_v20, %v1694_v19  ;;  %v1719_v25 = vpop.f32.mrf.mxu3  ;;  %v1682_v30 = vpop.f32.mrf.mxu0 }
  0xa7   :  { %1958 = vmatpush.bf16.msrb.mxu2 %v3135_v1  ;;  %v3151_v30 = vld [vmem:[%s3901_s5 + $0x10] sm:$0xff] }
  0xa8   :  { %1971 = vmatpush.bf16.msrb.mxu3 %v3143_v2  ;;  %v1720_v29 = vadd.f32 %v1719_v25, %v1707_v22 }
  0xa9   :  { %1945 = vmatpush.bf16.msrb.mxu1 %v3127_v3  ;;  %v1695_v34 = vpop.f32.mrf.mxu1 }
  0xaa   :  { %1933 = vmatpush.bf16.msrb.mxu0 %v3118_v4 }
  0xab   :  { %1959 = vmatpush.bf16.msrb.mxu2 %v3134_v5 }
  0xac   :  { %1972 = vmatpush.bf16.msrb.mxu3 %v3142_v6 }
  0xad   :  { %1946 = vmatpush.bf16.msrb.mxu1 %v3126_v8  ;;  %v1708_v37 = vpop.f32.mrf.mxu2 }
  0xae   :  { %1934 = vmatpush.bf16.msrb.mxu0 %v3117_v9  ;;  %v1721_v40 = vpop.f32.mrf.mxu3 }
  0xaf   :  { %1960 = vmatpush.bf16.msrb.mxu2 %v3133_v10 }
  0xb0   :  { %1973 = vmatpush.bf16.msrb.mxu3 %v3141_v11 }
  0xb1   :  { %1947 = vmatpush.bf16.msrb.mxu1 %v3125_v14 }
  0xb2   :  { %1935 = vmatpush.bf16.msrb.mxu0 %v3116_v15 }
  0xb3   :  { %1961 = vmatpush.bf16.msrb.mxu2 %v3132_v17 }
  0xb4   :  { %1974 = vmatpush.bf16.msrb.mxu3 %v3140_v18 }
  0xb5   :  { %1948 = vmatpush.bf16.msrb.mxu1 %v3124_v21 }
  0xb6   :  { %1936 = vmatpush.bf16.msrb.mxu0 %v3115_v24 }
  0xb7   :  { %1962 = vmatpush.bf16.msrb.mxu2 %v3131_v27 }
  0xb8   :  { %1975 = vmatpush.bf16.msrb.mxu3 %v3139_v28  ;;  %v3152_v28 = vld [vmem:[%s3901_s5 + $0x18] sm:$0xff] }
  0xb9   :  { %1949 = vmatpush.bf16.msrb.mxu1 %v3123_v32 }
  0xba   :  { %1937 = vmatpush.bf16.msrb.mxu0 %v3114_v33  ;;  %v3150_v33 = vld [vmem:[%s3901_s5 + $0x8] sm:$0xff] }
  0xbb   :  { %1963 = vmatpush.bf16.msrb.mxu2 %v3130_v35  ;;  %v3149_v35 = vld [vmem:[%s3901_s5] sm:$0xff] }
  0xbc   :  { %1976 = vmatpush.bf16.msrb.mxu3 %v3138_v36 }
  0xbd   :  { %1950 = vmatpush.bf16.msrb.mxu1 %v3122_v38  ;;  %v3156_v38 = vld [vmem:[%s3902_s7 + $0x18] sm:$0xff] }
  0xbe   :  { %1938 = vmatpush.bf16.msrb.mxu0 %v3113_v39  ;;  %v1732_v49 = vpop.f32.mrf.mxu0 }
  0xbf   :  { %1964 = vmatpush.bf16.msrb.mxu2 %v3129_v41  ;;  %v1733_v50 = vadd.f32 %v1732_v49, %v1720_v29 }
  0xc0   :  { %1977 = vmatpush.bf16.msrb.mxu3 %v3137_v42 }
  0xc1   :  { %1951 = vmatpush.bf16.msrb.mxu1 %v3121_v45  ;;  %1939 = vmatmul.bf16.vlgmr.msrb.gmra.mxu0 %v3746_v61  ;;  %v1745_v51 = vpop.f32.mrf.mxu1 }
  0xc2   :  { %1987 = vmatpush.bf16.msra.mxu0 %v3148_v43  ;;  %1965 = vmatmul.bf16.vlgmr.msrb.gmra.mxu2 %v3748_v62  ;;  %v1746_v52 = vadd.f32 %v1745_v51, %v1733_v50 }
  0xc3   :  { %1978 = vmatmul.bf16.vlgmr.msrb.gmra.mxu3 %v3750_v63  ;;  %2119 = vmatpush.bf16.msra.mxu2 %v3156_v38 }
  0xc4   :  { %1952 = vmatmul.bf16.vlgmr.msrb.gmra.mxu1 %v3752_v0 }
  0xc5   :  { %v1758_v54 = vpop.f32.mrf.mxu2  ;;  %2065 = vmatpush.bf16.msra.mxu1 %v3152_v28 }
  0xc6   :  { %1988 = vmatpush.bf16.msra.mxu0 %v3147_v46  ;;  %v1759_v55 = vadd.f32 %v1758_v54, %v1746_v52  ;;  %v1771_v56 = vpop.f32.mrf.mxu3  ;;  %v1734_v58 = vpop.f32.mrf.mxu0 }
  0xc8   :  { %v1772_v57 = vadd.f32 %v1771_v56, %v1759_v55 }
  0xc9   :  { %v1747_v59 = vpop.f32.mrf.mxu1  ;;  %2066 = vmatpush.bf16.msra.mxu1 %v3151_v30 }
  0xca   :  { %1989 = vmatpush.bf16.msra.mxu0 %v3146_v47  ;;  %v1997_v47 = vld [vmem:[%s3903_s3] sm:$0x7] }
  0xcb   :  { %v2003_v50 = vperm.slane %v1997_v47, 0  ;;  %v2010_v51 = vperm.slane %v1997_v47, 1  ;;  %v2017_v56 = vperm.slane %v1997_v47, 2 }
  0xcd   :  { %v1760_v60 = vpop.f32.mrf.mxu2  ;;  %2067 = vmatpush.bf16.msra.mxu1 %v3150_v33 }
  0xce   :  { %1990 = vmatpush.bf16.msra.mxu0 %v3145_v48  ;;  %v1773_v61 = vpop.f32.mrf.mxu3 }
  0xd1   :  { %2918 = vmatmul.msk.bf16.vlgmr.msra.gmra.mxu0 %vm1668_vm0, %v467_v53  ;;  %2068 = vmatpush.bf16.msra.mxu1 %v3149_v35 }
  0xde   :  { %v1784_v62 = vpop.f32.mrf.mxu0 }
  0xdf   :  { %v1785_v63 = vadd.f32 %v1784_v62, %v1772_v57 }
  0xe1   :  { %v1797_v0 = vpop.f32.mrf.mxu1 }
  0xe2   :  { %v1798_v1 = vadd.f32 %v1797_v0, %v1785_v63 }
  0xe5   :  { %v1810_v2 = vpop.f32.mrf.mxu2 }
  0xe6   :  { %v1811_v3 = vadd.f32 %v1810_v2, %v1798_v1  ;;  %v1823_v4 = vpop.f32.mrf.mxu3  ;;  %v1786_v5 = vpop.f32.mrf.mxu0 }
  0xe7   :  { %v3155_v5 = vld [vmem:[%s3902_s7 + $0x10] sm:$0xff] }
  0xe8   :  { %v1824_v6 = vadd.f32 %v1823_v4, %v1811_v3  ;;  %2120 = vmatpush.bf16.msra.mxu2 %v3155_v5 }
  0xe9   :  { %v1799_v7 = vpop.f32.mrf.mxu1 }
  0xea   :  { %v3153_v7 = vld [vmem:[%s3902_s7] sm:$0xff] }
  0xed   :  { %v1812_v8 = vpop.f32.mrf.mxu2 }
  0xee   :  { %v1825_v9 = vpop.f32.mrf.mxu3  ;;  %v14_v8 = vstv %s3904_s8 }
  0xef   :  { %15 = vst [vmem:[#allocation2] sm:$0x1] %v14_v8  ;;  %v3165_v9 = vld [vmem:[%s3900_s6] ss:$0 sm:$0xff] }
  0xfd   :  { %v2001_v41 = vpop.permute.xlu0 %2000 }
  0xfe   :  { %v1836_v10 = vpop.f32.mrf.mxu0  ;;  %v2004_v59 = vmul.f32 %v2003_v50, %v2001_v41 }
  0xff   :  { %v1837_v23 = vadd.f32 %v1836_v10, %v1824_v6  ;;  %v3154_v6 = vld [vmem:[%s3902_s7 + $0x8] sm:$0xff] }
 0x100   :  { %2121 = vmatpush.bf16.msra.mxu2 %v3154_v6 }
 0x101   :  { %v1849_v11 = vpop.f32.mrf.mxu1 }
 0x102   :  { %v1850_v25 = vadd.f32 %v1849_v11, %v1837_v23  ;;  %v2015_v58 = vpop.permute.xlu1 %2014 }
 0x103   :  { %v2018_v63 = vmul.f32 %v2017_v56, %v2015_v58 }
 0x104   :  { %2122 = vmatpush.bf16.msra.mxu2 %v3153_v7 }
 0x105   :  { %v1862_v12 = vpop.f32.mrf.mxu2 }
 0x106   :  { %v1875_v13 = vpop.f32.mrf.mxu3  ;;  %v1838_v14 = vpop.f32.mrf.mxu0  ;;  %v1863_v29 = vadd.f32 %v1862_v12, %v1850_v25 }
 0x108   :  { %v1876_v31 = vadd.f32 %v1875_v13, %v1863_v29 }
 0x109   :  { %v1851_v15 = vpop.f32.mrf.mxu1 }
 0x10a   :  { %v3166_v15 = vld [vmem:[#allocation2] ss:$0 sm:$0xff] }
 0x10d   :  { %v1864_v16 = vpop.f32.mrf.mxu2 }
 0x10e   :  { %v1877_v17 = vpop.f32.mrf.mxu3 }
 0x10f   :  { %v2008_v52 = vpop.permute.xlu0 %2007 }
 0x110   :  { %v2011_v61 = vmul.f32 %v2010_v51, %v2008_v52 }
 0x11e   :  { %v1888_v18 = vpop.f32.mrf.mxu0 }
 0x11f   :  { %v1889_v32 = vadd.f32 %v1888_v18, %v1876_v31 }
 0x121   :  { %v1901_v19 = vpop.f32.mrf.mxu1 }
 0x122   :  { %v1902_v34 = vadd.f32 %v1901_v19, %v1889_v32 }
 0x125   :  { %v1914_v20 = vpop.f32.mrf.mxu2 }
 0x126   :  { %v1927_v21 = vpop.f32.mrf.mxu3  ;;  %v1890_v22 = vpop.f32.mrf.mxu0  ;;  %v1915_v36 = vadd.f32 %v1914_v20, %v1902_v34 }
 0x128   :  { %v1928_v39 = vadd.f32 %v1927_v21, %v1915_v36 }
 0x129   :  { %v1903_v24 = vpop.f32.mrf.mxu1 }
 0x12d   :  { %v1916_v26 = vpop.f32.mrf.mxu2 }
 0x12e   :  { %v1929_v27 = vpop.f32.mrf.mxu3 }
 0x13e   :  { %v1940_v37 = vpop.f32.mrf.mxu0 }
 0x13f   :  { %v1941_v42 = vadd.f32 %v1940_v37, %v1928_v39 }
 0x141   :  { %v1953_v40 = vpop.f32.mrf.mxu1 }
 0x142   :  { %v1954_v46 = vadd.f32 %v1953_v40, %v1941_v42 }
 0x145   :  { %v1966_v43 = vpop.f32.mrf.mxu2 }
 0x146   :  { %v1979_v44 = vpop.f32.mrf.mxu3  ;;  %v1942_v45 = vpop.f32.mrf.mxu0  ;;  %v1967_v48 = vadd.f32 %v1966_v43, %v1954_v46 }
 0x148   :  { %v1980_v53 = vadd.f32 %v1979_v44, %v1967_v48 }
 0x149   :  { %v1955_v49 = vpop.f32.mrf.mxu1 }
 0x14d   :  { %v1968_v54 = vpop.f32.mrf.mxu2 }
 0x14e   :  { %v1981_v55 = vpop.f32.mrf.mxu3  ;;  %v1992_v57 = vpop.f32.mrf.mxu0 }
 0x14f   :  { %v1993_v60 = vadd.f32 %v1992_v57, %v1980_v53 }
 0x151   :  { %v2005_v62 = vadd.f32 %v2004_v59, %v1993_v60 }
 0x153   :  { %v2012_v0 = vadd.f32 %v2011_v61, %v2005_v62 }
 0x155   :  { %v2019_v1 = vadd.f32 %v2018_v63, %v2012_v0 }
 0x156   :  { %v1994_v2 = vpop.f32.mrf.mxu0 }
 0x157   :  { %3167 = vtanh.f32 %v2019_v1 }
 0x15d   :  { %v3168_v3 = vpop.eup %3167 }
 0x15e   :  { %v2021_v4 = vpack.c.bf16 %v3168_v3, %v3168_v3 }
 0x160   :  { %2935 = vmatmul.msk.bf16.vlgmr.msra.gmra.mxu1 %vm1668_vm0, %v2021_v4 }
 0x1dd   :  { %v2070_v10 = vpop.f32.mrf.mxu1 }
 0x1de   :  { %v2071_v11 = vadd.f32 %v3165_v9, %v2070_v10 }
 0x1e0   :  { %3169 = vtanh.f32 %v2071_v11 }
 0x1e5   :  { %v2072_v12 = vpop.f32.mrf.mxu1 }
 0x1e6   :  { %v3170_v13 = vpop.eup %3169 }
 0x1e7   :  { %v2075_v14 = vpack.c.bf16 %v3170_v13, %v3170_v13 }
 0x1e9   :  { %2952 = vmatmul.msk.bf16.vlgmr.msra.gmra.mxu2 %vm1668_vm0, %v2075_v14 }
 0x26c   :  { %v2124_v16 = vpop.f32.mrf.mxu2 }
 0x26d   :  { %v2125_v17 = vadd.f32 %v3166_v15, %v2124_v16 }
 0x26f   :  { %2129 = vst.msk [vmem:[%s3905_s9] sm:$0x3] %vm2128_vm1, %v2125_v17 }
 0x274   :  { %v2126_v18 = vpop.f32.mrf.mxu2 }

</bundles_post_ra>
